<compile_context>
chip_gen: v6e
topology: v6e:2x2x1
jax: 0.10.0
libtpu: 0.0.40
codegen_flags: <defaults>
</compile_context>

<pallas_src>
import numpy as np
import jax
import jax.numpy as jnp
from jax.experimental import pallas as pl
from jax.experimental.pallas import tpu as pltpu


def _haar_matrix(n, scale):
    """(n, n): top n/2 rows = Haar lowpass pairs, bottom n/2 = highpass."""
    m = np.zeros((n, n), np.float32)
    i = np.arange(n // 2)
    m[i, 2 * i] = scale
    m[i, 2 * i + 1] = scale
    m[n // 2 + i, 2 * i] = -scale
    m[n // 2 + i, 2 * i + 1] = scale
    return jnp.asarray(m)


def _haar_pyramid_kernel(x1_ref, x2_ref, r1_ref, c1_ref, r2_ref, c2_ref,
                         r3_ref, c3_ref,
                         y1f_ref, y2f_ref, y3f_ref,
                         y1s_ref, y2s_ref, y3s_ref):
    """(Bblk,H,W) planes of x1/x2 -> 3 Haar quadrant slabs [LL LH; HL HH] each."""
    r1, c1 = r1_ref[...], c1_ref[...]
    r2, c2 = r2_ref[...], c2_ref[...]
    r3, c3 = r3_ref[...], c3_ref[...]
    h2, w2 = r2.shape[0], c2.shape[0]
    h4, w4 = r3.shape[0], c3.shape[0]

    def pyramid(x, y1_ref, y2_ref, y3_ref):
        bblk, h, w = x.shape
        # Level-1 column transform: all planes of the block folded into ONE
        # MXU matmul (M = bblk*h) instead of bblk tiny (h,w)@(w,w) calls.
        xc = jnp.dot(x.reshape(bblk * h, w), c1,
                     preferred_element_type=jnp.float32).reshape(bblk, h, w)
        for b in range(bblk):                      # short, statically unrolled
            y1 = jnp.dot(r1, xc[b], preferred_element_type=jnp.float32)
            y1_ref[b] = y1
            # AvgPool2d(2,2) == 0.5 * LL quadrant; the 0.5 is pre-folded into
            # r2/r3 (scale 0.25), so LL feeds the next level directly with no
            # VPU scale sweep and no materialized avg temporary.
            y2 = jnp.dot(
                jnp.dot(r2, y1[:h2, :w2], preferred_element_type=jnp.float32),
                c2, preferred_element_type=jnp.float32)
            y2_ref[b] = y2
            y3_ref[b] = jnp.dot(
                jnp.dot(r3, y2[:h4, :w4], preferred_element_type=jnp.float32),
                c3, preferred_element_type=jnp.float32)

    pyramid(x1_ref[...], y1f_ref, y2f_ref, y3f_ref)
    pyramid(x2_ref[...], y1s_ref, y2s_ref, y3s_ref)


def _choose_grid(n, h, w, vmem_budget_bytes=16 << 20):
    """Pick (grid_len, planes_per_step).

    Prefer >= 2 grid steps when the batch allows it (v7x has 2 TensorCores on
    a 'parallel' axis), while batching enough planes per step to amortize the
    ~0.35us/step pipeline overhead and keeping the per-step working set
    (double-buffered 2 inputs + 6 outputs) inside the VMEM budget.
    """
    plane_bytes = h * w * 4
    max_planes = max(1, vmem_budget_bytes // (16 * plane_bytes))
    min_steps = 2 if n >= 2 else 1
    for g in range(1, n + 1):
        if n % g == 0 and g >= min_steps and (n // g) <= max_planes:
            return g, n // g
    return n, 1


def hdr_wave_decompose_pallas(x1, x2):
    """Pallas implementation of HDRWaveEnDe_simple_decompose.forward.

    x1, x2: (N, 1, H, W) float32.  Returns the `skips` dict of the module:
    keys fir_pool{1,2,3} / sec_pool{1,2,3}, each a list [LL, LH, HL, HH]
    of (N, 1, h, w) arrays.
    """
    N, C, H, W = x1.shape
    assert C == 1 and x2.shape == x1.shape
    assert H % 8 == 0 and W % 8 == 0, "need 3 clean 2x2 decimation levels"
    H2, W2, H4, W4 = H // 2, W // 2, H // 4, W // 4

    # (N,1,H,W) -> (N,H,W) is a free reshape; no concat / no HBM copy.
    x1p = x1.reshape(N, H, W).astype(jnp.float32)
    x2p = x2.reshape(N, H, W).astype(jnp.float32)

    # Row transforms carry the 0.5 Haar coefficient (0.25 at levels 2/3: the
    # avgpool 0.5 is folded in); column transforms carry the +/-1 signs.
    r1 = _haar_matrix(H, 0.5)
    c1 = _haar_matrix(W, 1.0).T
    r2 = _haar_matrix(H2, 0.25)
    c2 = _haar_matrix(W2, 1.0).T
    r3 = _haar_matrix(H4, 0.25)
    c3 = _haar_matrix(W4, 1.0).T

    g, bblk = _choose_grid(N, H, W)

    # Advisory cost estimate (per plane: two matmuls per level).
    per_plane_flops = sum(2 * h * w * w + 2 * h * h * w
                          for (h, w) in ((H, W), (H2, W2), (H4, W4)))
    flops = int(2 * N * per_plane_flops)
    bytes_accessed = int(4 * (2 * N * H * W
                              + 2 * N * (H * W + H2 * W2 + H4 * W4)
                              + (H * H + W * W + H2 * H2 + W2 * W2
                                 + H4 * H4 + W4 * W4)))
    cost = pl.CostEstimate(flops=flops, transcendentals=0,
                           bytes_accessed=bytes_accessed)

    # Raise the scoped VMEM cap only if the (double-buffered) working set
    # would exceed the default (16/32 MiB depending on generation).
    fp32 = 4
    consts_bytes = (H * H + W * W + H2 * H2 + W2 * W2 + H4 * H4 + W4 * W4) * fp32
    block_bytes = (2 * bblk * H * W
                   + 2 * bblk * (H * W + H2 * W2 + H4 * W4)) * fp32
    vmem_need = 2 * block_bytes + 2 * consts_bytes
    cp_kwargs = dict(dimension_semantics=("parallel",))
    if vmem_need > (24 << 20):
        cp_kwargs["vmem_limit_bytes"] = int(min(vmem_need * 3 // 2 + (4 << 20),
                                                110 << 20))

    def build(use_buffered, use_cost):
        def const_spec(n):
            if use_buffered:
                # Constant matrices are fetched once; single-buffer them to
                # avoid reserving 2x VMEM for dead double buffers.
                return pl.BlockSpec((n, n), lambda i: (0, 0),
                                    pipeline_mode=pl.Buffered(1))
            return pl.BlockSpec((n, n), lambda i: (0, 0))

        grid_spec = pltpu.PrefetchScalarGridSpec(
            num_scalar_prefetch=0,
            grid=(g,),
            in_specs=[
                pl.BlockSpec((bblk, H, W), lambda i: (i, 0, 0)),
                pl.BlockSpec((bblk, H, W), lambda i: (i, 0, 0)),
                const_spec(H), const_spec(W),
                const_spec(H2), const_spec(W2),
                const_spec(H4), const_spec(W4),
            ],
            out_specs=[
                pl.BlockSpec((bblk, H, W), lambda i: (i, 0, 0)),
                pl.BlockSpec((bblk, H2, W2), lambda i: (i, 0, 0)),
                pl.BlockSpec((bblk, H4, W4), lambda i: (i, 0, 0)),
                pl.BlockSpec((bblk, H, W), lambda i: (i, 0, 0)),
                pl.BlockSpec((bblk, H2, W2), lambda i: (i, 0, 0)),
                pl.BlockSpec((bblk, H4, W4), lambda i: (i, 0, 0)),
            ],
        )
        kwargs = {}
        if use_cost:
            kwargs["cost_estimate"] = cost
        return pl.pallas_call(
            _haar_pyramid_kernel,
            out_shape=(
                jax.ShapeDtypeStruct((N, H, W), jnp.float32),
                jax.ShapeDtypeStruct((N, H2, W2), jnp.float32),
                jax.ShapeDtypeStruct((N, H4, W4), jnp.float32),
                jax.ShapeDtypeStruct((N, H, W), jnp.float32),
                jax.ShapeDtypeStruct((N, H2, W2), jnp.float32),
                jax.ShapeDtypeStruct((N, H4, W4), jnp.float32),
            ),
            grid_spec=grid_spec,
            compiler_params=pltpu.CompilerParams(**cp_kwargs),
            **kwargs,
        )

    # Prefer single-buffered constants + cost estimate; degrade gracefully if
    # this JAX build rejects either knob (perf-only options, same semantics).
    attempts = ((True, True), (False, True), (False, False))
    last_err = None
    outs = None
    for use_buffered, use_cost in attempts:
        try:
            outs = build(use_buffered, use_cost)(
                x1p, x2p, r1, c1, r2, c2, r3, c3)
            break
        except Exception as e:  # noqa: BLE001 - fall back to plainer specs
            last_err = e
    if outs is None:
        raise last_err
    y1f, y2f, y3f, y1s, y2s, y3s = outs

    # Quadrant slicing kept in the wrapper to preserve the module's output
    # contract (negligible at these sizes; for HD/4K emit subbands directly).
    def quadrants(y):
        h, w = y.shape[1] // 2, y.shape[2] // 2
        nchw = lambda a: a[:, None, :, :]                  # restore C=1
        return [nchw(y[:, :h, :w]), nchw(y[:, :h, w:]),
                nchw(y[:, h:, :w]), nchw(y[:, h:, w:])]

    return {
        'fir_pool1': quadrants(y1f), 'sec_pool1': quadrants(y1s),
        'fir_pool2': quadrants(y2f), 'sec_pool2': quadrants(y2s),
        'fir_pool3': quadrants(y3f), 'sec_pool3': quadrants(y3s),
    }


def hdr_wave_decompose_ref(x1, x2):
    """Pure-JAX reference matching the PyTorch forward (conv-based Haar)."""
    l = np.ones((1, 2), np.float64) / np.sqrt(2.0)
    h = l.copy()
    h[0, 0] = -h[0, 0]
    filt = {'LL': l.T * l, 'LH': l.T * h, 'HL': h.T * l, 'HH': h.T * h}

    def conv2(x, w):
        w = jnp.asarray(np.asarray(w, np.float32)).reshape(1, 1, 2, 2)
        return jax.lax.conv_general_dilated(
            x, w, window_strides=(2, 2), padding='VALID',
            dimension_numbers=("NCHW", "OIHW", "NCHW"),
            precision=jax.lax.Precision.HIGHEST)

    def avgpool(x):
        return conv2(x, np.full((2, 2), 0.25, np.float32))

    def wavepool(x):
        return [conv2(x, filt['LL']), conv2(x, filt['LH']),
                conv2(x, filt['HL']), conv2(x, filt['HH'])]

    res11 = avgpool(x1)
    res12 = avgpool(res11)
    res21 = avgpool(x2)
    res22 = avgpool(res21)
    return {
        'fir_pool1': wavepool(x1), 'sec_pool1': wavepool(x2),
        'fir_pool2': wavepool(res11), 'sec_pool2': wavepool(res21),
        'fir_pool3': wavepool(res12), 'sec_pool3': wavepool(res22),
    }


if __name__ == "__main__":
    key = jax.random.PRNGKey(0)
    k1, k2 = jax.random.split(key)

    N, C, H, W = 4, 1, 32, 32          # WavePool(1) => single-channel inputs
    x1 = jax.random.normal(k1, (N, C, H, W), jnp.float32)
    x2 = jax.random.normal(k2, (N, C, H, W), jnp.float32)

    skips = hdr_wave_decompose_pallas(x1, x2)
    skips = jax.block_until_ready(skips)

    ref = hdr_wave_decompose_ref(x1, x2)
    ref = jax.block_until_ready(ref)

    expected_hw = {1: (H // 2, W // 2), 2: (H // 4, W // 4), 3: (H // 8, W // 8)}
    for lvl in (1, 2, 3):
        for prefix in ('fir', 'sec'):
            name = f'{prefix}_pool{lvl}'
            for got, want in zip(skips[name], ref[name]):
                assert got.shape == (N, 1) + expected_hw[lvl], (name, got.shape)
                assert got.shape == want.shape, (name, got.shape, want.shape)
                err = float(jnp.max(jnp.abs(got - want)))
                assert err < 1e-4, (name, err)

    print("KERNEL_OK")
</pallas_src>

<mosaic_0001>
module attributes {stable_mosaic.version = 11 : i64} {
  func.func @_haar_pyramid_kernel(%arg0: i32, %arg1: memref<2x32x32xf32, #tpu.memory_space<vmem>>, %arg2: memref<2x32x32xf32, #tpu.memory_space<vmem>>, %arg3: memref<32x32xf32, #tpu.memory_space<vmem>>, %arg4: memref<32x32xf32, #tpu.memory_space<vmem>>, %arg5: memref<16x16xf32, #tpu.memory_space<vmem>>, %arg6: memref<16x16xf32, #tpu.memory_space<vmem>>, %arg7: memref<8x8xf32, #tpu.memory_space<vmem>>, %arg8: memref<8x8xf32, #tpu.memory_space<vmem>>, %arg9: memref<2x32x32xf32, #tpu.memory_space<vmem>>, %arg10: memref<2x16x16xf32, #tpu.memory_space<vmem>>, %arg11: memref<2x8x8xf32, #tpu.memory_space<vmem>>, %arg12: memref<2x32x32xf32, #tpu.memory_space<vmem>>, %arg13: memref<2x16x16xf32, #tpu.memory_space<vmem>>, %arg14: memref<2x8x8xf32, #tpu.memory_space<vmem>>) attributes {dimension_semantics = [#tpu.dimension_semantics<parallel>], iteration_bounds = array<i64: 2>, scalar_prefetch = 0 : i64, scratch_operands = 0 : i64, tpu.core_type = #tpu.core_type<tc>, window_params = [{transform_indices = @transform_0, window_bounds = array<i64: 2, 32, 32>}, {transform_indices = @transform_1, window_bounds = array<i64: 2, 32, 32>}, {pipeline_mode = #tpu.pipeline_mode<synchronous>, transform_indices = @transform_2, window_bounds = array<i64: 32, 32>}, {pipeline_mode = #tpu.pipeline_mode<synchronous>, transform_indices = @transform_3, window_bounds = array<i64: 32, 32>}, {pipeline_mode = #tpu.pipeline_mode<synchronous>, transform_indices = @transform_4, window_bounds = array<i64: 16, 16>}, {pipeline_mode = #tpu.pipeline_mode<synchronous>, transform_indices = @transform_5, window_bounds = array<i64: 16, 16>}, {pipeline_mode = #tpu.pipeline_mode<synchronous>, transform_indices = @transform_6, window_bounds = array<i64: 8, 8>}, {pipeline_mode = #tpu.pipeline_mode<synchronous>, transform_indices = @transform_7, window_bounds = array<i64: 8, 8>}, {transform_indices = @transform_8, window_bounds = array<i64: 2, 32, 32>}, {transform_indices = @transform_9, window_bounds = array<i64: 2, 16, 16>}, {transform_indices = @transform_10, window_bounds = array<i64: 2, 8, 8>}, {transform_indices = @transform_11, window_bounds = array<i64: 2, 32, 32>}, {transform_indices = @transform_12, window_bounds = array<i64: 2, 16, 16>}, {transform_indices = @transform_13, window_bounds = array<i64: 2, 8, 8>}]} {
    %c0 = arith.constant 0 : index
    %c0_0 = arith.constant 0 : index
    %0 = vector.load %arg3[%c0, %c0_0] : memref<32x32xf32, #tpu.memory_space<vmem>>, vector<32x32xf32>
    %c0_1 = arith.constant 0 : index
    %c0_2 = arith.constant 0 : index
    %1 = vector.load %arg4[%c0_1, %c0_2] : memref<32x32xf32, #tpu.memory_space<vmem>>, vector<32x32xf32>
    %c0_3 = arith.constant 0 : index
    %c0_4 = arith.constant 0 : index
    %2 = vector.load %arg5[%c0_3, %c0_4] : memref<16x16xf32, #tpu.memory_space<vmem>>, vector<16x16xf32>
    %c0_5 = arith.constant 0 : index
    %c0_6 = arith.constant 0 : index
    %3 = vector.load %arg6[%c0_5, %c0_6] : memref<16x16xf32, #tpu.memory_space<vmem>>, vector<16x16xf32>
    %c0_7 = arith.constant 0 : index
    %c0_8 = arith.constant 0 : index
    %4 = vector.load %arg7[%c0_7, %c0_8] : memref<8x8xf32, #tpu.memory_space<vmem>>, vector<8x8xf32>
    %c0_9 = arith.constant 0 : index
    %c0_10 = arith.constant 0 : index
    %5 = vector.load %arg8[%c0_9, %c0_10] : memref<8x8xf32, #tpu.memory_space<vmem>>, vector<8x8xf32>
    %c0_11 = arith.constant 0 : index
    %c0_12 = arith.constant 0 : index
    %c0_13 = arith.constant 0 : index
    %6 = vector.load %arg1[%c0_11, %c0_12, %c0_13] : memref<2x32x32xf32, #tpu.memory_space<vmem>>, vector<2x32x32xf32>
    %7 = vector.shape_cast %6 : vector<2x32x32xf32> to vector<64x32xf32>
    %cst = arith.constant dense<0.000000e+00> : vector<64x32xf32>
    %8 = tpu.matmul %7, %1, %cst {dimension_numbers = #tpu.dot_dimension_numbers<[1], [0], [0], [1], [0, 0, 1, 1], [], []>} : vector<64x32xf32>, vector<32x32xf32>, vector<64x32xf32> -> vector<64x32xf32>
    %9 = vector.shape_cast %8 : vector<64x32xf32> to vector<2x32x32xf32>
    %10 = vector.extract_strided_slice %9 {offsets = [0, 0, 0], sizes = [1, 32, 32], strides = [1, 1, 1]} : vector<2x32x32xf32> to vector<1x32x32xf32>
    %11 = vector.shape_cast %10 : vector<1x32x32xf32> to vector<32x32xf32>
    %cst_14 = arith.constant dense<0.000000e+00> : vector<32x32xf32>
    %12 = tpu.matmul %0, %11, %cst_14 {dimension_numbers = #tpu.dot_dimension_numbers<[1], [0], [0], [1], [0, 0, 1, 1], [], []>} : vector<32x32xf32>, vector<32x32xf32>, vector<32x32xf32> -> vector<32x32xf32>
    %c0_15 = arith.constant 0 : index
    %c0_16 = arith.constant 0 : index
    %c0_17 = arith.constant 0 : index
    %13 = vector.load %arg9[%c0_15, %c0_16, %c0_17] : memref<2x32x32xf32, #tpu.memory_space<vmem>>, vector<1x32x32xf32>
    %14 = vector.shape_cast %13 : vector<1x32x32xf32> to vector<32x32xf32>
    %15 = vector.shape_cast %12 : vector<32x32xf32> to vector<1x32x32xf32>
    tpu.vector_store %arg9[%c0_15, %c0_16, %c0_17], %15 {strides = array<i32>} : memref<2x32x32xf32, #tpu.memory_space<vmem>>, vector<1x32x32xf32>,
    %16 = vector.extract_strided_slice %12 {offsets = [0, 0], sizes = [16, 16], strides = [1, 1]} : vector<32x32xf32> to vector<16x16xf32>
    %cst_18 = arith.constant dense<0.000000e+00> : vector<16x16xf32>
    %17 = tpu.matmul %2, %16, %cst_18 {dimension_numbers = #tpu.dot_dimension_numbers<[1], [0], [0], [1], [0, 0, 1, 1], [], []>} : vector<16x16xf32>, vector<16x16xf32>, vector<16x16xf32> -> vector<16x16xf32>
    %cst_19 = arith.constant dense<0.000000e+00> : vector<16x16xf32>
    %18 = tpu.matmul %17, %3, %cst_19 {dimension_numbers = #tpu.dot_dimension_numbers<[1], [0], [0], [1], [0, 0, 1, 1], [], []>} : vector<16x16xf32>, vector<16x16xf32>, vector<16x16xf32> -> vector<16x16xf32>
    %c0_20 = arith.constant 0 : index
    %c0_21 = arith.constant 0 : index
    %c0_22 = arith.constant 0 : index
    %19 = vector.load %arg10[%c0_20, %c0_21, %c0_22] : memref<2x16x16xf32, #tpu.memory_space<vmem>>, vector<1x16x16xf32>
    %20 = vector.shape_cast %19 : vector<1x16x16xf32> to vector<16x16xf32>
    %21 = vector.shape_cast %18 : vector<16x16xf32> to vector<1x16x16xf32>
    tpu.vector_store %arg10[%c0_20, %c0_21, %c0_22], %21 {strides = array<i32>} : memref<2x16x16xf32, #tpu.memory_space<vmem>>, vector<1x16x16xf32>,
    %22 = vector.extract_strided_slice %18 {offsets = [0, 0], sizes = [8, 8], strides = [1, 1]} : vector<16x16xf32> to vector<8x8xf32>
    %cst_23 = arith.constant dense<0.000000e+00> : vector<8x8xf32>
    %23 = tpu.matmul %4, %22, %cst_23 {dimension_numbers = #tpu.dot_dimension_numbers<[1], [0], [0], [1], [0, 0, 1, 1], [], []>} : vector<8x8xf32>, vector<8x8xf32>, vector<8x8xf32> -> vector<8x8xf32>
    %cst_24 = arith.constant dense<0.000000e+00> : vector<8x8xf32>
    %24 = tpu.matmul %23, %5, %cst_24 {dimension_numbers = #tpu.dot_dimension_numbers<[1], [0], [0], [1], [0, 0, 1, 1], [], []>} : vector<8x8xf32>, vector<8x8xf32>, vector<8x8xf32> -> vector<8x8xf32>
    %c0_25 = arith.constant 0 : index
    %c0_26 = arith.constant 0 : index
    %c0_27 = arith.constant 0 : index
    %25 = vector.load %arg11[%c0_25, %c0_26, %c0_27] : memref<2x8x8xf32, #tpu.memory_space<vmem>>, vector<1x8x8xf32>
    %26 = vector.shape_cast %25 : vector<1x8x8xf32> to vector<8x8xf32>
    %27 = vector.shape_cast %24 : vector<8x8xf32> to vector<1x8x8xf32>
    tpu.vector_store %arg11[%c0_25, %c0_26, %c0_27], %27 {strides = array<i32>} : memref<2x8x8xf32, #tpu.memory_space<vmem>>, vector<1x8x8xf32>,
    %28 = vector.extract_strided_slice %9 {offsets = [1, 0, 0], sizes = [1, 32, 32], strides = [1, 1, 1]} : vector<2x32x32xf32> to vector<1x32x32xf32>
    %29 = vector.shape_cast %28 : vector<1x32x32xf32> to vector<32x32xf32>
    %cst_28 = arith.constant dense<0.000000e+00> : vector<32x32xf32>
    %30 = tpu.matmul %0, %29, %cst_28 {dimension_numbers = #tpu.dot_dimension_numbers<[1], [0], [0], [1], [0, 0, 1, 1], [], []>} : vector<32x32xf32>, vector<32x32xf32>, vector<32x32xf32> -> vector<32x32xf32>
    %c1 = arith.constant 1 : index
    %c0_29 = arith.constant 0 : index
    %c0_30 = arith.constant 0 : index
    %31 = vector.load %arg9[%c1, %c0_29, %c0_30] : memref<2x32x32xf32, #tpu.memory_space<vmem>>, vector<1x32x32xf32>
    %32 = vector.shape_cast %31 : vector<1x32x32xf32> to vector<32x32xf32>
    %33 = vector.shape_cast %30 : vector<32x32xf32> to vector<1x32x32xf32>
    tpu.vector_store %arg9[%c1, %c0_29, %c0_30], %33 {strides = array<i32>} : memref<2x32x32xf32, #tpu.memory_space<vmem>>, vector<1x32x32xf32>,
    %34 = vector.extract_strided_slice %30 {offsets = [0, 0], sizes = [16, 16], strides = [1, 1]} : vector<32x32xf32> to vector<16x16xf32>
    %cst_31 = arith.constant dense<0.000000e+00> : vector<16x16xf32>
    %35 = tpu.matmul %2, %34, %cst_31 {dimension_numbers = #tpu.dot_dimension_numbers<[1], [0], [0], [1], [0, 0, 1, 1], [], []>} : vector<16x16xf32>, vector<16x16xf32>, vector<16x16xf32> -> vector<16x16xf32>
    %cst_32 = arith.constant dense<0.000000e+00> : vector<16x16xf32>
    %36 = tpu.matmul %35, %3, %cst_32 {dimension_numbers = #tpu.dot_dimension_numbers<[1], [0], [0], [1], [0, 0, 1, 1], [], []>} : vector<16x16xf32>, vector<16x16xf32>, vector<16x16xf32> -> vector<16x16xf32>
    %c1_33 = arith.constant 1 : index
    %c0_34 = arith.constant 0 : index
    %c0_35 = arith.constant 0 : index
    %37 = vector.load %arg10[%c1_33, %c0_34, %c0_35] : memref<2x16x16xf32, #tpu.memory_space<vmem>>, vector<1x16x16xf32>
    %38 = vector.shape_cast %37 : vector<1x16x16xf32> to vector<16x16xf32>
    %39 = vector.shape_cast %36 : vector<16x16xf32> to vector<1x16x16xf32>
    tpu.vector_store %arg10[%c1_33, %c0_34, %c0_35], %39 {strides = array<i32>} : memref<2x16x16xf32, #tpu.memory_space<vmem>>, vector<1x16x16xf32>,
    %40 = vector.extract_strided_slice %36 {offsets = [0, 0], sizes = [8, 8], strides = [1, 1]} : vector<16x16xf32> to vector<8x8xf32>
    %cst_36 = arith.constant dense<0.000000e+00> : vector<8x8xf32>
    %41 = tpu.matmul %4, %40, %cst_36 {dimension_numbers = #tpu.dot_dimension_numbers<[1], [0], [0], [1], [0, 0, 1, 1], [], []>} : vector<8x8xf32>, vector<8x8xf32>, vector<8x8xf32> -> vector<8x8xf32>
    %cst_37 = arith.constant dense<0.000000e+00> : vector<8x8xf32>
    %42 = tpu.matmul %41, %5, %cst_37 {dimension_numbers = #tpu.dot_dimension_numbers<[1], [0], [0], [1], [0, 0, 1, 1], [], []>} : vector<8x8xf32>, vector<8x8xf32>, vector<8x8xf32> -> vector<8x8xf32>
    %c1_38 = arith.constant 1 : index
    %c0_39 = arith.constant 0 : index
    %c0_40 = arith.constant 0 : index
    %43 = vector.load %arg11[%c1_38, %c0_39, %c0_40] : memref<2x8x8xf32, #tpu.memory_space<vmem>>, vector<1x8x8xf32>
    %44 = vector.shape_cast %43 : vector<1x8x8xf32> to vector<8x8xf32>
    %45 = vector.shape_cast %42 : vector<8x8xf32> to vector<1x8x8xf32>
    tpu.vector_store %arg11[%c1_38, %c0_39, %c0_40], %45 {strides = array<i32>} : memref<2x8x8xf32, #tpu.memory_space<vmem>>, vector<1x8x8xf32>,
    %c0_41 = arith.constant 0 : index
    %c0_42 = arith.constant 0 : index
    %c0_43 = arith.constant 0 : index
    %46 = vector.load %arg2[%c0_41, %c0_42, %c0_43] : memref<2x32x32xf32, #tpu.memory_space<vmem>>, vector<2x32x32xf32>
    %47 = vector.shape_cast %46 : vector<2x32x32xf32> to vector<64x32xf32>
    %cst_44 = arith.constant dense<0.000000e+00> : vector<64x32xf32>
    %48 = tpu.matmul %47, %1, %cst_44 {dimension_numbers = #tpu.dot_dimension_numbers<[1], [0], [0], [1], [0, 0, 1, 1], [], []>} : vector<64x32xf32>, vector<32x32xf32>, vector<64x32xf32> -> vector<64x32xf32>
    %49 = vector.shape_cast %48 : vector<64x32xf32> to vector<2x32x32xf32>
    %50 = vector.extract_strided_slice %49 {offsets = [0, 0, 0], sizes = [1, 32, 32], strides = [1, 1, 1]} : vector<2x32x32xf32> to vector<1x32x32xf32>
    %51 = vector.shape_cast %50 : vector<1x32x32xf32> to vector<32x32xf32>
    %cst_45 = arith.constant dense<0.000000e+00> : vector<32x32xf32>
    %52 = tpu.matmul %0, %51, %cst_45 {dimension_numbers = #tpu.dot_dimension_numbers<[1], [0], [0], [1], [0, 0, 1, 1], [], []>} : vector<32x32xf32>, vector<32x32xf32>, vector<32x32xf32> -> vector<32x32xf32>
    %c0_46 = arith.constant 0 : index
    %c0_47 = arith.constant 0 : index
    %c0_48 = arith.constant 0 : index
    %53 = vector.load %arg12[%c0_46, %c0_47, %c0_48] : memref<2x32x32xf32, #tpu.memory_space<vmem>>, vector<1x32x32xf32>
    %54 = vector.shape_cast %53 : vector<1x32x32xf32> to vector<32x32xf32>
    %55 = vector.shape_cast %52 : vector<32x32xf32> to vector<1x32x32xf32>
    tpu.vector_store %arg12[%c0_46, %c0_47, %c0_48], %55 {strides = array<i32>} : memref<2x32x32xf32, #tpu.memory_space<vmem>>, vector<1x32x32xf32>,
    %56 = vector.extract_strided_slice %52 {offsets = [0, 0], sizes = [16, 16], strides = [1, 1]} : vector<32x32xf32> to vector<16x16xf32>
    %cst_49 = arith.constant dense<0.000000e+00> : vector<16x16xf32>
    %57 = tpu.matmul %2, %56, %cst_49 {dimension_numbers = #tpu.dot_dimension_numbers<[1], [0], [0], [1], [0, 0, 1, 1], [], []>} : vector<16x16xf32>, vector<16x16xf32>, vector<16x16xf32> -> vector<16x16xf32>
    %cst_50 = arith.constant dense<0.000000e+00> : vector<16x16xf32>
    %58 = tpu.matmul %57, %3, %cst_50 {dimension_numbers = #tpu.dot_dimension_numbers<[1], [0], [0], [1], [0, 0, 1, 1], [], []>} : vector<16x16xf32>, vector<16x16xf32>, vector<16x16xf32> -> vector<16x16xf32>
    %c0_51 = arith.constant 0 : index
    %c0_52 = arith.constant 0 : index
    %c0_53 = arith.constant 0 : index
    %59 = vector.load %arg13[%c0_51, %c0_52, %c0_53] : memref<2x16x16xf32, #tpu.memory_space<vmem>>, vector<1x16x16xf32>
    %60 = vector.shape_cast %59 : vector<1x16x16xf32> to vector<16x16xf32>
    %61 = vector.shape_cast %58 : vector<16x16xf32> to vector<1x16x16xf32>
    tpu.vector_store %arg13[%c0_51, %c0_52, %c0_53], %61 {strides = array<i32>} : memref<2x16x16xf32, #tpu.memory_space<vmem>>, vector<1x16x16xf32>,
    %62 = vector.extract_strided_slice %58 {offsets = [0, 0], sizes = [8, 8], strides = [1, 1]} : vector<16x16xf32> to vector<8x8xf32>
    %cst_54 = arith.constant dense<0.000000e+00> : vector<8x8xf32>
    %63 = tpu.matmul %4, %62, %cst_54 {dimension_numbers = #tpu.dot_dimension_numbers<[1], [0], [0], [1], [0, 0, 1, 1], [], []>} : vector<8x8xf32>, vector<8x8xf32>, vector<8x8xf32> -> vector<8x8xf32>
    %cst_55 = arith.constant dense<0.000000e+00> : vector<8x8xf32>
    %64 = tpu.matmul %63, %5, %cst_55 {dimension_numbers = #tpu.dot_dimension_numbers<[1], [0], [0], [1], [0, 0, 1, 1], [], []>} : vector<8x8xf32>, vector<8x8xf32>, vector<8x8xf32> -> vector<8x8xf32>
    %c0_56 = arith.constant 0 : index
    %c0_57 = arith.constant 0 : index
    %c0_58 = arith.constant 0 : index
    %65 = vector.load %arg14[%c0_56, %c0_57, %c0_58] : memref<2x8x8xf32, #tpu.memory_space<vmem>>, vector<1x8x8xf32>
    %66 = vector.shape_cast %65 : vector<1x8x8xf32> to vector<8x8xf32>
    %67 = vector.shape_cast %64 : vector<8x8xf32> to vector<1x8x8xf32>
    tpu.vector_store %arg14[%c0_56, %c0_57, %c0_58], %67 {strides = array<i32>} : memref<2x8x8xf32, #tpu.memory_space<vmem>>, vector<1x8x8xf32>,
    %68 = vector.extract_strided_slice %49 {offsets = [1, 0, 0], sizes = [1, 32, 32], strides = [1, 1, 1]} : vector<2x32x32xf32> to vector<1x32x32xf32>
    %69 = vector.shape_cast %68 : vector<1x32x32xf32> to vector<32x32xf32>
    %cst_59 = arith.constant dense<0.000000e+00> : vector<32x32xf32>
    %70 = tpu.matmul %0, %69, %cst_59 {dimension_numbers = #tpu.dot_dimension_numbers<[1], [0], [0], [1], [0, 0, 1, 1], [], []>} : vector<32x32xf32>, vector<32x32xf32>, vector<32x32xf32> -> vector<32x32xf32>
    %c1_60 = arith.constant 1 : index
    %c0_61 = arith.constant 0 : index
    %c0_62 = arith.constant 0 : index
    %71 = vector.load %arg12[%c1_60, %c0_61, %c0_62] : memref<2x32x32xf32, #tpu.memory_space<vmem>>, vector<1x32x32xf32>
    %72 = vector.shape_cast %71 : vector<1x32x32xf32> to vector<32x32xf32>
    %73 = vector.shape_cast %70 : vector<32x32xf32> to vector<1x32x32xf32>
    tpu.vector_store %arg12[%c1_60, %c0_61, %c0_62], %73 {strides = array<i32>} : memref<2x32x32xf32, #tpu.memory_space<vmem>>, vector<1x32x32xf32>,
    %74 = vector.extract_strided_slice %70 {offsets = [0, 0], sizes = [16, 16], strides = [1, 1]} : vector<32x32xf32> to vector<16x16xf32>
    %cst_63 = arith.constant dense<0.000000e+00> : vector<16x16xf32>
    %75 = tpu.matmul %2, %74, %cst_63 {dimension_numbers = #tpu.dot_dimension_numbers<[1], [0], [0], [1], [0, 0, 1, 1], [], []>} : vector<16x16xf32>, vector<16x16xf32>, vector<16x16xf32> -> vector<16x16xf32>
    %cst_64 = arith.constant dense<0.000000e+00> : vector<16x16xf32>
    %76 = tpu.matmul %75, %3, %cst_64 {dimension_numbers = #tpu.dot_dimension_numbers<[1], [0], [0], [1], [0, 0, 1, 1], [], []>} : vector<16x16xf32>, vector<16x16xf32>, vector<16x16xf32> -> vector<16x16xf32>
    %c1_65 = arith.constant 1 : index
    %c0_66 = arith.constant 0 : index
    %c0_67 = arith.constant 0 : index
    %77 = vector.load %arg13[%c1_65, %c0_66, %c0_67] : memref<2x16x16xf32, #tpu.memory_space<vmem>>, vector<1x16x16xf32>
    %78 = vector.shape_cast %77 : vector<1x16x16xf32> to vector<16x16xf32>
    %79 = vector.shape_cast %76 : vector<16x16xf32> to vector<1x16x16xf32>
    tpu.vector_store %arg13[%c1_65, %c0_66, %c0_67], %79 {strides = array<i32>} : memref<2x16x16xf32, #tpu.memory_space<vmem>>, vector<1x16x16xf32>,
    %80 = vector.extract_strided_slice %76 {offsets = [0, 0], sizes = [8, 8], strides = [1, 1]} : vector<16x16xf32> to vector<8x8xf32>
    %cst_68 = arith.constant dense<0.000000e+00> : vector<8x8xf32>
    %81 = tpu.matmul %4, %80, %cst_68 {dimension_numbers = #tpu.dot_dimension_numbers<[1], [0], [0], [1], [0, 0, 1, 1], [], []>} : vector<8x8xf32>, vector<8x8xf32>, vector<8x8xf32> -> vector<8x8xf32>
    %cst_69 = arith.constant dense<0.000000e+00> : vector<8x8xf32>
    %82 = tpu.matmul %81, %5, %cst_69 {dimension_numbers = #tpu.dot_dimension_numbers<[1], [0], [0], [1], [0, 0, 1, 1], [], []>} : vector<8x8xf32>, vector<8x8xf32>, vector<8x8xf32> -> vector<8x8xf32>
    %c1_70 = arith.constant 1 : index
    %c0_71 = arith.constant 0 : index
    %c0_72 = arith.constant 0 : index
    %83 = vector.load %arg14[%c1_70, %c0_71, %c0_72] : memref<2x8x8xf32, #tpu.memory_space<vmem>>, vector<1x8x8xf32>
    %84 = vector.shape_cast %83 : vector<1x8x8xf32> to vector<8x8xf32>
    %85 = vector.shape_cast %82 : vector<8x8xf32> to vector<1x8x8xf32>
    tpu.vector_store %arg14[%c1_70, %c0_71, %c0_72], %85 {strides = array<i32>} : memref<2x8x8xf32, #tpu.memory_space<vmem>>, vector<1x8x8xf32>,
    return
  }
  func.func @transform_0(%arg0: i32) -> (i32, i32, i32) {
    %c0_i32 = arith.constant 0 : i32
    %c0_i32_0 = arith.constant 0 : i32
    %c0_i32_1 = arith.constant 0 : i32
    return %arg0, %c0_i32, %c0_i32_0 : i32, i32, i32
  }
  func.func @transform_1(%arg0: i32) -> (i32, i32, i32) {
    %c0_i32 = arith.constant 0 : i32
    %c0_i32_0 = arith.constant 0 : i32
    %c0_i32_1 = arith.constant 0 : i32
    return %arg0, %c0_i32, %c0_i32_0 : i32, i32, i32
  }
  func.func @transform_2(%arg0: i32) -> (i32, i32) {
    %c0_i32 = arith.constant 0 : i32
    %c0_i32_0 = arith.constant 0 : i32
    %c0_i32_1 = arith.constant 0 : i32
    return %c0_i32, %c0_i32_0 : i32, i32
  }
  func.func @transform_3(%arg0: i32) -> (i32, i32) {
    %c0_i32 = arith.constant 0 : i32
    %c0_i32_0 = arith.constant 0 : i32
    %c0_i32_1 = arith.constant 0 : i32
    return %c0_i32, %c0_i32_0 : i32, i32
  }
  func.func @transform_4(%arg0: i32) -> (i32, i32) {
    %c0_i32 = arith.constant 0 : i32
    %c0_i32_0 = arith.constant 0 : i32
    %c0_i32_1 = arith.constant 0 : i32
    return %c0_i32, %c0_i32_0 : i32, i32
  }
  func.func @transform_5(%arg0: i32) -> (i32, i32) {
    %c0_i32 = arith.constant 0 : i32
    %c0_i32_0 = arith.constant 0 : i32
    %c0_i32_1 = arith.constant 0 : i32
    return %c0_i32, %c0_i32_0 : i32, i32
  }
  func.func @transform_6(%arg0: i32) -> (i32, i32) {
    %c0_i32 = arith.constant 0 : i32
    %c0_i32_0 = arith.constant 0 : i32
    %c0_i32_1 = arith.constant 0 : i32
    return %c0_i32, %c0_i32_0 : i32, i32
  }
  func.func @transform_7(%arg0: i32) -> (i32, i32) {
    %c0_i32 = arith.constant 0 : i32
    %c0_i32_0 = arith.constant 0 : i32
    %c0_i32_1 = arith.constant 0 : i32
    return %c0_i32, %c0_i32_0 : i32, i32
  }
  func.func @transform_8(%arg0: i32) -> (i32, i32, i32) {
    %c0_i32 = arith.constant 0 : i32
    %c0_i32_0 = arith.constant 0 : i32
    %c0_i32_1 = arith.constant 0 : i32
    return %arg0, %c0_i32, %c0_i32_0 : i32, i32, i32
  }
  func.func @transform_9(%arg0: i32) -> (i32, i32, i32) {
    %c0_i32 = arith.constant 0 : i32
    %c0_i32_0 = arith.constant 0 : i32
    %c0_i32_1 = arith.constant 0 : i32
    return %arg0, %c0_i32, %c0_i32_0 : i32, i32, i32
  }
  func.func @transform_10(%arg0: i32) -> (i32, i32, i32) {
    %c0_i32 = arith.constant 0 : i32
    %c0_i32_0 = arith.constant 0 : i32
    %c0_i32_1 = arith.constant 0 : i32
    return %arg0, %c0_i32, %c0_i32_0 : i32, i32, i32
  }
  func.func @transform_11(%arg0: i32) -> (i32, i32, i32) {
    %c0_i32 = arith.constant 0 : i32
    %c0_i32_0 = arith.constant 0 : i32
    %c0_i32_1 = arith.constant 0 : i32
    return %arg0, %c0_i32, %c0_i32_0 : i32, i32, i32
  }
  func.func @transform_12(%arg0: i32) -> (i32, i32, i32) {
    %c0_i32 = arith.constant 0 : i32
    %c0_i32_0 = arith.constant 0 : i32
    %c0_i32_1 = arith.constant 0 : i32
    return %arg0, %c0_i32, %c0_i32_0 : i32, i32, i32
  }
  func.func @transform_13(%arg0: i32) -> (i32, i32, i32) {
    %c0_i32 = arith.constant 0 : i32
    %c0_i32_0 = arith.constant 0 : i32
    %c0_i32_1 = arith.constant 0 : i32
    return %arg0, %c0_i32, %c0_i32_0 : i32, i32, i32
  }
}

module attributes {stable_mosaic.version = 11 : i64} {
  func.func @_haar_pyramid_kernel(%arg0: i32, %arg1: memref<2x32x32xf32, #tpu.memory_space<vmem>>, %arg2: memref<2x32x32xf32, #tpu.memory_space<vmem>>, %arg3: memref<32x32xf32, #tpu.memory_space<vmem>>, %arg4: memref<32x32xf32, #tpu.memory_space<vmem>>, %arg5: memref<16x16xf32, #tpu.memory_space<vmem>>, %arg6: memref<16x16xf32, #tpu.memory_space<vmem>>, %arg7: memref<8x8xf32, #tpu.memory_space<vmem>>, %arg8: memref<8x8xf32, #tpu.memory_space<vmem>>, %arg9: memref<2x32x32xf32, #tpu.memory_space<vmem>>, %arg10: memref<2x16x16xf32, #tpu.memory_space<vmem>>, %arg11: memref<2x8x8xf32, #tpu.memory_space<vmem>>, %arg12: memref<2x32x32xf32, #tpu.memory_space<vmem>>, %arg13: memref<2x16x16xf32, #tpu.memory_space<vmem>>, %arg14: memref<2x8x8xf32, #tpu.memory_space<vmem>>) attributes {dimension_semantics = [#tpu.dimension_semantics<parallel>], iteration_bounds = array<i64: 2>, scalar_prefetch = 0 : i64, scratch_operands = 0 : i64, tpu.core_type = #tpu.core_type<tc>, window_params = [{transform_indices = @transform_0, window_bounds = array<i64: 2, 32, 32>}, {transform_indices = @transform_1, window_bounds = array<i64: 2, 32, 32>}, {pipeline_mode = #tpu.pipeline_mode<synchronous>, transform_indices = @transform_2, window_bounds = array<i64: 32, 32>}, {pipeline_mode = #tpu.pipeline_mode<synchronous>, transform_indices = @transform_3, window_bounds = array<i64: 32, 32>}, {pipeline_mode = #tpu.pipeline_mode<synchronous>, transform_indices = @transform_4, window_bounds = array<i64: 16, 16>}, {pipeline_mode = #tpu.pipeline_mode<synchronous>, transform_indices = @transform_5, window_bounds = array<i64: 16, 16>}, {pipeline_mode = #tpu.pipeline_mode<synchronous>, transform_indices = @transform_6, window_bounds = array<i64: 8, 8>}, {pipeline_mode = #tpu.pipeline_mode<synchronous>, transform_indices = @transform_7, window_bounds = array<i64: 8, 8>}, {transform_indices = @transform_8, window_bounds = array<i64: 2, 32, 32>}, {transform_indices = @transform_9, window_bounds = array<i64: 2, 16, 16>}, {transform_indices = @transform_10, window_bounds = array<i64: 2, 8, 8>}, {transform_indices = @transform_11, window_bounds = array<i64: 2, 32, 32>}, {transform_indices = @transform_12, window_bounds = array<i64: 2, 16, 16>}, {transform_indices = @transform_13, window_bounds = array<i64: 2, 8, 8>}]} {
    %c0 = arith.constant 0 : index
    %c0_0 = arith.constant 0 : index
    %0 = vector.load %arg3[%c0, %c0_0] : memref<32x32xf32, #tpu.memory_space<vmem>>, vector<32x32xf32>
    %c0_1 = arith.constant 0 : index
    %c0_2 = arith.constant 0 : index
    %1 = vector.load %arg4[%c0_1, %c0_2] : memref<32x32xf32, #tpu.memory_space<vmem>>, vector<32x32xf32>
    %c0_3 = arith.constant 0 : index
    %c0_4 = arith.constant 0 : index
    %2 = vector.load %arg5[%c0_3, %c0_4] : memref<16x16xf32, #tpu.memory_space<vmem>>, vector<16x16xf32>
    %c0_5 = arith.constant 0 : index
    %c0_6 = arith.constant 0 : index
    %3 = vector.load %arg6[%c0_5, %c0_6] : memref<16x16xf32, #tpu.memory_space<vmem>>, vector<16x16xf32>
    %c0_7 = arith.constant 0 : index
    %c0_8 = arith.constant 0 : index
    %4 = vector.load %arg7[%c0_7, %c0_8] : memref<8x8xf32, #tpu.memory_space<vmem>>, vector<8x8xf32>
    %c0_9 = arith.constant 0 : index
    %c0_10 = arith.constant 0 : index
    %5 = vector.load %arg8[%c0_9, %c0_10] : memref<8x8xf32, #tpu.memory_space<vmem>>, vector<8x8xf32>
    %c0_11 = arith.constant 0 : index
    %c0_12 = arith.constant 0 : index
    %c0_13 = arith.constant 0 : index
    %6 = vector.load %arg1[%c0_11, %c0_12, %c0_13] : memref<2x32x32xf32, #tpu.memory_space<vmem>>, vector<2x32x32xf32>
    %7 = vector.shape_cast %6 : vector<2x32x32xf32> to vector<64x32xf32>
    %cst = arith.constant dense<0.000000e+00> : vector<64x32xf32>
    %8 = tpu.matmul %7, %1, %cst {dimension_numbers = #tpu.dot_dimension_numbers<[1], [0], [0], [1], [0, 0, 1, 1], [], []>} : vector<64x32xf32>, vector<32x32xf32>, vector<64x32xf32> -> vector<64x32xf32>
    %9 = vector.shape_cast %8 : vector<64x32xf32> to vector<2x32x32xf32>
    %10 = vector.extract_strided_slice %9 {offsets = [0, 0, 0], sizes = [1, 32, 32], strides = [1, 1, 1]} : vector<2x32x32xf32> to vector<1x32x32xf32>
    %11 = vector.shape_cast %10 : vector<1x32x32xf32> to vector<32x32xf32>
    %cst_14 = arith.constant dense<0.000000e+00> : vector<32x32xf32>
    %12 = tpu.matmul %0, %11, %cst_14 {dimension_numbers = #tpu.dot_dimension_numbers<[1], [0], [0], [1], [0, 0, 1, 1], [], []>} : vector<32x32xf32>, vector<32x32xf32>, vector<32x32xf32> -> vector<32x32xf32>
    %c0_15 = arith.constant 0 : index
    %c0_16 = arith.constant 0 : index
    %c0_17 = arith.constant 0 : index
    %13 = vector.load %arg9[%c0_15, %c0_16, %c0_17] : memref<2x32x32xf32, #tpu.memory_space<vmem>>, vector<1x32x32xf32>
    %14 = vector.shape_cast %13 : vector<1x32x32xf32> to vector<32x32xf32>
    %15 = vector.shape_cast %12 : vector<32x32xf32> to vector<1x32x32xf32>
    tpu.vector_store %arg9[%c0_15, %c0_16, %c0_17], %15 {strides = array<i32>} : memref<2x32x32xf32, #tpu.memory_space<vmem>>, vector<1x32x32xf32>,
    %16 = vector.extract_strided_slice %12 {offsets = [0, 0], sizes = [16, 16], strides = [1, 1]} : vector<32x32xf32> to vector<16x16xf32>
    %cst_18 = arith.constant dense<0.000000e+00> : vector<16x16xf32>
    %17 = tpu.matmul %2, %16, %cst_18 {dimension_numbers = #tpu.dot_dimension_numbers<[1], [0], [0], [1], [0, 0, 1, 1], [], []>} : vector<16x16xf32>, vector<16x16xf32>, vector<16x16xf32> -> vector<16x16xf32>
    %cst_19 = arith.constant dense<0.000000e+00> : vector<16x16xf32>
    %18 = tpu.matmul %17, %3, %cst_19 {dimension_numbers = #tpu.dot_dimension_numbers<[1], [0], [0], [1], [0, 0, 1, 1], [], []>} : vector<16x16xf32>, vector<16x16xf32>, vector<16x16xf32> -> vector<16x16xf32>
    %c0_20 = arith.constant 0 : index
    %c0_21 = arith.constant 0 : index
    %c0_22 = arith.constant 0 : index
    %19 = vector.load %arg10[%c0_20, %c0_21, %c0_22] : memref<2x16x16xf32, #tpu.memory_space<vmem>>, vector<1x16x16xf32>
    %20 = vector.shape_cast %19 : vector<1x16x16xf32> to vector<16x16xf32>
    %21 = vector.shape_cast %18 : vector<16x16xf32> to vector<1x16x16xf32>
    tpu.vector_store %arg10[%c0_20, %c0_21, %c0_22], %21 {strides = array<i32>} : memref<2x16x16xf32, #tpu.memory_space<vmem>>, vector<1x16x16xf32>,
    %22 = vector.extract_strided_slice %18 {offsets = [0, 0], sizes = [8, 8], strides = [1, 1]} : vector<16x16xf32> to vector<8x8xf32>
    %cst_23 = arith.constant dense<0.000000e+00> : vector<8x8xf32>
    %23 = tpu.matmul %4, %22, %cst_23 {dimension_numbers = #tpu.dot_dimension_numbers<[1], [0], [0], [1], [0, 0, 1, 1], [], []>} : vector<8x8xf32>, vector<8x8xf32>, vector<8x8xf32> -> vector<8x8xf32>
    %cst_24 = arith.constant dense<0.000000e+00> : vector<8x8xf32>
    %24 = tpu.matmul %23, %5, %cst_24 {dimension_numbers = #tpu.dot_dimension_numbers<[1], [0], [0], [1], [0, 0, 1, 1], [], []>} : vector<8x8xf32>, vector<8x8xf32>, vector<8x8xf32> -> vector<8x8xf32>
    %c0_25 = arith.constant 0 : index
    %c0_26 = arith.constant 0 : index
    %c0_27 = arith.constant 0 : index
    %25 = vector.load %arg11[%c0_25, %c0_26, %c0_27] : memref<2x8x8xf32, #tpu.memory_space<vmem>>, vector<1x8x8xf32>
    %26 = vector.shape_cast %25 : vector<1x8x8xf32> to vector<8x8xf32>
    %27 = vector.shape_cast %24 : vector<8x8xf32> to vector<1x8x8xf32>
    tpu.vector_store %arg11[%c0_25, %c0_26, %c0_27], %27 {strides = array<i32>} : memref<2x8x8xf32, #tpu.memory_space<vmem>>, vector<1x8x8xf32>,
    %28 = vector.extract_strided_slice %9 {offsets = [1, 0, 0], sizes = [1, 32, 32], strides = [1, 1, 1]} : vector<2x32x32xf32> to vector<1x32x32xf32>
    %29 = vector.shape_cast %28 : vector<1x32x32xf32> to vector<32x32xf32>
    %cst_28 = arith.constant dense<0.000000e+00> : vector<32x32xf32>
    %30 = tpu.matmul %0, %29, %cst_28 {dimension_numbers = #tpu.dot_dimension_numbers<[1], [0], [0], [1], [0, 0, 1, 1], [], []>} : vector<32x32xf32>, vector<32x32xf32>, vector<32x32xf32> -> vector<32x32xf32>
    %c1 = arith.constant 1 : index
    %c0_29 = arith.constant 0 : index
    %c0_30 = arith.constant 0 : index
    %31 = vector.load %arg9[%c1, %c0_29, %c0_30] : memref<2x32x32xf32, #tpu.memory_space<vmem>>, vector<1x32x32xf32>
    %32 = vector.shape_cast %31 : vector<1x32x32xf32> to vector<32x32xf32>
    %33 = vector.shape_cast %30 : vector<32x32xf32> to vector<1x32x32xf32>
    tpu.vector_store %arg9[%c1, %c0_29, %c0_30], %33 {strides = array<i32>} : memref<2x32x32xf32, #tpu.memory_space<vmem>>, vector<1x32x32xf32>,
    %34 = vector.extract_strided_slice %30 {offsets = [0, 0], sizes = [16, 16], strides = [1, 1]} : vector<32x32xf32> to vector<16x16xf32>
    %cst_31 = arith.constant dense<0.000000e+00> : vector<16x16xf32>
    %35 = tpu.matmul %2, %34, %cst_31 {dimension_numbers = #tpu.dot_dimension_numbers<[1], [0], [0], [1], [0, 0, 1, 1], [], []>} : vector<16x16xf32>, vector<16x16xf32>, vector<16x16xf32> -> vector<16x16xf32>
    %cst_32 = arith.constant dense<0.000000e+00> : vector<16x16xf32>
    %36 = tpu.matmul %35, %3, %cst_32 {dimension_numbers = #tpu.dot_dimension_numbers<[1], [0], [0], [1], [0, 0, 1, 1], [], []>} : vector<16x16xf32>, vector<16x16xf32>, vector<16x16xf32> -> vector<16x16xf32>
    %c1_33 = arith.constant 1 : index
    %c0_34 = arith.constant 0 : index
    %c0_35 = arith.constant 0 : index
    %37 = vector.load %arg10[%c1_33, %c0_34, %c0_35] : memref<2x16x16xf32, #tpu.memory_space<vmem>>, vector<1x16x16xf32>
    %38 = vector.shape_cast %37 : vector<1x16x16xf32> to vector<16x16xf32>
    %39 = vector.shape_cast %36 : vector<16x16xf32> to vector<1x16x16xf32>
    tpu.vector_store %arg10[%c1_33, %c0_34, %c0_35], %39 {strides = array<i32>} : memref<2x16x16xf32, #tpu.memory_space<vmem>>, vector<1x16x16xf32>,
    %40 = vector.extract_strided_slice %36 {offsets = [0, 0], sizes = [8, 8], strides = [1, 1]} : vector<16x16xf32> to vector<8x8xf32>
    %cst_36 = arith.constant dense<0.000000e+00> : vector<8x8xf32>
    %41 = tpu.matmul %4, %40, %cst_36 {dimension_numbers = #tpu.dot_dimension_numbers<[1], [0], [0], [1], [0, 0, 1, 1], [], []>} : vector<8x8xf32>, vector<8x8xf32>, vector<8x8xf32> -> vector<8x8xf32>
    %cst_37 = arith.constant dense<0.000000e+00> : vector<8x8xf32>
    %42 = tpu.matmul %41, %5, %cst_37 {dimension_numbers = #tpu.dot_dimension_numbers<[1], [0], [0], [1], [0, 0, 1, 1], [], []>} : vector<8x8xf32>, vector<8x8xf32>, vector<8x8xf32> -> vector<8x8xf32>
    %c1_38 = arith.constant 1 : index
    %c0_39 = arith.constant 0 : index
    %c0_40 = arith.constant 0 : index
    %43 = vector.load %arg11[%c1_38, %c0_39, %c0_40] : memref<2x8x8xf32, #tpu.memory_space<vmem>>, vector<1x8x8xf32>
    %44 = vector.shape_cast %43 : vector<1x8x8xf32> to vector<8x8xf32>
    %45 = vector.shape_cast %42 : vector<8x8xf32> to vector<1x8x8xf32>
    tpu.vector_store %arg11[%c1_38, %c0_39, %c0_40], %45 {strides = array<i32>} : memref<2x8x8xf32, #tpu.memory_space<vmem>>, vector<1x8x8xf32>,
    %c0_41 = arith.constant 0 : index
    %c0_42 = arith.constant 0 : index
    %c0_43 = arith.constant 0 : index
    %46 = vector.load %arg2[%c0_41, %c0_42, %c0_43] : memref<2x32x32xf32, #tpu.memory_space<vmem>>, vector<2x32x32xf32>
    %47 = vector.shape_cast %46 : vector<2x32x32xf32> to vector<64x32xf32>
    %cst_44 = arith.constant dense<0.000000e+00> : vector<64x32xf32>
    %48 = tpu.matmul %47, %1, %cst_44 {dimension_numbers = #tpu.dot_dimension_numbers<[1], [0], [0], [1], [0, 0, 1, 1], [], []>} : vector<64x32xf32>, vector<32x32xf32>, vector<64x32xf32> -> vector<64x32xf32>
    %49 = vector.shape_cast %48 : vector<64x32xf32> to vector<2x32x32xf32>
    %50 = vector.extract_strided_slice %49 {offsets = [0, 0, 0], sizes = [1, 32, 32], strides = [1, 1, 1]} : vector<2x32x32xf32> to vector<1x32x32xf32>
    %51 = vector.shape_cast %50 : vector<1x32x32xf32> to vector<32x32xf32>
    %cst_45 = arith.constant dense<0.000000e+00> : vector<32x32xf32>
    %52 = tpu.matmul %0, %51, %cst_45 {dimension_numbers = #tpu.dot_dimension_numbers<[1], [0], [0], [1], [0, 0, 1, 1], [], []>} : vector<32x32xf32>, vector<32x32xf32>, vector<32x32xf32> -> vector<32x32xf32>
    %c0_46 = arith.constant 0 : index
    %c0_47 = arith.constant 0 : index
    %c0_48 = arith.constant 0 : index
    %53 = vector.load %arg12[%c0_46, %c0_47, %c0_48] : memref<2x32x32xf32, #tpu.memory_space<vmem>>, vector<1x32x32xf32>
    %54 = vector.shape_cast %53 : vector<1x32x32xf32> to vector<32x32xf32>
    %55 = vector.shape_cast %52 : vector<32x32xf32> to vector<1x32x32xf32>
    tpu.vector_store %arg12[%c0_46, %c0_47, %c0_48], %55 {strides = array<i32>} : memref<2x32x32xf32, #tpu.memory_space<vmem>>, vector<1x32x32xf32>,
    %56 = vector.extract_strided_slice %52 {offsets = [0, 0], sizes = [16, 16], strides = [1, 1]} : vector<32x32xf32> to vector<16x16xf32>
    %cst_49 = arith.constant dense<0.000000e+00> : vector<16x16xf32>
    %57 = tpu.matmul %2, %56, %cst_49 {dimension_numbers = #tpu.dot_dimension_numbers<[1], [0], [0], [1], [0, 0, 1, 1], [], []>} : vector<16x16xf32>, vector<16x16xf32>, vector<16x16xf32> -> vector<16x16xf32>
    %cst_50 = arith.constant dense<0.000000e+00> : vector<16x16xf32>
    %58 = tpu.matmul %57, %3, %cst_50 {dimension_numbers = #tpu.dot_dimension_numbers<[1], [0], [0], [1], [0, 0, 1, 1], [], []>} : vector<16x16xf32>, vector<16x16xf32>, vector<16x16xf32> -> vector<16x16xf32>
    %c0_51 = arith.constant 0 : index
    %c0_52 = arith.constant 0 : index
    %c0_53 = arith.constant 0 : index
    %59 = vector.load %arg13[%c0_51, %c0_52, %c0_53] : memref<2x16x16xf32, #tpu.memory_space<vmem>>, vector<1x16x16xf32>
    %60 = vector.shape_cast %59 : vector<1x16x16xf32> to vector<16x16xf32>
    %61 = vector.shape_cast %58 : vector<16x16xf32> to vector<1x16x16xf32>
    tpu.vector_store %arg13[%c0_51, %c0_52, %c0_53], %61 {strides = array<i32>} : memref<2x16x16xf32, #tpu.memory_space<vmem>>, vector<1x16x16xf32>,
    %62 = vector.extract_strided_slice %58 {offsets = [0, 0], sizes = [8, 8], strides = [1, 1]} : vector<16x16xf32> to vector<8x8xf32>
    %cst_54 = arith.constant dense<0.000000e+00> : vector<8x8xf32>
    %63 = tpu.matmul %4, %62, %cst_54 {dimension_numbers = #tpu.dot_dimension_numbers<[1], [0], [0], [1], [0, 0, 1, 1], [], []>} : vector<8x8xf32>, vector<8x8xf32>, vector<8x8xf32> -> vector<8x8xf32>
    %cst_55 = arith.constant dense<0.000000e+00> : vector<8x8xf32>
    %64 = tpu.matmul %63, %5, %cst_55 {dimension_numbers = #tpu.dot_dimension_numbers<[1], [0], [0], [1], [0, 0, 1, 1], [], []>} : vector<8x8xf32>, vector<8x8xf32>, vector<8x8xf32> -> vector<8x8xf32>
    %c0_56 = arith.constant 0 : index
    %c0_57 = arith.constant 0 : index
    %c0_58 = arith.constant 0 : index
    %65 = vector.load %arg14[%c0_56, %c0_57, %c0_58] : memref<2x8x8xf32, #tpu.memory_space<vmem>>, vector<1x8x8xf32>
    %66 = vector.shape_cast %65 : vector<1x8x8xf32> to vector<8x8xf32>
    %67 = vector.shape_cast %64 : vector<8x8xf32> to vector<1x8x8xf32>
    tpu.vector_store %arg14[%c0_56, %c0_57, %c0_58], %67 {strides = array<i32>} : memref<2x8x8xf32, #tpu.memory_space<vmem>>, vector<1x8x8xf32>,
    %68 = vector.extract_strided_slice %49 {offsets = [1, 0, 0], sizes = [1, 32, 32], strides = [1, 1, 1]} : vector<2x32x32xf32> to vector<1x32x32xf32>
    %69 = vector.shape_cast %68 : vector<1x32x32xf32> to vector<32x32xf32>
    %cst_59 = arith.constant dense<0.000000e+00> : vector<32x32xf32>
    %70 = tpu.matmul %0, %69, %cst_59 {dimension_numbers = #tpu.dot_dimension_numbers<[1], [0], [0], [1], [0, 0, 1, 1], [], []>} : vector<32x32xf32>, vector<32x32xf32>, vector<32x32xf32> -> vector<32x32xf32>
    %c1_60 = arith.constant 1 : index
    %c0_61 = arith.constant 0 : index
    %c0_62 = arith.constant 0 : index
    %71 = vector.load %arg12[%c1_60, %c0_61, %c0_62] : memref<2x32x32xf32, #tpu.memory_space<vmem>>, vector<1x32x32xf32>
    %72 = vector.shape_cast %71 : vector<1x32x32xf32> to vector<32x32xf32>
    %73 = vector.shape_cast %70 : vector<32x32xf32> to vector<1x32x32xf32>
    tpu.vector_store %arg12[%c1_60, %c0_61, %c0_62], %73 {strides = array<i32>} : memref<2x32x32xf32, #tpu.memory_space<vmem>>, vector<1x32x32xf32>,
    %74 = vector.extract_strided_slice %70 {offsets = [0, 0], sizes = [16, 16], strides = [1, 1]} : vector<32x32xf32> to vector<16x16xf32>
    %cst_63 = arith.constant dense<0.000000e+00> : vector<16x16xf32>
    %75 = tpu.matmul %2, %74, %cst_63 {dimension_numbers = #tpu.dot_dimension_numbers<[1], [0], [0], [1], [0, 0, 1, 1], [], []>} : vector<16x16xf32>, vector<16x16xf32>, vector<16x16xf32> -> vector<16x16xf32>
    %cst_64 = arith.constant dense<0.000000e+00> : vector<16x16xf32>
    %76 = tpu.matmul %75, %3, %cst_64 {dimension_numbers = #tpu.dot_dimension_numbers<[1], [0], [0], [1], [0, 0, 1, 1], [], []>} : vector<16x16xf32>, vector<16x16xf32>, vector<16x16xf32> -> vector<16x16xf32>
    %c1_65 = arith.constant 1 : index
    %c0_66 = arith.constant 0 : index
    %c0_67 = arith.constant 0 : index
    %77 = vector.load %arg13[%c1_65, %c0_66, %c0_67] : memref<2x16x16xf32, #tpu.memory_space<vmem>>, vector<1x16x16xf32>
    %78 = vector.shape_cast %77 : vector<1x16x16xf32> to vector<16x16xf32>
    %79 = vector.shape_cast %76 : vector<16x16xf32> to vector<1x16x16xf32>
    tpu.vector_store %arg13[%c1_65, %c0_66, %c0_67], %79 {strides = array<i32>} : memref<2x16x16xf32, #tpu.memory_space<vmem>>, vector<1x16x16xf32>,
    %80 = vector.extract_strided_slice %76 {offsets = [0, 0], sizes = [8, 8], strides = [1, 1]} : vector<16x16xf32> to vector<8x8xf32>
    %cst_68 = arith.constant dense<0.000000e+00> : vector<8x8xf32>
    %81 = tpu.matmul %4, %80, %cst_68 {dimension_numbers = #tpu.dot_dimension_numbers<[1], [0], [0], [1], [0, 0, 1, 1], [], []>} : vector<8x8xf32>, vector<8x8xf32>, vector<8x8xf32> -> vector<8x8xf32>
    %cst_69 = arith.constant dense<0.000000e+00> : vector<8x8xf32>
    %82 = tpu.matmul %81, %5, %cst_69 {dimension_numbers = #tpu.dot_dimension_numbers<[1], [0], [0], [1], [0, 0, 1, 1], [], []>} : vector<8x8xf32>, vector<8x8xf32>, vector<8x8xf32> -> vector<8x8xf32>
    %c1_70 = arith.constant 1 : index
    %c0_71 = arith.constant 0 : index
    %c0_72 = arith.constant 0 : index
    %83 = vector.load %arg14[%c1_70, %c0_71, %c0_72] : memref<2x8x8xf32, #tpu.memory_space<vmem>>, vector<1x8x8xf32>
    %84 = vector.shape_cast %83 : vector<1x8x8xf32> to vector<8x8xf32>
    %85 = vector.shape_cast %82 : vector<8x8xf32> to vector<1x8x8xf32>
    tpu.vector_store %arg14[%c1_70, %c0_71, %c0_72], %85 {strides = array<i32>} : memref<2x8x8xf32, #tpu.memory_space<vmem>>, vector<1x8x8xf32>,
    return
  }
  func.func @transform_0(%arg0: i32) -> (i32, i32, i32) {
    %c0_i32 = arith.constant 0 : i32
    %c0_i32_0 = arith.constant 0 : i32
    %c0_i32_1 = arith.constant 0 : i32
    return %arg0, %c0_i32, %c0_i32_0 : i32, i32, i32
  }
  func.func @transform_1(%arg0: i32) -> (i32, i32, i32) {
    %c0_i32 = arith.constant 0 : i32
    %c0_i32_0 = arith.constant 0 : i32
    %c0_i32_1 = arith.constant 0 : i32
    return %arg0, %c0_i32, %c0_i32_0 : i32, i32, i32
  }
  func.func @transform_2(%arg0: i32) -> (i32, i32) {
    %c0_i32 = arith.constant 0 : i32
    %c0_i32_0 = arith.constant 0 : i32
    %c0_i32_1 = arith.constant 0 : i32
    return %c0_i32, %c0_i32_0 : i32, i32
  }
  func.func @transform_3(%arg0: i32) -> (i32, i32) {
    %c0_i32 = arith.constant 0 : i32
    %c0_i32_0 = arith.constant 0 : i32
    %c0_i32_1 = arith.constant 0 : i32
    return %c0_i32, %c0_i32_0 : i32, i32
  }
  func.func @transform_4(%arg0: i32) -> (i32, i32) {
    %c0_i32 = arith.constant 0 : i32
    %c0_i32_0 = arith.constant 0 : i32
    %c0_i32_1 = arith.constant 0 : i32
    return %c0_i32, %c0_i32_0 : i32, i32
  }
  func.func @transform_5(%arg0: i32) -> (i32, i32) {
    %c0_i32 = arith.constant 0 : i32
    %c0_i32_0 = arith.constant 0 : i32
    %c0_i32_1 = arith.constant 0 : i32
    return %c0_i32, %c0_i32_0 : i32, i32
  }
  func.func @transform_6(%arg0: i32) -> (i32, i32) {
    %c0_i32 = arith.constant 0 : i32
    %c0_i32_0 = arith.constant 0 : i32
    %c0_i32_1 = arith.constant 0 : i32
    return %c0_i32, %c0_i32_0 : i32, i32
  }
  func.func @transform_7(%arg0: i32) -> (i32, i32) {
    %c0_i32 = arith.constant 0 : i32
    %c0_i32_0 = arith.constant 0 : i32
    %c0_i32_1 = arith.constant 0 : i32
    return %c0_i32, %c0_i32_0 : i32, i32
  }
  func.func @transform_8(%arg0: i32) -> (i32, i32, i32) {
    %c0_i32 = arith.constant 0 : i32
    %c0_i32_0 = arith.constant 0 : i32
    %c0_i32_1 = arith.constant 0 : i32
    return %arg0, %c0_i32, %c0_i32_0 : i32, i32, i32
  }
  func.func @transform_9(%arg0: i32) -> (i32, i32, i32) {
    %c0_i32 = arith.constant 0 : i32
    %c0_i32_0 = arith.constant 0 : i32
    %c0_i32_1 = arith.constant 0 : i32
    return %arg0, %c0_i32, %c0_i32_0 : i32, i32, i32
  }
  func.func @transform_10(%arg0: i32) -> (i32, i32, i32) {
    %c0_i32 = arith.constant 0 : i32
    %c0_i32_0 = arith.constant 0 : i32
    %c0_i32_1 = arith.constant 0 : i32
    return %arg0, %c0_i32, %c0_i32_0 : i32, i32, i32
  }
  func.func @transform_11(%arg0: i32) -> (i32, i32, i32) {
    %c0_i32 = arith.constant 0 : i32
    %c0_i32_0 = arith.constant 0 : i32
    %c0_i32_1 = arith.constant 0 : i32
    return %arg0, %c0_i32, %c0_i32_0 : i32, i32, i32
  }
  func.func @transform_12(%arg0: i32) -> (i32, i32, i32) {
    %c0_i32 = arith.constant 0 : i32
    %c0_i32_0 = arith.constant 0 : i32
    %c0_i32_1 = arith.constant 0 : i32
    return %arg0, %c0_i32, %c0_i32_0 : i32, i32, i32
  }
  func.func @transform_13(%arg0: i32) -> (i32, i32, i32) {
    %c0_i32 = arith.constant 0 : i32
    %c0_i32_0 = arith.constant 0 : i32
    %c0_i32_1 = arith.constant 0 : i32
    return %arg0, %c0_i32, %c0_i32_0 : i32, i32, i32
  }
}

module attributes {stable_mosaic.version = 11 : i64} {
  func.func @_haar_pyramid_kernel(%arg0: i32, %arg1: memref<2x32x32xf32, #tpu.memory_space<vmem>>, %arg2: memref<2x32x32xf32, #tpu.memory_space<vmem>>, %arg3: memref<32x32xf32, #tpu.memory_space<vmem>>, %arg4: memref<32x32xf32, #tpu.memory_space<vmem>>, %arg5: memref<16x16xf32, #tpu.memory_space<vmem>>, %arg6: memref<16x16xf32, #tpu.memory_space<vmem>>, %arg7: memref<8x8xf32, #tpu.memory_space<vmem>>, %arg8: memref<8x8xf32, #tpu.memory_space<vmem>>, %arg9: memref<2x32x32xf32, #tpu.memory_space<vmem>>, %arg10: memref<2x16x16xf32, #tpu.memory_space<vmem>>, %arg11: memref<2x8x8xf32, #tpu.memory_space<vmem>>, %arg12: memref<2x32x32xf32, #tpu.memory_space<vmem>>, %arg13: memref<2x16x16xf32, #tpu.memory_space<vmem>>, %arg14: memref<2x8x8xf32, #tpu.memory_space<vmem>>) attributes {dimension_semantics = [#tpu.dimension_semantics<parallel>], iteration_bounds = array<i64: 2>, scalar_prefetch = 0 : i64, scratch_operands = 0 : i64, tpu.core_type = #tpu.core_type<tc>, window_params = [{transform_indices = @transform_0, window_bounds = array<i64: 2, 32, 32>}, {transform_indices = @transform_1, window_bounds = array<i64: 2, 32, 32>}, {pipeline_mode = #tpu.pipeline_mode<synchronous>, transform_indices = @transform_2, window_bounds = array<i64: 32, 32>}, {pipeline_mode = #tpu.pipeline_mode<synchronous>, transform_indices = @transform_3, window_bounds = array<i64: 32, 32>}, {pipeline_mode = #tpu.pipeline_mode<synchronous>, transform_indices = @transform_4, window_bounds = array<i64: 16, 16>}, {pipeline_mode = #tpu.pipeline_mode<synchronous>, transform_indices = @transform_5, window_bounds = array<i64: 16, 16>}, {pipeline_mode = #tpu.pipeline_mode<synchronous>, transform_indices = @transform_6, window_bounds = array<i64: 8, 8>}, {pipeline_mode = #tpu.pipeline_mode<synchronous>, transform_indices = @transform_7, window_bounds = array<i64: 8, 8>}, {transform_indices = @transform_8, window_bounds = array<i64: 2, 32, 32>}, {transform_indices = @transform_9, window_bounds = array<i64: 2, 16, 16>}, {transform_indices = @transform_10, window_bounds = array<i64: 2, 8, 8>}, {transform_indices = @transform_11, window_bounds = array<i64: 2, 32, 32>}, {transform_indices = @transform_12, window_bounds = array<i64: 2, 16, 16>}, {transform_indices = @transform_13, window_bounds = array<i64: 2, 8, 8>}]} {
    %c0 = arith.constant 0 : index
    %c0_0 = arith.constant 0 : index
    %0 = vector.load %arg3[%c0, %c0_0] : memref<32x32xf32, #tpu.memory_space<vmem>>, vector<32x32xf32>
    %c0_1 = arith.constant 0 : index
    %c0_2 = arith.constant 0 : index
    %1 = vector.load %arg4[%c0_1, %c0_2] : memref<32x32xf32, #tpu.memory_space<vmem>>, vector<32x32xf32>
    %c0_3 = arith.constant 0 : index
    %c0_4 = arith.constant 0 : index
    %2 = vector.load %arg5[%c0_3, %c0_4] : memref<16x16xf32, #tpu.memory_space<vmem>>, vector<16x16xf32>
    %c0_5 = arith.constant 0 : index
    %c0_6 = arith.constant 0 : index
    %3 = vector.load %arg6[%c0_5, %c0_6] : memref<16x16xf32, #tpu.memory_space<vmem>>, vector<16x16xf32>
    %c0_7 = arith.constant 0 : index
    %c0_8 = arith.constant 0 : index
    %4 = vector.load %arg7[%c0_7, %c0_8] : memref<8x8xf32, #tpu.memory_space<vmem>>, vector<8x8xf32>
    %c0_9 = arith.constant 0 : index
    %c0_10 = arith.constant 0 : index
    %5 = vector.load %arg8[%c0_9, %c0_10] : memref<8x8xf32, #tpu.memory_space<vmem>>, vector<8x8xf32>
    %c0_11 = arith.constant 0 : index
    %c0_12 = arith.constant 0 : index
    %c0_13 = arith.constant 0 : index
    %6 = vector.load %arg1[%c0_11, %c0_12, %c0_13] : memref<2x32x32xf32, #tpu.memory_space<vmem>>, vector<2x32x32xf32>
    %7 = vector.shape_cast %6 : vector<2x32x32xf32> to vector<64x32xf32>
    %cst = arith.constant dense<0.000000e+00> : vector<64x32xf32>
    %8 = tpu.matmul %7, %1, %cst {dimension_numbers = #tpu.dot_dimension_numbers<[1], [0], [0], [1], [0, 0, 1, 1], [], []>} : vector<64x32xf32>, vector<32x32xf32>, vector<64x32xf32> -> vector<64x32xf32>
    %9 = vector.shape_cast %8 : vector<64x32xf32> to vector<2x32x32xf32>
    %10 = vector.extract_strided_slice %9 {offsets = [0, 0, 0], sizes = [1, 32, 32], strides = [1, 1, 1]} : vector<2x32x32xf32> to vector<1x32x32xf32>
    %11 = vector.shape_cast %10 : vector<1x32x32xf32> to vector<32x32xf32>
    %cst_14 = arith.constant dense<0.000000e+00> : vector<32x32xf32>
    %12 = tpu.matmul %0, %11, %cst_14 {dimension_numbers = #tpu.dot_dimension_numbers<[1], [0], [0], [1], [0, 0, 1, 1], [], []>} : vector<32x32xf32>, vector<32x32xf32>, vector<32x32xf32> -> vector<32x32xf32>
    %c0_15 = arith.constant 0 : index
    %c0_16 = arith.constant 0 : index
    %c0_17 = arith.constant 0 : index
    %13 = vector.load %arg9[%c0_15, %c0_16, %c0_17] : memref<2x32x32xf32, #tpu.memory_space<vmem>>, vector<1x32x32xf32>
    %14 = vector.shape_cast %13 : vector<1x32x32xf32> to vector<32x32xf32>
    %15 = vector.shape_cast %12 : vector<32x32xf32> to vector<1x32x32xf32>
    tpu.vector_store %arg9[%c0_15, %c0_16, %c0_17], %15 {strides = array<i32>} : memref<2x32x32xf32, #tpu.memory_space<vmem>>, vector<1x32x32xf32>,
    %16 = vector.extract_strided_slice %12 {offsets = [0, 0], sizes = [16, 16], strides = [1, 1]} : vector<32x32xf32> to vector<16x16xf32>
    %cst_18 = arith.constant dense<0.000000e+00> : vector<16x16xf32>
    %17 = tpu.matmul %2, %16, %cst_18 {dimension_numbers = #tpu.dot_dimension_numbers<[1], [0], [0], [1], [0, 0, 1, 1], [], []>} : vector<16x16xf32>, vector<16x16xf32>, vector<16x16xf32> -> vector<16x16xf32>
    %cst_19 = arith.constant dense<0.000000e+00> : vector<16x16xf32>
    %18 = tpu.matmul %17, %3, %cst_19 {dimension_numbers = #tpu.dot_dimension_numbers<[1], [0], [0], [1], [0, 0, 1, 1], [], []>} : vector<16x16xf32>, vector<16x16xf32>, vector<16x16xf32> -> vector<16x16xf32>
    %c0_20 = arith.constant 0 : index
    %c0_21 = arith.constant 0 : index
    %c0_22 = arith.constant 0 : index
    %19 = vector.load %arg10[%c0_20, %c0_21, %c0_22] : memref<2x16x16xf32, #tpu.memory_space<vmem>>, vector<1x16x16xf32>
    %20 = vector.shape_cast %19 : vector<1x16x16xf32> to vector<16x16xf32>
    %21 = vector.shape_cast %18 : vector<16x16xf32> to vector<1x16x16xf32>
    tpu.vector_store %arg10[%c0_20, %c0_21, %c0_22], %21 {strides = array<i32>} : memref<2x16x16xf32, #tpu.memory_space<vmem>>, vector<1x16x16xf32>,
    %22 = vector.extract_strided_slice %18 {offsets = [0, 0], sizes = [8, 8], strides = [1, 1]} : vector<16x16xf32> to vector<8x8xf32>
    %cst_23 = arith.constant dense<0.000000e+00> : vector<8x8xf32>
    %23 = tpu.matmul %4, %22, %cst_23 {dimension_numbers = #tpu.dot_dimension_numbers<[1], [0], [0], [1], [0, 0, 1, 1], [], []>} : vector<8x8xf32>, vector<8x8xf32>, vector<8x8xf32> -> vector<8x8xf32>
    %cst_24 = arith.constant dense<0.000000e+00> : vector<8x8xf32>
    %24 = tpu.matmul %23, %5, %cst_24 {dimension_numbers = #tpu.dot_dimension_numbers<[1], [0], [0], [1], [0, 0, 1, 1], [], []>} : vector<8x8xf32>, vector<8x8xf32>, vector<8x8xf32> -> vector<8x8xf32>
    %c0_25 = arith.constant 0 : index
    %c0_26 = arith.constant 0 : index
    %c0_27 = arith.constant 0 : index
    %25 = vector.load %arg11[%c0_25, %c0_26, %c0_27] : memref<2x8x8xf32, #tpu.memory_space<vmem>>, vector<1x8x8xf32>
    %26 = vector.shape_cast %25 : vector<1x8x8xf32> to vector<8x8xf32>
    %27 = vector.shape_cast %24 : vector<8x8xf32> to vector<1x8x8xf32>
    tpu.vector_store %arg11[%c0_25, %c0_26, %c0_27], %27 {strides = array<i32>} : memref<2x8x8xf32, #tpu.memory_space<vmem>>, vector<1x8x8xf32>,
    %28 = vector.extract_strided_slice %9 {offsets = [1, 0, 0], sizes = [1, 32, 32], strides = [1, 1, 1]} : vector<2x32x32xf32> to vector<1x32x32xf32>
    %29 = vector.shape_cast %28 : vector<1x32x32xf32> to vector<32x32xf32>
    %cst_28 = arith.constant dense<0.000000e+00> : vector<32x32xf32>
    %30 = tpu.matmul %0, %29, %cst_28 {dimension_numbers = #tpu.dot_dimension_numbers<[1], [0], [0], [1], [0, 0, 1, 1], [], []>} : vector<32x32xf32>, vector<32x32xf32>, vector<32x32xf32> -> vector<32x32xf32>
    %c1 = arith.constant 1 : index
    %c0_29 = arith.constant 0 : index
    %c0_30 = arith.constant 0 : index
    %31 = vector.load %arg9[%c1, %c0_29, %c0_30] : memref<2x32x32xf32, #tpu.memory_space<vmem>>, vector<1x32x32xf32>
    %32 = vector.shape_cast %31 : vector<1x32x32xf32> to vector<32x32xf32>
    %33 = vector.shape_cast %30 : vector<32x32xf32> to vector<1x32x32xf32>
    tpu.vector_store %arg9[%c1, %c0_29, %c0_30], %33 {strides = array<i32>} : memref<2x32x32xf32, #tpu.memory_space<vmem>>, vector<1x32x32xf32>,
    %34 = vector.extract_strided_slice %30 {offsets = [0, 0], sizes = [16, 16], strides = [1, 1]} : vector<32x32xf32> to vector<16x16xf32>
    %cst_31 = arith.constant dense<0.000000e+00> : vector<16x16xf32>
    %35 = tpu.matmul %2, %34, %cst_31 {dimension_numbers = #tpu.dot_dimension_numbers<[1], [0], [0], [1], [0, 0, 1, 1], [], []>} : vector<16x16xf32>, vector<16x16xf32>, vector<16x16xf32> -> vector<16x16xf32>
    %cst_32 = arith.constant dense<0.000000e+00> : vector<16x16xf32>
    %36 = tpu.matmul %35, %3, %cst_32 {dimension_numbers = #tpu.dot_dimension_numbers<[1], [0], [0], [1], [0, 0, 1, 1], [], []>} : vector<16x16xf32>, vector<16x16xf32>, vector<16x16xf32> -> vector<16x16xf32>
    %c1_33 = arith.constant 1 : index
    %c0_34 = arith.constant 0 : index
    %c0_35 = arith.constant 0 : index
    %37 = vector.load %arg10[%c1_33, %c0_34, %c0_35] : memref<2x16x16xf32, #tpu.memory_space<vmem>>, vector<1x16x16xf32>
    %38 = vector.shape_cast %37 : vector<1x16x16xf32> to vector<16x16xf32>
    %39 = vector.shape_cast %36 : vector<16x16xf32> to vector<1x16x16xf32>
    tpu.vector_store %arg10[%c1_33, %c0_34, %c0_35], %39 {strides = array<i32>} : memref<2x16x16xf32, #tpu.memory_space<vmem>>, vector<1x16x16xf32>,
    %40 = vector.extract_strided_slice %36 {offsets = [0, 0], sizes = [8, 8], strides = [1, 1]} : vector<16x16xf32> to vector<8x8xf32>
    %cst_36 = arith.constant dense<0.000000e+00> : vector<8x8xf32>
    %41 = tpu.matmul %4, %40, %cst_36 {dimension_numbers = #tpu.dot_dimension_numbers<[1], [0], [0], [1], [0, 0, 1, 1], [], []>} : vector<8x8xf32>, vector<8x8xf32>, vector<8x8xf32> -> vector<8x8xf32>
    %cst_37 = arith.constant dense<0.000000e+00> : vector<8x8xf32>
    %42 = tpu.matmul %41, %5, %cst_37 {dimension_numbers = #tpu.dot_dimension_numbers<[1], [0], [0], [1], [0, 0, 1, 1], [], []>} : vector<8x8xf32>, vector<8x8xf32>, vector<8x8xf32> -> vector<8x8xf32>
    %c1_38 = arith.constant 1 : index
    %c0_39 = arith.constant 0 : index
    %c0_40 = arith.constant 0 : index
    %43 = vector.load %arg11[%c1_38, %c0_39, %c0_40] : memref<2x8x8xf32, #tpu.memory_space<vmem>>, vector<1x8x8xf32>
    %44 = vector.shape_cast %43 : vector<1x8x8xf32> to vector<8x8xf32>
    %45 = vector.shape_cast %42 : vector<8x8xf32> to vector<1x8x8xf32>
    tpu.vector_store %arg11[%c1_38, %c0_39, %c0_40], %45 {strides = array<i32>} : memref<2x8x8xf32, #tpu.memory_space<vmem>>, vector<1x8x8xf32>,
    %c0_41 = arith.constant 0 : index
    %c0_42 = arith.constant 0 : index
    %c0_43 = arith.constant 0 : index
    %46 = vector.load %arg2[%c0_41, %c0_42, %c0_43] : memref<2x32x32xf32, #tpu.memory_space<vmem>>, vector<2x32x32xf32>
    %47 = vector.shape_cast %46 : vector<2x32x32xf32> to vector<64x32xf32>
    %cst_44 = arith.constant dense<0.000000e+00> : vector<64x32xf32>
    %48 = tpu.matmul %47, %1, %cst_44 {dimension_numbers = #tpu.dot_dimension_numbers<[1], [0], [0], [1], [0, 0, 1, 1], [], []>} : vector<64x32xf32>, vector<32x32xf32>, vector<64x32xf32> -> vector<64x32xf32>
    %49 = vector.shape_cast %48 : vector<64x32xf32> to vector<2x32x32xf32>
    %50 = vector.extract_strided_slice %49 {offsets = [0, 0, 0], sizes = [1, 32, 32], strides = [1, 1, 1]} : vector<2x32x32xf32> to vector<1x32x32xf32>
    %51 = vector.shape_cast %50 : vector<1x32x32xf32> to vector<32x32xf32>
    %cst_45 = arith.constant dense<0.000000e+00> : vector<32x32xf32>
    %52 = tpu.matmul %0, %51, %cst_45 {dimension_numbers = #tpu.dot_dimension_numbers<[1], [0], [0], [1], [0, 0, 1, 1], [], []>} : vector<32x32xf32>, vector<32x32xf32>, vector<32x32xf32> -> vector<32x32xf32>
    %c0_46 = arith.constant 0 : index
    %c0_47 = arith.constant 0 : index
    %c0_48 = arith.constant 0 : index
    %53 = vector.load %arg12[%c0_46, %c0_47, %c0_48] : memref<2x32x32xf32, #tpu.memory_space<vmem>>, vector<1x32x32xf32>
    %54 = vector.shape_cast %53 : vector<1x32x32xf32> to vector<32x32xf32>
    %55 = vector.shape_cast %52 : vector<32x32xf32> to vector<1x32x32xf32>
    tpu.vector_store %arg12[%c0_46, %c0_47, %c0_48], %55 {strides = array<i32>} : memref<2x32x32xf32, #tpu.memory_space<vmem>>, vector<1x32x32xf32>,
    %56 = vector.extract_strided_slice %52 {offsets = [0, 0], sizes = [16, 16], strides = [1, 1]} : vector<32x32xf32> to vector<16x16xf32>
    %cst_49 = arith.constant dense<0.000000e+00> : vector<16x16xf32>
    %57 = tpu.matmul %2, %56, %cst_49 {dimension_numbers = #tpu.dot_dimension_numbers<[1], [0], [0], [1], [0, 0, 1, 1], [], []>} : vector<16x16xf32>, vector<16x16xf32>, vector<16x16xf32> -> vector<16x16xf32>
    %cst_50 = arith.constant dense<0.000000e+00> : vector<16x16xf32>
    %58 = tpu.matmul %57, %3, %cst_50 {dimension_numbers = #tpu.dot_dimension_numbers<[1], [0], [0], [1], [0, 0, 1, 1], [], []>} : vector<16x16xf32>, vector<16x16xf32>, vector<16x16xf32> -> vector<16x16xf32>
    %c0_51 = arith.constant 0 : index
    %c0_52 = arith.constant 0 : index
    %c0_53 = arith.constant 0 : index
    %59 = vector.load %arg13[%c0_51, %c0_52, %c0_53] : memref<2x16x16xf32, #tpu.memory_space<vmem>>, vector<1x16x16xf32>
    %60 = vector.shape_cast %59 : vector<1x16x16xf32> to vector<16x16xf32>
    %61 = vector.shape_cast %58 : vector<16x16xf32> to vector<1x16x16xf32>
    tpu.vector_store %arg13[%c0_51, %c0_52, %c0_53], %61 {strides = array<i32>} : memref<2x16x16xf32, #tpu.memory_space<vmem>>, vector<1x16x16xf32>,
    %62 = vector.extract_strided_slice %58 {offsets = [0, 0], sizes = [8, 8], strides = [1, 1]} : vector<16x16xf32> to vector<8x8xf32>
    %cst_54 = arith.constant dense<0.000000e+00> : vector<8x8xf32>
    %63 = tpu.matmul %4, %62, %cst_54 {dimension_numbers = #tpu.dot_dimension_numbers<[1], [0], [0], [1], [0, 0, 1, 1], [], []>} : vector<8x8xf32>, vector<8x8xf32>, vector<8x8xf32> -> vector<8x8xf32>
    %cst_55 = arith.constant dense<0.000000e+00> : vector<8x8xf32>
    %64 = tpu.matmul %63, %5, %cst_55 {dimension_numbers = #tpu.dot_dimension_numbers<[1], [0], [0], [1], [0, 0, 1, 1], [], []>} : vector<8x8xf32>, vector<8x8xf32>, vector<8x8xf32> -> vector<8x8xf32>
    %c0_56 = arith.constant 0 : index
    %c0_57 = arith.constant 0 : index
    %c0_58 = arith.constant 0 : index
    %65 = vector.load %arg14[%c0_56, %c0_57, %c0_58] : memref<2x8x8xf32, #tpu.memory_space<vmem>>, vector<1x8x8xf32>
    %66 = vector.shape_cast %65 : vector<1x8x8xf32> to vector<8x8xf32>
    %67 = vector.shape_cast %64 : vector<8x8xf32> to vector<1x8x8xf32>
    tpu.vector_store %arg14[%c0_56, %c0_57, %c0_58], %67 {strides = array<i32>} : memref<2x8x8xf32, #tpu.memory_space<vmem>>, vector<1x8x8xf32>,
    %68 = vector.extract_strided_slice %49 {offsets = [1, 0, 0], sizes = [1, 32, 32], strides = [1, 1, 1]} : vector<2x32x32xf32> to vector<1x32x32xf32>
    %69 = vector.shape_cast %68 : vector<1x32x32xf32> to vector<32x32xf32>
    %cst_59 = arith.constant dense<0.000000e+00> : vector<32x32xf32>
    %70 = tpu.matmul %0, %69, %cst_59 {dimension_numbers = #tpu.dot_dimension_numbers<[1], [0], [0], [1], [0, 0, 1, 1], [], []>} : vector<32x32xf32>, vector<32x32xf32>, vector<32x32xf32> -> vector<32x32xf32>
    %c1_60 = arith.constant 1 : index
    %c0_61 = arith.constant 0 : index
    %c0_62 = arith.constant 0 : index
    %71 = vector.load %arg12[%c1_60, %c0_61, %c0_62] : memref<2x32x32xf32, #tpu.memory_space<vmem>>, vector<1x32x32xf32>
    %72 = vector.shape_cast %71 : vector<1x32x32xf32> to vector<32x32xf32>
    %73 = vector.shape_cast %70 : vector<32x32xf32> to vector<1x32x32xf32>
    tpu.vector_store %arg12[%c1_60, %c0_61, %c0_62], %73 {strides = array<i32>} : memref<2x32x32xf32, #tpu.memory_space<vmem>>, vector<1x32x32xf32>,
    %74 = vector.extract_strided_slice %70 {offsets = [0, 0], sizes = [16, 16], strides = [1, 1]} : vector<32x32xf32> to vector<16x16xf32>
    %cst_63 = arith.constant dense<0.000000e+00> : vector<16x16xf32>
    %75 = tpu.matmul %2, %74, %cst_63 {dimension_numbers = #tpu.dot_dimension_numbers<[1], [0], [0], [1], [0, 0, 1, 1], [], []>} : vector<16x16xf32>, vector<16x16xf32>, vector<16x16xf32> -> vector<16x16xf32>
    %cst_64 = arith.constant dense<0.000000e+00> : vector<16x16xf32>
    %76 = tpu.matmul %75, %3, %cst_64 {dimension_numbers = #tpu.dot_dimension_numbers<[1], [0], [0], [1], [0, 0, 1, 1], [], []>} : vector<16x16xf32>, vector<16x16xf32>, vector<16x16xf32> -> vector<16x16xf32>
    %c1_65 = arith.constant 1 : index
    %c0_66 = arith.constant 0 : index
    %c0_67 = arith.constant 0 : index
    %77 = vector.load %arg13[%c1_65, %c0_66, %c0_67] : memref<2x16x16xf32, #tpu.memory_space<vmem>>, vector<1x16x16xf32>
    %78 = vector.shape_cast %77 : vector<1x16x16xf32> to vector<16x16xf32>
    %79 = vector.shape_cast %76 : vector<16x16xf32> to vector<1x16x16xf32>
    tpu.vector_store %arg13[%c1_65, %c0_66, %c0_67], %79 {strides = array<i32>} : memref<2x16x16xf32, #tpu.memory_space<vmem>>, vector<1x16x16xf32>,
    %80 = vector.extract_strided_slice %76 {offsets = [0, 0], sizes = [8, 8], strides = [1, 1]} : vector<16x16xf32> to vector<8x8xf32>
    %cst_68 = arith.constant dense<0.000000e+00> : vector<8x8xf32>
    %81 = tpu.matmul %4, %80, %cst_68 {dimension_numbers = #tpu.dot_dimension_numbers<[1], [0], [0], [1], [0, 0, 1, 1], [], []>} : vector<8x8xf32>, vector<8x8xf32>, vector<8x8xf32> -> vector<8x8xf32>
    %cst_69 = arith.constant dense<0.000000e+00> : vector<8x8xf32>
    %82 = tpu.matmul %81, %5, %cst_69 {dimension_numbers = #tpu.dot_dimension_numbers<[1], [0], [0], [1], [0, 0, 1, 1], [], []>} : vector<8x8xf32>, vector<8x8xf32>, vector<8x8xf32> -> vector<8x8xf32>
    %c1_70 = arith.constant 1 : index
    %c0_71 = arith.constant 0 : index
    %c0_72 = arith.constant 0 : index
    %83 = vector.load %arg14[%c1_70, %c0_71, %c0_72] : memref<2x8x8xf32, #tpu.memory_space<vmem>>, vector<1x8x8xf32>
    %84 = vector.shape_cast %83 : vector<1x8x8xf32> to vector<8x8xf32>
    %85 = vector.shape_cast %82 : vector<8x8xf32> to vector<1x8x8xf32>
    tpu.vector_store %arg14[%c1_70, %c0_71, %c0_72], %85 {strides = array<i32>} : memref<2x8x8xf32, #tpu.memory_space<vmem>>, vector<1x8x8xf32>,
    return
  }
  func.func @transform_0(%arg0: i32) -> (i32, i32, i32) {
    %c0_i32 = arith.constant 0 : i32
    %c0_i32_0 = arith.constant 0 : i32
    %c0_i32_1 = arith.constant 0 : i32
    return %arg0, %c0_i32, %c0_i32_0 : i32, i32, i32
  }
  func.func @transform_1(%arg0: i32) -> (i32, i32, i32) {
    %c0_i32 = arith.constant 0 : i32
    %c0_i32_0 = arith.constant 0 : i32
    %c0_i32_1 = arith.constant 0 : i32
    return %arg0, %c0_i32, %c0_i32_0 : i32, i32, i32
  }
  func.func @transform_2(%arg0: i32) -> (i32, i32) {
    %c0_i32 = arith.constant 0 : i32
    %c0_i32_0 = arith.constant 0 : i32
    %c0_i32_1 = arith.constant 0 : i32
    return %c0_i32, %c0_i32_0 : i32, i32
  }
  func.func @transform_3(%arg0: i32) -> (i32, i32) {
    %c0_i32 = arith.constant 0 : i32
    %c0_i32_0 = arith.constant 0 : i32
    %c0_i32_1 = arith.constant 0 : i32
    return %c0_i32, %c0_i32_0 : i32, i32
  }
  func.func @transform_4(%arg0: i32) -> (i32, i32) {
    %c0_i32 = arith.constant 0 : i32
    %c0_i32_0 = arith.constant 0 : i32
    %c0_i32_1 = arith.constant 0 : i32
    return %c0_i32, %c0_i32_0 : i32, i32
  }
  func.func @transform_5(%arg0: i32) -> (i32, i32) {
    %c0_i32 = arith.constant 0 : i32
    %c0_i32_0 = arith.constant 0 : i32
    %c0_i32_1 = arith.constant 0 : i32
    return %c0_i32, %c0_i32_0 : i32, i32
  }
  func.func @transform_6(%arg0: i32) -> (i32, i32) {
    %c0_i32 = arith.constant 0 : i32
    %c0_i32_0 = arith.constant 0 : i32
    %c0_i32_1 = arith.constant 0 : i32
    return %c0_i32, %c0_i32_0 : i32, i32
  }
  func.func @transform_7(%arg0: i32) -> (i32, i32) {
    %c0_i32 = arith.constant 0 : i32
    %c0_i32_0 = arith.constant 0 : i32
    %c0_i32_1 = arith.constant 0 : i32
    return %c0_i32, %c0_i32_0 : i32, i32
  }
  func.func @transform_8(%arg0: i32) -> (i32, i32, i32) {
    %c0_i32 = arith.constant 0 : i32
    %c0_i32_0 = arith.constant 0 : i32
    %c0_i32_1 = arith.constant 0 : i32
    return %arg0, %c0_i32, %c0_i32_0 : i32, i32, i32
  }
  func.func @transform_9(%arg0: i32) -> (i32, i32, i32) {
    %c0_i32 = arith.constant 0 : i32
    %c0_i32_0 = arith.constant 0 : i32
    %c0_i32_1 = arith.constant 0 : i32
    return %arg0, %c0_i32, %c0_i32_0 : i32, i32, i32
  }
  func.func @transform_10(%arg0: i32) -> (i32, i32, i32) {
    %c0_i32 = arith.constant 0 : i32
    %c0_i32_0 = arith.constant 0 : i32
    %c0_i32_1 = arith.constant 0 : i32
    return %arg0, %c0_i32, %c0_i32_0 : i32, i32, i32
  }
  func.func @transform_11(%arg0: i32) -> (i32, i32, i32) {
    %c0_i32 = arith.constant 0 : i32
    %c0_i32_0 = arith.constant 0 : i32
    %c0_i32_1 = arith.constant 0 : i32
    return %arg0, %c0_i32, %c0_i32_0 : i32, i32, i32
  }
  func.func @transform_12(%arg0: i32) -> (i32, i32, i32) {
    %c0_i32 = arith.constant 0 : i32
    %c0_i32_0 = arith.constant 0 : i32
    %c0_i32_1 = arith.constant 0 : i32
    return %arg0, %c0_i32, %c0_i32_0 : i32, i32, i32
  }
  func.func @transform_13(%arg0: i32) -> (i32, i32, i32) {
    %c0_i32 = arith.constant 0 : i32
    %c0_i32_0 = arith.constant 0 : i32
    %c0_i32_1 = arith.constant 0 : i32
    return %arg0, %c0_i32, %c0_i32_0 : i32, i32, i32
  }
}

</mosaic_0001>

<bundles_post_ra>
// kernel: tpu_custom_call.1
= control target key start
LH: loop header
LB: loop body
LE: loop exit
PB: predicated region body
PF: predicated region fallthrough
CT: control target
= control target key end

     0   :  { %s4748_s0 = inlined_call_operand.hbm [shape: f32[4,32,32], index: 0, kind: input, shape index: {}]   ;;  %s4749_s1 = inlined_call_operand.hbm [shape: f32[4,32,32], index: 1, kind: input, shape index: {}]   ;;  %s4750_s2 = inlined_call_operand.hbm [shape: f32[32,32], index: 2, kind: input, shape index: {}]   ;;  %s4751_s3 = inlined_call_operand.hbm [shape: f32[32,32], index: 3, kind: input, shape index: {}]   ;;  %s4752_s4 = inlined_call_operand.hbm [shape: f32[16,16], index: 4, kind: input, shape index: {}]   ;;  %s4753_s5 = inlined_call_operand.hbm [shape: f32[16,16], index: 5, kind: input, shape index: {}]   ;;  %s4754_s6 = inlined_call_operand.vmem [shape: f32[8,8], index: 6, kind: input, shape index: {}]   ;;  %s4755_s7 = inlined_call_operand.hbm [shape: f32[8,8], index: 7, kind: input, shape index: {}]   ;;  %s4756_s8 = inlined_call_operand.hbm [shape: f32[4,32,32], index: 8, kind: output, shape index: {0}]   ;;  %s4757_s9 = inlined_call_operand.hbm [shape: f32[4,16,16], index: 9, kind: output, shape index: {1}]   ;;  %s4758_s10 = inlined_call_operand.hbm [shape: f32[4,8,8], index: 10, kind: output, shape index: {2}]   ;;  %s4759_s11 = inlined_call_operand.hbm [shape: f32[4,32,32], index: 11, kind: output, shape index: {3}]   ;;  %s4760_s12 = inlined_call_operand.hbm [shape: f32[4,16,16], index: 12, kind: output, shape index: {4}]   ;;  %s4761_s13 = inlined_call_operand.hbm [shape: f32[4,8,8], index: 13, kind: output, shape index: {5}]  }
   0x1   :  { %4776 = sst [smem:[#allocation37_spill]] %s4748_s0 }
   0x2   :  { %4777 = sst [smem:[#allocation38_spill]] %s4749_s1 }
   0x3   :  { %4778 = sst [smem:[#allocation39_spill]] %s4750_s2 }
   0x4   :  { %4779 = sst [smem:[#allocation40_spill]] %s4751_s3 }
   0x5   :  { %4780 = sst [smem:[#allocation41_spill]] %s4752_s4 }
   0x6   :  { %4781 = sst [smem:[#allocation42_spill]] %s4753_s5 }
   0x7   :  { %4782 = sst [smem:[#allocation43_spill]] %s4754_s6 }
   0x8   :  { %4783 = sst [smem:[#allocation44_spill]] %s4755_s7 }
   0x9   :  { %4784 = sst [smem:[#allocation45_spill]] %s4757_s9 }
   0xa   :  { %4785 = sst [smem:[#allocation46_spill]] %s4761_s13 }
   0xb   :  { %19 = vsyncpa [#allocation3], 0 }
   0xc   :  { %21 = vsyncpa [#allocation3 + $0x1], 0 }
   0xd   :  { %22 = vsyncpa [#allocation6], 0 }
   0xe   :  { %24 = vsyncpa [#allocation6 + $0x1], 0 }
   0xf   :  { %25 = vsyncpa [#allocation9], 0 }
  0x10   :  { %26 = vsyncpa [#allocation12], 0 }
  0x11   :  { %27 = vsyncpa [#allocation4], 0 }
  0x12   :  { %29 = vsyncpa [#allocation4 + $0x1], 0 }
  0x13   :  { %30 = vsyncpa [#allocation16], 0 }
  0x14   :  { %32 = vsyncpa [#allocation16 + $0x1], 0 }
  0x15   :  { %33 = vsyncpa [#allocation19], 0 }
  0x16   :  { %35 = vsyncpa [#allocation19 + $0x1], 0 }
  0x17   :  { %36 = vsyncpa [#allocation22], 0 }
  0x18   :  { %38 = vsyncpa [#allocation22 + $0x1], 0  ;;  %s3992_s25 = smov 0   ;;  %s3994_s26 = smov 0  }
  0x19   :  { %s3996_s27 = smov 0   ;;  %s3998_s28 = smov 0  }
  0x1a LB: > { %4786 = sst [smem:[#allocation32_spill]] %s3889_s25  ;;  %s3903_s29 = smov [#allocation7]   ;;  %s3901_s28 = sphi %s3998_s28, %s4825_s28   ;;  %s3897_s27 = sphi %s3996_s27, %s4827_s27   ;;  %s3893_s26 = sphi %s3994_s26, %s4829_s26   ;;  %s3889_s25 = sphi %s3992_s25, %s4828_s25  }
  0x1b   : > { %4787 = sst [smem:[#allocation33_spill]] %s3897_s27  ;;  %s395_s30 = sshll.u32 %s3903_s29, 4  ;;  %s396_s30 = int_to_ptr.vmem [resolvable:$true] %s395_s30 }
  0x1c   : > { %s4013_s14 = sadd.s32 4294967295, %s3901_s28   ;;  %p2927_p0 = scmp.ge.s32.totalorder %s3901_s28, 1 }
  0x1d   : > { %p4772_p1 = scmp.eq.s32.totalorder %s4013_s14, 0  ;;  %p383_p2 = scmp.lt.s32.totalorder %s3901_s28, 3 }
  0x1e   : > { %s3904_s16 = smov [#allocation8]   ;;  %s3905_s19 = smov [#allocation11]  }
  0x1f   : > { %p4018_p3 = pnand %p2927_p0, %p383_p2  ;;  %s408_s17 = sshll.u32 %s3904_s16, 4  ;;  %s4031_s17 = int_to_ptr.vmem [resolvable:$true] %s408_s17 }
  0x20   : > { %s434_s20 = sshll.u32 %s3905_s19, 4  ;;  %s3504_s22 = scalar_lea.vmem %s396_s30, 512  ;;  %s4033_s20 = int_to_ptr.vmem [resolvable:$true] %s434_s20 }
  0x21   : > { %p3396_p5 = pneg %p4018_p3  ;;  %p3505_p8 = scmp.ne.s32.totalorder %s396_s30, %s3504_s22 }
  0x22   : > { %p3512_p11 = scmp.lt.s32.totalorder %s396_s30, %s396_s30  ;;  %p3513_p12 = scmp.lt.s32.totalorder %s3504_s22, %s3504_s22 }
  0x23   : > { %p4027_p6 = pnand %p3396_p5, %p4772_p1 }
  0x24   : > { %p3514_p13 = por %p3513_p12, %p3512_p11 }
  0x25   : > { %p4037_p7 = pneg %p4027_p6 }
  0x27   : > { %p3507_p9 = pnand %p3505_p8, %p4037_p7 }
  0x29   : > { %p3508_p10 = pneg %p3507_p9 }
  0x2b   : > { %p3515_p0 = pnand %p3514_p13, %p3508_p10 }
  0x2d   : > { %3518 = shalt.err (!%p3515_p0)
}
  0x2e   : > { %s4762_s23 = smov 128   ;;  %s4764_s24 = smov 8  }
  0x2f   : > { %s4791_s2 = sld [smem:[#allocation39_spill]]  ;;  %s3530_s19 = scalar_lea.vmem %s4031_s17, 512 }
  0x30   : > { %p3531_p2 = scmp.ne.s32.totalorder %s4031_s17, %s3530_s19  ;;  %p3538_p9 = scmp.lt.s32.totalorder %s4031_s17, %s4031_s17 }
  0x31   : > { %p3539_p10 = scmp.lt.s32.totalorder %s3530_s19, %s3530_s19 }
  0x32   : > { %p3533_p5 = pnand %p3531_p2, %p4037_p7 }
  0x33   : > { %p3540_p11 = por %p3539_p10, %p3538_p9 }
  0x34   : > { %p3534_p8 = pneg %p3533_p5 }
  0x35   : > { %3399 = dma.hbm_to_vmem [thread:$0]  (!%p4027_p6), %s4791_s2, 512, %s396_s30, [#allocation6], %s4762_s23, %s4762_s23, %s4764_s24  }
  0x36   : > { %p3541_p12 = pnand %p3540_p11, %p3534_p8 }
  0x38   : > { %3544 = shalt.err (!%p3541_p12)
}
  0x39   : > { %s4792_s3 = sld [smem:[#allocation40_spill]]  ;;  %s3556_s30 = scalar_lea.vmem %s4033_s20, 256 }
  0x3a   : > { %p3557_p13 = scmp.ne.s32.totalorder %s4033_s20, %s3556_s30  ;;  %p3564_p5 = scmp.lt.s32.totalorder %s4033_s20, %s4033_s20 }
  0x3b   : > { %p3565_p8 = scmp.lt.s32.totalorder %s3556_s30, %s3556_s30 }
  0x3c   : > { %p3559_p0 = pnand %p3557_p13, %p4037_p7 }
  0x3d   : > { %p3566_p9 = por %p3565_p8, %p3564_p5 }
  0x3e   : > { %p3560_p2 = pneg %p3559_p0 }
  0x3f   : > { %3402 = dma.hbm_to_vmem [thread:$0]  (!%p4027_p6), %s4792_s3, 512, %s4031_s17, [#allocation9], %s4762_s23, %s4762_s23, %s4764_s24  }
  0x40   : > { %p3567_p10 = pnand %p3566_p9, %p3560_p2 }
  0x42   : > { %3570 = shalt.err (!%p3567_p10)
}
  0x43   : > { %s4793_s5 = sld [smem:[#allocation42_spill]]  ;;  %s3908_s17 = smov [#allocation10]  }
  0x44   : > { %s421_s22 = sshll.u32 %s3908_s17, 4  ;;  %s3909_s29 = smov [#allocation13]   ;;  %s422_s22 = int_to_ptr.vmem [resolvable:$true] %s421_s22 }
  0x45   : > { %s451_s2 = sshll.u32 %s3909_s29, 4  ;;  %s3582_s30 = scalar_lea.vmem %s422_s22, 256  ;;  %s452_s2 = int_to_ptr.vmem [resolvable:$true] %s451_s2 }
  0x46   : > { %p3583_p11 = scmp.ne.s32.totalorder %s422_s22, %s3582_s30  ;;  %p3590_p0 = scmp.lt.s32.totalorder %s422_s22, %s422_s22 }
  0x47   : > { %p3591_p2 = scmp.lt.s32.totalorder %s3582_s30, %s3582_s30 }
  0x48   : > { %p3585_p12 = pnand %p3583_p11, %p4037_p7 }
  0x49   : > { %3408 = dma.hbm_to_vmem [thread:$0]  (!%p4027_p6), %s4793_s5, 256, %s4033_s20, [#allocation12], %s4762_s23, %s4762_s23, %s4764_s24  }
  0x4a   : > { %p3586_p13 = pneg %p3585_p12  ;;  %p3592_p5 = por %p3591_p2, %p3590_p0 }
  0x4c   : > { %p3593_p8 = pnand %p3592_p5, %p3586_p13 }
  0x4e   : > { %3596 = shalt.err (!%p3593_p8)
}
  0x4f   : > { %s4794_s4 = sld [smem:[#allocation41_spill]]  ;;  %s3608_s19 = scalar_lea.vmem %s452_s2, 128 }
  0x50   : > { %p3609_p9 = scmp.ne.s32.totalorder %s452_s2, %s3608_s19  ;;  %p3616_p12 = scmp.lt.s32.totalorder %s452_s2, %s452_s2 }
  0x51   : > { %p3617_p0 = scmp.lt.s32.totalorder %s3608_s19, %s3608_s19 }
  0x52   : > { %p3611_p10 = pnand %p3609_p9, %p4037_p7 }
  0x53   : > { %p3618_p13 = por %p3617_p0, %p3616_p12 }
  0x54   : > { %p3612_p11 = pneg %p3611_p10 }
  0x55   : > { %3405 = dma.hbm_to_vmem [thread:$0]  (!%p4027_p6), %s4794_s4, 256, %s422_s22, [#allocation9], %s4762_s23, %s4762_s23, %s4764_s24  }
  0x56   : > { %p3619_p2 = pnand %p3618_p13, %p3612_p11 }
  0x58   : > { %3622 = shalt.err (!%p3619_p2)
}
  0x59   : > { %s4795_s7 = sld [smem:[#allocation44_spill]]  ;;  %s4766_s18 = sadd.s32 4294967294, %s3901_s28  }
  0x5a   : > { %s4100_s21 = sadd.s32 1, %s3901_s28   ;;  %s51_s22 = sadd.s32 1, %s3897_s27 }
  0x5b   : > { %4796 = sst [smem:[#allocation34_spill]] %s4100_s21  ;;  %s48_s30 = ssub.s32 %s3901_s28, %s4100_s21 }
  0x5c   : > { %p58_p7 = scmp.ne.s32.totalorder %s3897_s27, %s3893_s26  ;;  %p49_p5 = scmp.eq.s32.totalorder %s48_s30, 0 }
  0x5d   : > { %p59_p8 = scmp.eq.s32.totalorder %s3901_s28, 0  ;;  %p64_p9 = scmp.ne.s32.totalorder %s3893_s26, %s3889_s25 }
  0x5e   : > { %p240_p10 = scmp.eq.s32.totalorder %s4013_s14, 1  ;;  %p246_p0 = scmp.eq.s32.totalorder %s4766_s18, 1 }
  0x5f   : > { %3411 = dma.hbm_to_vmem [thread:$0]  (!%p4027_p6), %s4795_s7, 128, %s452_s2, [#allocation12]  }
  0x60   : > { %s4112_s20 = scalar_select %p49_p5, %s3897_s27, %s51_s22  }
  0x61   : > { %p60_p11 = por %p59_p8, %p58_p7  ;;  %p4116_p12 = por %p4772_p1, %p64_p9 }
  0x62   : > { %4797 = sst [smem:[#allocation35_spill]] %s4112_s20  ;;  %p4120_p6 = por %p240_p10, %p58_p7 }
  0x63   : > { %s4798_s16 = scalar_select %p4116_p12, 1, 0 }
  0x64   : > { %s4799_s2 = scalar_select %p4120_p6, 1, 0 }
  0x65   : > { %p3443_p13 = scmp.lt.s32.totalorder %s3901_s28, 2  ;;  %s462_s19 = sand.u32 1, %s3897_s27  }
  0x66   : > { %p4128_p2 = por %p246_p0, %p64_p9  ;;  %s4132_s29 = sshll.u32 %s462_s19, 6 }
  0x67   : > { %s3051_s22 = sshll.u32 %s3901_s28, 10  ;;  %s4802_s0 = sld [smem:[#allocation37_spill]] }
  0x68   : > { %s4800_s17 = scalar_select %p4128_p2, 1, 0 }
  0x69   : > { %s466_s3 = scalar_lea.vmem [#allocation2], %s4132_s29  ;;  %p4141_p7 = pnand %p3443_p13, %p60_p11 }
  0x6a   : > { %4801 = sst [smem:[#allocation36_spill]] %s4800_s17  ;;  %s474_s18 = sshll.u32 %s466_s3, 4  ;;  %s4145_s18 = int_to_ptr.vmem [resolvable:$true] %s474_s18 }
  0x6b   : > { %s4804_s1 = sld [smem:[#allocation38_spill]]  ;;  %s4152_s23 = scalar_lea.sflag [#allocation3], %s462_s19 }
  0x6c   : > { %p3625_p8 = pneg %p4141_p7 }
  0x6d   : > { %s4138_s24 = scalar_lea.hbm %s4802_s0, %s3051_s22  ;;  %s3628_s21 = scalar_lea.hbm %s4802_s0, 2048 }
  0x6e   : > { %s3623_s30 = scalar_lea.hbm %s4138_s24, 1024  ;;  %p3629_p11 = scmp.lt.s32.totalorder %s4138_s24, %s4802_s0 }
  0x6f   : > { %p3624_p5 = scmp.ne.s32.totalorder %s4138_s24, %s3623_s30  ;;  %p3630_p0 = scmp.lt.s32.totalorder %s3628_s21, %s3623_s30 }
  0x71   : > { %s4150_s20 = scalar_lea.hbm %s4804_s1, %s3051_s22  ;;  %p3626_p9 = pnand %p3625_p8, %p3624_p5 }
  0x72   : > { %p3631_p13 = por %p3630_p0, %p3629_p11 }
  0x73   : > { %p3627_p10 = pneg %p3626_p9 }
  0x75   : > { %p3632_p4 = pnand %p3631_p13, %p3627_p10 }
  0x77   : > { %3635 = shalt.err (!%p3632_p4)
}
  0x78   : > { %s3636_s5 = scalar_lea.vmem %s4145_s18, 1024  ;;  %s3910_s7 = smov [#allocation2]  }
  0x79   : > { %p3637_p1 = scmp.ne.s32.totalorder %s4145_s18, %s3636_s5  ;;  %s3641_s27 = sshll.u32 %s3910_s7, 4  ;;  %s3642_s27 = int_to_ptr.vmem [resolvable:$false] %s3641_s27 }
  0x7a   : > { %s3643_s19 = scalar_lea.vmem %s3642_s27, 2048  ;;  %p3644_p2 = scmp.lt.s32.totalorder %s4145_s18, %s3642_s27 }
  0x7b   : > { %p3639_p5 = pnand %p3637_p1, %p3625_p8  ;;  %p3645_p6 = scmp.lt.s32.totalorder %s3643_s19, %s3636_s5 }
  0x7d   : > { %p3640_p9 = pneg %p3639_p5  ;;  %p3646_p12 = por %p3645_p6, %p3644_p2 }
  0x7f   : > { %p3647_p11 = pnand %p3646_p12, %p3640_p9 }
  0x81   : > { %3650 = shalt.err (!%p3647_p11)
}
  0x82   : > { %s4805_s25 = smov 8   ;;  %s4806_s21 = smov 128  }
  0x83   : > { %3415 = dma.hbm_to_vmem [thread:$0]  (!%p4141_p7), %s4138_s24, 1024, %s4145_s18, %s4152_s23, %s4806_s21, %s4806_s21, %s4805_s25  }
  0x84   : > { %s488_s17 = scalar_lea.vmem [#allocation5], %s4132_s29  ;;  %s484_s30 = sand.u32 1, %s3901_s28  }
  0x85   : > { %s496_s22 = sshll.u32 %s488_s17, 4  ;;  %s485_s3 = scalar_lea.sflag [#allocation6], %s484_s30  ;;  %s4184_s22 = int_to_ptr.vmem [resolvable:$true] %s496_s22 }
  0x86   : > { %s3651_s5 = scalar_lea.hbm %s4150_s20, 1024  ;;  %s3656_s19 = scalar_lea.hbm %s4804_s1, 2048 }
  0x87   : > { %p3652_p1 = scmp.ne.s32.totalorder %s4150_s20, %s3651_s5  ;;  %p3657_p6 = scmp.lt.s32.totalorder %s4150_s20, %s4804_s1 }
  0x88   : > { %p3658_p2 = scmp.lt.s32.totalorder %s3656_s19, %s3651_s5 }
  0x89   : > { %p3654_p4 = pnand %p3652_p1, %p3625_p8 }
  0x8a   : > { %p3659_p10 = por %p3658_p2, %p3657_p6 }
  0x8b   : > { %p3655_p12 = pneg %p3654_p4 }
  0x8d   : > { %p3660_p0 = pnand %p3659_p10, %p3655_p12 }
  0x8f   : > { %3663 = shalt.err (!%p3660_p0)
}
  0x90   : > { %s3664_s24 = scalar_lea.vmem %s4184_s22, 1024  ;;  %s3911_s18 = smov [#allocation5]  }
  0x91   : > { %p3665_p13 = scmp.ne.s32.totalorder %s4184_s22, %s3664_s24  ;;  %s3669_s29 = sshll.u32 %s3911_s18, 4  ;;  %s3670_s29 = int_to_ptr.vmem [resolvable:$false] %s3669_s29 }
  0x92   : > { %s3671_s23 = scalar_lea.vmem %s3670_s29, 2048  ;;  %p3672_p11 = scmp.lt.s32.totalorder %s4184_s22, %s3670_s29 }
  0x93   : > { %p3667_p5 = pnand %p3665_p13, %p3625_p8  ;;  %p3673_p1 = scmp.lt.s32.totalorder %s3671_s23, %s3664_s24 }
  0x95   : > { %p3668_p9 = pneg %p3667_p5  ;;  %p3674_p4 = por %p3673_p1, %p3672_p11 }
  0x97   : > { %p3675_p6 = pnand %p3674_p4, %p3668_p9 }
  0x99   : > { %3678 = shalt.err (!%p3675_p6)
}
  0x9a   : > { %3418 = dma.hbm_to_vmem [thread:$0]  (!%p4141_p7), %s4150_s20, 1024, %s4184_s22, %s485_s3, %s4806_s21, %s4806_s21, %s4805_s25  }
  0x9b   : > { %508 = sbr.rel (%p4018_p3) target bundleno = 3373 (0xd2d), region = 52  ;;  %s4214_s0 = sand.u32 (!%p4018_p3), 1, %s3893_s26  }
  0x9c   : > { %s4217_s13 = sshll.u32 (!%p4018_p3), %s4214_s0, 6  ;;  %s511_s17 = scalar_lea.sflag (!%p4018_p3), [#allocation3], %s4214_s0 }
  0x9d   : > { %s4221_s4 = scalar_lea.vmem (!%p4018_p3), [#allocation2], %s4217_s13  ;;  %p4807_p8 = scmp.ne.s32.totalorder (!%p4018_p3), %s4798_s16, 0 }
  0xa0   : > { %3852 = dma.done.wait (%p4807_p8), %s511_s17, 1024  }
  0xa1   : > { %3854 = vsyncadd (%p4807_p8), %s511_s17, 4294966272  ;;  %s4228_s15 = sand.u32 1, %s4013_s14   ;;  %s4232_s25 = scalar_lea.vmem [#allocation5], %s4217_s13 }
  0xa2   : > { %s520_s20 = scalar_lea.sflag [#allocation6], %s4228_s15 }
  0xa3   : > { %3856 = dma.done.wait (%p4807_p8), %s520_s20, 1024  }
  0xa4   : > { %3858 = vsyncadd (%p4807_p8), %s520_s20, 4294966272  ;;  %p4808_p3 = scmp.eq.s32.totalorder %s4013_s14, 0 }
  0xa6   : > { %3860 = dma.done.wait (%p4808_p3), [#allocation6], 512   ;;  %p4809_p7 = pmov %p4808_p3 }
  0xa7   : > { %p4810_p12 = pmov %p4808_p3 }
  0xa8   : > { %3862 = vsyncadd (%p4809_p7), [#allocation6], 4294966784 }
  0xa9   : > { %3864 = dma.done.wait (%p4810_p12), [#allocation9], 768   ;;  %p4811_p2 = pmov %p4808_p3 }
  0xab   : > { %3866 = vsyncadd (%p4811_p2), [#allocation9], 4294966528  ;;  %p4812_p10 = pmov %p4811_p2 }
  0xac   : > { %p4813_p0 = pmov %p4811_p2 }
  0xad   : > { %3868 = dma.done.wait (%p4812_p10), [#allocation12], 384  }
  0xae   : > { %3870 = vsyncadd (%p4813_p0), [#allocation12], 4294966912  ;;  %vm646_vm0 = vcmask 261120   ;;  %v4250_v0 = vld [vmem:[#allocation8 + $0x18] sm:$0xff]  ;;  %v4252_v1 = vld [vmem:[#allocation8 + $0x10] sm:$0xff]  ;;  %vm877_vm1 = vcmask 130048  }
  0xaf   : > { %3168 = vmatprep.subr.mxu0 %v4250_v0  ;;  %v638_v2 = vld [vmem:[%s4221_s4] sm:$0xff]  ;;  %v4257_v3 = vld [vmem:[#allocation8 + $0x8] sm:$0xff]  ;;  %v640_v6 = vld [vmem:[%s4221_s4 + $0x10] sm:$0xff]  ;;  %s4297_s16 = scalar_lea.vmem [#allocation14], %s4217_s13  ;;  %v3912_v30 = vmov 0.0   ;;  %vm3913_vm2 = vmmov 0  }
  0xb0   : > { %3169 = vmatpush3.msra.mxu0 %v4250_v0  ;;  %3176 = vmatprep.mubr.msk.f32.mxu0 %vm646_vm0, %v638_v2  ;;  %v4262_v4 = vld [vmem:[#allocation8] sm:$0xff]  ;;  %v639_v5 = vld [vmem:[%s4221_s4 + $0x8] sm:$0xff]  ;;  %v641_v7 = vld [vmem:[%s4221_s4 + $0x18] sm:$0xff]  ;;  %s2951_s21 = sshll.u32 %s4214_s0, 5  ;;  %s4814_s6 = sld [smem:[#allocation43_spill]]  ;;  %vm1042_vm3 = vcmask 64512  }
  0xb1   : > { %3170 = vmatprep.subr.mxu0 %v4252_v1  ;;  %v4274_v8 = vld [vmem:[#allocation7] sm:$0xff]  ;;  %v4278_v13 = vld [vmem:[#allocation7 + $0x8] sm:$0xff]  ;;  %v4280_v14 = vld [vmem:[#allocation7 + $0x10] sm:$0xff]  ;;  %s4336_s22 = scalar_lea.vmem [#allocation15], %s2951_s21  ;;  %s2952_s5 = sshll.u32 %s4214_s0, 4 }
  0xb2   : > { %3171 = vmatpush3.msra.mxu0 %v4252_v1  ;;  %3196 = vmatprep.mubr.msk.f32.mxu1 %vm646_vm0, %v4274_v8  ;;  %v4286_v15 = vld [vmem:[#allocation7 + $0x18] sm:$0xff]  ;;  %v4290_v16 = vld [vmem:[#allocation10] sm:$0xff]  ;;  %v4301_v20 = vld [vmem:[#allocation10 + $0x8] sm:$0xff]  ;;  %s4381_s7 = scalar_lea.vmem [#allocation17], %s2952_s5  ;;  %s4430_s27 = scalar_lea.vmem [#allocation18], %s4217_s13 }
  0xb3   : > { %3172 = vmatprep.subr.mxu0 %v4257_v3  ;;  %v642_v17 = vld [vmem:[%s4221_s4 + $0x20] sm:$0xff]  ;;  %v4311_v23 = vld [vmem:[#allocation11 + $0x8] sm:$0xff]  ;;  %v643_v24 = vld [vmem:[%s4221_s4 + $0x28] sm:$0xff]  ;;  %s4464_s19 = scalar_lea.vmem [#allocation20], %s2951_s21  ;;  %s4500_s24 = scalar_lea.vmem [#allocation21], %s2952_s5 }
  0xb4   : > { %3173 = vmatpush3.msra.mxu0 %v4257_v3  ;;  %v4317_v25 = vld [vmem:[#allocation11] sm:$0xff]  ;;  %v645_v27 = vld [vmem:[%s4221_s4 + $0x38] sm:$0xff]  ;;  %v4360_v38 = vld [vmem:[#allocation13] sm:$0xff]  ;;  %s2546_s18 = sshll.u32 %s4297_s16, 4  ;;  %s2563_s29 = sshll.u32 %s4336_s22, 4  ;;  %s4524_s18 = int_to_ptr.vmem [resolvable:$true] %s2546_s18  ;;  %s4526_s29 = int_to_ptr.vmem [resolvable:$true] %s2563_s29 }
  0xb5   : > { %3174 = vmatprep.subr.mxu0 %v4262_v4  ;;  %v644_v26 = vld [vmem:[%s4221_s4 + $0x30] sm:$0xff]  ;;  %v1584_v49 = vld [vmem:[%s4232_s25] sm:$0xff]  ;;  %v1585_v50 = vld [vmem:[%s4232_s25 + $0x8] sm:$0xff]  ;;  %s2579_s23 = sshll.u32 %s4381_s7, 4  ;;  %s2596_s13 = sshll.u32 %s4430_s27, 4  ;;  %s4528_s23 = int_to_ptr.vmem [resolvable:$true] %s2579_s23  ;;  %s4530_s13 = int_to_ptr.vmem [resolvable:$true] %s2596_s13 }
  0xb6   : > { %3175 = vmatpush3.msra.mxu0 %v4262_v4  ;;  %v4343_v35 = vld [vmem:[%s4814_s6] sm:$0xff]  ;;  %v1586_v51 = vld [vmem:[%s4232_s25 + $0x10] sm:$0xff]  ;;  %v1587_v52 = vld [vmem:[%s4232_s25 + $0x18] sm:$0xff]  ;;  %s2613_s17 = sshll.u32 %s4464_s19, 4  ;;  %s3057_s4 = sshll.u32 %s4013_s14, 9  ;;  %s4532_s17 = int_to_ptr.vmem [resolvable:$true] %s2613_s17 }
  0xb7   : > { %3177 = vmatmul.mubr.msk.f32.vlgmr.msra.gmra.mxu0 %vm646_vm0, %v639_v5  ;;  %3216 = vmatprep.subr.mxu0 %v3912_v30  ;;  %v1590_v5 = vld [vmem:[%s4232_s25 + $0x30] sm:$0xff]  ;;  %s4815_s9 = sld [smem:[#allocation45_spill]]  ;;  %s3679_s30 = scalar_lea.vmem %s4526_s29, 512 }
  0xb8   : > { %3179 = vmatprep.mubr.msk.f32.mxu0 %vm646_vm0, %v640_v6  ;;  %v1591_v6 = vld [vmem:[%s4232_s25 + $0x38] sm:$0xff]  ;;  %p3680_p13 = scmp.ne.s32.totalorder %s4526_s29, %s3679_s30  ;;  %p4816_p5 = scmp.ne.s32.totalorder %s4799_s2, 0 }
  0xb9   : > { %s3914_s3 = smov [#allocation15]  }
  0xba   : > { %p3681_p9 = pnand %p3680_p13, %p4816_p5  ;;  %s3683_s5 = sshll.u32 %s3914_s3, 4  ;;  %s3684_s5 = int_to_ptr.vmem [resolvable:$false] %s3683_s5 }
  0xbb   : > { %3180 = vmatmul.mubr.msk.f32.gmra.mxu0 %vm646_vm0, %v641_v7  ;;  %p3686_p1 = scmp.lt.s32.totalorder %s4526_s29, %s3684_s5 }
  0xbc   : > { %3182 = vmatprep.mubr.msk.f32.mxu0 %vm646_vm0, %v642_v17  ;;  %p3682_p11 = pneg %p3681_p9 }
  0xbd   : > { %s4541_s21 = scalar_lea.hbm %s4815_s9, %s3057_s4 }
  0xbf   : > { %3183 = vmatmul.mubr.msk.f32.gmra.mxu0 %vm646_vm0, %v643_v24 }
  0xc0   : > { %3185 = vmatprep.mubr.msk.f32.mxu0 %vm646_vm0, %v644_v26 }
  0xc3   : > { %3186 = vmatmul.mubr.msk.f32.gmra.mxu0 %vm646_vm0, %v645_v27 }
  0xc4   : > { %3218 = vmatprep.mubr.msk.f32.mxu0 %vm3913_vm2, %v3912_v30 }
 0x177   : > { %v3178_v9 = vpop.f32.mrf.mxu0 }
 0x179   : > { %v737_v10 = vpop.f32.mrf.mxu0 }
 0x17b   : > { %v3181_v11 = vpop.f32.mrf.mxu0 }
 0x17c   : > { %3188 = vmatprep.subr.mxu1 %v3181_v11 }
 0x17d   : > { %v747_v12 = vpop.f32.mrf.mxu0  ;;  %3189 = vmatpush3.msra.mxu1 %v3181_v11 }
 0x17e   : > { %3190 = vmatprep.subr.mxu1 %v747_v12 }
 0x17f   : > { %3191 = vmatpush3.msra.mxu1 %v747_v12  ;;  %v3184_v31 = vpop.f32.mrf.mxu0 }
 0x180   : > { %3192 = vmatprep.subr.mxu1 %v3178_v9 }
 0x181   : > { %3193 = vmatpush3.msra.mxu1 %v3178_v9  ;;  %v757_v32 = vpop.f32.mrf.mxu0 }
 0x182   : > { %3194 = vmatprep.subr.mxu1 %v737_v10 }
 0x183   : > { %3195 = vmatpush3.msra.mxu1 %v737_v10  ;;  %v3187_v34 = vpop.f32.mrf.mxu0 }
 0x184   : > { %3197 = vmatmul.mubr.msk.f32.vlgmr.msra.gmra.mxu1 %vm646_vm0, %v4278_v13 }
 0x185   : > { %3199 = vmatprep.mubr.msk.f32.mxu1 %vm646_vm0, %v4280_v14  ;;  %v767_v37 = vpop.f32.mrf.mxu0 }
 0x188   : > { %3200 = vmatmul.mubr.msk.f32.gmra.mxu1 %vm646_vm0, %v4286_v15 }
 0x189   : > { %3206 = vmatprep.mubr.msk.f32.mxu1 %vm877_vm1, %v4290_v16 }
 0x244   : > { %v3198_v18 = vpop.f32.mrf.mxu1 }
 0x245   : > { %874 = vst.msk [vmem:[%s4297_s16 + $0x8] sm:$0xff] %vm646_vm0, %v3198_v18  ;;  %3202 = vmatprep.subr.mxu1 %v3198_v18 }
 0x246   : > { %v854_v19 = vpop.f32.mrf.mxu1  ;;  %3203 = vmatpush3.msra.mxu1 %v3198_v18 }
 0x247   : > { %873 = vst.msk [vmem:[%s4297_s16] sm:$0xff] %vm646_vm0, %v854_v19  ;;  %3204 = vmatprep.subr.mxu1 %v854_v19 }
 0x248   : > { %3205 = vmatpush3.msra.mxu1 %v854_v19  ;;  %v3201_v21 = vpop.f32.mrf.mxu1 }
 0x249   : > { %3207 = vmatmul.mubr.msk.f32.vlgmr.msra.gmra.mxu1 %vm877_vm1, %v4301_v20  ;;  %876 = vst.msk [vmem:[%s4297_s16 + $0x18] sm:$0xff] %vm646_vm0, %v3201_v21  ;;  %3209 = vmatprep.subr.mxu1 %v4311_v23 }
 0x24a   : > { %v864_v22 = vpop.f32.mrf.mxu1  ;;  %3210 = vmatpush3.msra.mxu1 %v4311_v23 }
 0x24b   : > { %875 = vst.msk [vmem:[%s4297_s16 + $0x10] sm:$0xff] %vm646_vm0, %v864_v22  ;;  %3211 = vmatprep.subr.mxu1 %v4317_v25 }
 0x24c   : > { %3212 = vmatpush3.msra.mxu1 %v4317_v25 }
 0x24d   : > { %3221 = vmatprep.subr.mxu1 %v3912_v30 }
 0x309   : > { %v3208_v28 = vpop.f32.mrf.mxu1 }
 0x30b   : > { %v950_v29 = vpop.f32.mrf.mxu1 }
 0x30c   : > { %3213 = vmatprep.mubr.msk.f32.mxu1 %vm877_vm1, %v950_v29 }
 0x30d   : > { %3214 = vmatmul.mubr.msk.f32.vlgmr.msra.gmra.mxu1 %vm877_vm1, %v3208_v28 }
 0x30e   : > { %3223 = vmatprep.mubr.msk.f32.mxu1 %vm3913_vm2, %v3912_v30  ;;  %3222 = vmatpush3.msra.mxu1 %v4360_v38 }
 0x3cd   : > { %v3215_v33 = vpop.f32.mrf.mxu1 }
 0x3ce   : > { %1041 = vst.msk [vmem:[%s4336_s22 + $0x8] sm:$0xff] %vm877_vm1, %v3215_v33 }
 0x3cf   : > { %v1031_v36 = vpop.f32.mrf.mxu1 }
 0x3d0   : > { %1040 = vst.msk [vmem:[%s4336_s22] sm:$0xff] %vm877_vm1, %v1031_v36  ;;  %3217 = vmatpush3.msra.mxu0 %v1031_v36 }
 0x3d1   : > { %3219 = vmatmul.mubr.msk.f32.vlgmr.msra.gmra.mxu0 %vm1042_vm3, %v4343_v35  ;;  %3226 = vmatprep.subr.mxu0 %v3187_v34 }
 0x3d2   : > { %3227 = vmatpush3.msra.mxu0 %v3187_v34  ;;  %3234 = vmatprep.mubr.msk.f32.mxu0 %vm646_vm0, %v4274_v8 }
 0x3d3   : > { %3228 = vmatprep.subr.mxu0 %v767_v37 }
 0x3d4   : > { %3229 = vmatpush3.msra.mxu0 %v767_v37 }
 0x3d5   : > { %3230 = vmatprep.subr.mxu0 %v3184_v31 }
 0x3d6   : > { %3231 = vmatpush3.msra.mxu0 %v3184_v31 }
 0x3d7   : > { %3232 = vmatprep.subr.mxu0 %v757_v32 }
 0x3d8   : > { %3233 = vmatpush3.msra.mxu0 %v757_v32 }
 0x3d9   : > { %3235 = vmatmul.mubr.msk.f32.vlgmr.msra.gmra.mxu0 %vm646_vm0, %v4278_v13  ;;  %3259 = vmatprep.subr.mxu0 %v3912_v30 }
 0x3da   : > { %3237 = vmatprep.mubr.msk.f32.mxu0 %vm646_vm0, %v4280_v14  ;;  %3260 = vmatpush3.msra.mxu0 %v4360_v38 }
 0x3dd   : > { %3238 = vmatmul.mubr.msk.f32.gmra.mxu0 %vm646_vm0, %v4286_v15 }
 0x3de   : > { %3261 = vmatprep.mubr.msk.f32.mxu0 %vm3913_vm2, %v3912_v30 }
 0x491   : > { %v1112_v39 = vpop.f32.mrf.mxu0 }
 0x492   : > { %3224 = vmatmul.mubr.msk.f32.vlgmr.msra.gmra.mxu1 %vm1042_vm3, %v1112_v39 }
 0x493   : > { %v3220_v40 = vpop.f32.mrf.mxu0  ;;  %3244 = vmatprep.mubr.msk.f32.mxu1 %vm877_vm1, %v4290_v16 }
 0x499   : > { %v3236_v41 = vpop.f32.mrf.mxu0 }
 0x49a   : > { %2979 = vst.msk [vmem:[%s4297_s16 + $0x28] sm:$0xff] %vm646_vm0, %v3236_v41  ;;  %3240 = vmatprep.subr.mxu1 %v3236_v41 }
 0x49b   : > { %v1256_v42 = vpop.f32.mrf.mxu0  ;;  %3241 = vmatpush3.msra.mxu1 %v3236_v41 }
 0x49c   : > { %2978 = vst.msk [vmem:[%s4297_s16 + $0x20] sm:$0xff] %vm646_vm0, %v1256_v42  ;;  %3242 = vmatprep.subr.mxu1 %v1256_v42 }
 0x49d   : > { %3243 = vmatpush3.msra.mxu1 %v1256_v42  ;;  %v3239_v53 = vpop.f32.mrf.mxu0 }
 0x49e   : > { %3245 = vmatmul.mubr.msk.f32.vlgmr.msra.gmra.mxu1 %vm877_vm1, %v4301_v20  ;;  %3247 = vmatprep.subr.mxu1 %v4311_v23  ;;  %2981 = vst.msk [vmem:[%s4297_s16 + $0x38] sm:$0xff] %vm646_vm0, %v3239_v53 }
 0x49f   : > { %3248 = vmatpush3.msra.mxu1 %v4311_v23  ;;  %v1266_v54 = vpop.f32.mrf.mxu0 }
 0x4a0   : > { %3249 = vmatprep.subr.mxu1 %v4317_v25  ;;  %2980 = vst.msk [vmem:[%s4297_s16 + $0x30] sm:$0xff] %vm646_vm0, %v1266_v54 }
 0x4a1   : > { %3250 = vmatpush3.msra.mxu1 %v4317_v25 }
 0x4a2   : > { %3254 = vmatprep.subr.mxu1 %v3912_v30 }
 0x552   : > { %v1185_v43 = vpop.f32.mrf.mxu1 }
 0x553   : > { %1189 = vst.msk [vmem:[%s4381_s7] sm:$0xff] %vm1042_vm3, %v1185_v43 }
 0x554   : > { %v3225_v44 = vpop.f32.mrf.mxu1 }
 0x55e   : > { %v3246_v45 = vpop.f32.mrf.mxu1 }
 0x560   : > { %v1346_v46 = vpop.f32.mrf.mxu1 }
 0x561   : > { %3251 = vmatprep.mubr.msk.f32.mxu1 %vm877_vm1, %v1346_v46 }
 0x562   : > { %3252 = vmatmul.mubr.msk.f32.vlgmr.msra.gmra.mxu1 %vm877_vm1, %v3246_v45 }
 0x563   : > { %3256 = vmatprep.mubr.msk.f32.mxu1 %vm3913_vm2, %v3912_v30 }
 0x622   : > { %v3253_v47 = vpop.f32.mrf.mxu1 }
 0x623   : > { %2987 = vst.msk [vmem:[%s4336_s22 + $0x18] sm:$0xff] %vm877_vm1, %v3253_v47 }
 0x624   : > { %v1427_v48 = vpop.f32.mrf.mxu1 }
 0x625   : > { %2986 = vst.msk [vmem:[%s4336_s22 + $0x10] sm:$0xff] %vm877_vm1, %v1427_v48  ;;  %3255 = vmatpush3.msra.mxu1 %v1427_v48  ;;  %s2512_s22 = scalar_lea.sflag [#allocation16], %s4228_s15 }
 0x626   : > { %3257 = vmatmul.mubr.msk.f32.vlgmr.msra.gmra.mxu1 %vm1042_vm3, %v4343_v35  ;;  %3264 = vmatprep.subr.mxu1 %v4250_v0 }
 0x627   : > { %3265 = vmatpush3.msra.mxu1 %v4250_v0  ;;  %3272 = vmatprep.mubr.msk.f32.mxu1 %vm646_vm0, %v1584_v49 }
 0x628   : > { %3266 = vmatprep.subr.mxu1 %v4252_v1 }
 0x629   : > { %3267 = vmatpush3.msra.mxu1 %v4252_v1 }
 0x62a   : > { %3268 = vmatprep.subr.mxu1 %v4257_v3 }
 0x62b   : > { %3269 = vmatpush3.msra.mxu1 %v4257_v3  ;;  %v1588_v3 = vld [vmem:[%s4232_s25 + $0x20] sm:$0xff] }
 0x62c   : > { %3270 = vmatprep.subr.mxu1 %v4262_v4 }
 0x62d   : > { %3271 = vmatpush3.msra.mxu1 %v4262_v4  ;;  %v1589_v4 = vld [vmem:[%s4232_s25 + $0x28] sm:$0xff] }
 0x62e   : > { %3273 = vmatmul.mubr.msk.f32.vlgmr.msra.gmra.mxu1 %vm646_vm0, %v1585_v50  ;;  %3312 = vmatprep.subr.mxu1 %v3912_v30 }
 0x62f   : > { %3275 = vmatprep.mubr.msk.f32.mxu1 %vm646_vm0, %v1586_v51 }
 0x632   : > { %3276 = vmatmul.mubr.msk.f32.gmra.mxu1 %vm646_vm0, %v1587_v52 }
 0x633   : > { %3278 = vmatprep.mubr.msk.f32.mxu1 %vm646_vm0, %v1588_v3 }
 0x636   : > { %3279 = vmatmul.mubr.msk.f32.gmra.mxu1 %vm646_vm0, %v1589_v4 }
 0x637   : > { %3281 = vmatprep.mubr.msk.f32.mxu1 %vm646_vm0, %v1590_v5 }
 0x63a   : > { %3282 = vmatmul.mubr.msk.f32.gmra.mxu1 %vm646_vm0, %v1591_v6 }
 0x63b   : > { %3314 = vmatprep.mubr.msk.f32.mxu1 %vm3913_vm2, %v3912_v30 }
 0x6e6   : > { %v1505_v55 = vpop.f32.mrf.mxu1 }
 0x6e7   : > { %3262 = vmatmul.mubr.msk.f32.vlgmr.msra.gmra.mxu0 %vm1042_vm3, %v1505_v55 }
 0x6e8   : > { %v3258_v56 = vpop.f32.mrf.mxu1  ;;  %3292 = vmatprep.mubr.msk.f32.mxu0 %vm646_vm0, %v4274_v8 }
 0x6ee   : > { %v3274_v57 = vpop.f32.mrf.mxu1 }
 0x6f0   : > { %v1682_v58 = vpop.f32.mrf.mxu1 }
 0x6f2   : > { %v3277_v59 = vpop.f32.mrf.mxu1 }
 0x6f3   : > { %3284 = vmatprep.subr.mxu0 %v3277_v59 }
 0x6f4   : > { %v1692_v60 = vpop.f32.mrf.mxu1  ;;  %3285 = vmatpush3.msra.mxu0 %v3277_v59 }
 0x6f5   : > { %3286 = vmatprep.subr.mxu0 %v1692_v60 }
 0x6f6   : > { %3287 = vmatpush3.msra.mxu0 %v1692_v60  ;;  %v3280_v10 = vpop.f32.mrf.mxu1 }
 0x6f7   : > { %3288 = vmatprep.subr.mxu0 %v3274_v57 }
 0x6f8   : > { %3289 = vmatpush3.msra.mxu0 %v3274_v57  ;;  %v1702_v11 = vpop.f32.mrf.mxu1 }
 0x6f9   : > { %3290 = vmatprep.subr.mxu0 %v1682_v58 }
 0x6fa   : > { %3291 = vmatpush3.msra.mxu0 %v1682_v58  ;;  %v3283_v17 = vpop.f32.mrf.mxu1 }
 0x6fb   : > { %3293 = vmatmul.mubr.msk.f32.vlgmr.msra.gmra.mxu0 %vm646_vm0, %v4278_v13 }
 0x6fc   : > { %3295 = vmatprep.mubr.msk.f32.mxu0 %vm646_vm0, %v4280_v14  ;;  %v1712_v19 = vpop.f32.mrf.mxu1 }
 0x6ff   : > { %3296 = vmatmul.mubr.msk.f32.gmra.mxu0 %vm646_vm0, %v4286_v15 }
 0x700   : > { %3302 = vmatprep.mubr.msk.f32.mxu0 %vm877_vm1, %v4290_v16 }
 0x7a7   : > { %v1578_v61 = vpop.f32.mrf.mxu0 }
 0x7a8   : > { %2990 = vst.msk [vmem:[%s4381_s7 + $0x8] sm:$0xff] %vm1042_vm3, %v1578_v61  ;;  %s3685_s7 = scalar_lea.vmem %s3684_s5, 1024 }
 0x7a9   : > { %v3263_v62 = vpop.f32.mrf.mxu0  ;;  %p3687_p4 = scmp.lt.s32.totalorder %s3685_s7, %s3679_s30 }
 0x7ab   : > { %p3688_p6 = por %p3687_p4, %p3686_p1 }
 0x7ad   : > { %p3689_p8 = pnand %p3688_p6, %p3682_p11 }
 0x7bb   : > { %v3294_v63 = vpop.f32.mrf.mxu0 }
 0x7bc   : > { %1807 = vst.msk [vmem:[%s4430_s27 + $0x8] sm:$0xff] %vm646_vm0, %v3294_v63  ;;  %3298 = vmatprep.subr.mxu0 %v3294_v63 }
 0x7bd   : > { %v1787_v0 = vpop.f32.mrf.mxu0  ;;  %3299 = vmatpush3.msra.mxu0 %v3294_v63 }
 0x7be   : > { %1806 = vst.msk [vmem:[%s4430_s27] sm:$0xff] %vm646_vm0, %v1787_v0  ;;  %3300 = vmatprep.subr.mxu0 %v1787_v0 }
 0x7bf   : > { %3301 = vmatpush3.msra.mxu0 %v1787_v0  ;;  %v3297_v1 = vpop.f32.mrf.mxu0 }
 0x7c0   : > { %3303 = vmatmul.mubr.msk.f32.vlgmr.msra.gmra.mxu0 %vm877_vm1, %v4301_v20  ;;  %1809 = vst.msk [vmem:[%s4430_s27 + $0x18] sm:$0xff] %vm646_vm0, %v3297_v1  ;;  %3305 = vmatprep.subr.mxu0 %v4311_v23 }
 0x7c1   : > { %v1797_v2 = vpop.f32.mrf.mxu0  ;;  %3306 = vmatpush3.msra.mxu0 %v4311_v23 }
 0x7c2   : > { %1808 = vst.msk [vmem:[%s4430_s27 + $0x10] sm:$0xff] %vm646_vm0, %v1797_v2  ;;  %3307 = vmatprep.subr.mxu0 %v4317_v25 }
 0x7c3   : > { %3308 = vmatpush3.msra.mxu0 %v4317_v25 }
 0x7c4   : > { %3317 = vmatprep.subr.mxu0 %v3912_v30 }
 0x880   : > { %v3304_v7 = vpop.f32.mrf.mxu0 }
 0x882   : > { %v1876_v9 = vpop.f32.mrf.mxu0 }
 0x883   : > { %3309 = vmatprep.mubr.msk.f32.mxu0 %vm877_vm1, %v1876_v9 }
 0x884   : > { %3310 = vmatmul.mubr.msk.f32.vlgmr.msra.gmra.mxu0 %vm877_vm1, %v3304_v7 }
 0x885   : > { %3318 = vmatpush3.msra.mxu0 %v4360_v38  ;;  %3319 = vmatprep.mubr.msk.f32.mxu0 %vm3913_vm2, %v3912_v30 }
 0x944   : > { %v3311_v12 = vpop.f32.mrf.mxu0 }
 0x945   : > { %1967 = vst.msk [vmem:[%s4464_s19 + $0x8] sm:$0xff] %vm877_vm1, %v3311_v12 }
 0x946   : > { %v1957_v18 = vpop.f32.mrf.mxu0 }
 0x947   : > { %1966 = vst.msk [vmem:[%s4464_s19] sm:$0xff] %vm877_vm1, %v1957_v18  ;;  %3313 = vmatpush3.msra.mxu1 %v1957_v18 }
 0x948   : > { %3322 = vmatprep.subr.mxu1 %v3283_v17  ;;  %3315 = vmatmul.mubr.msk.f32.vlgmr.msra.gmra.mxu1 %vm1042_vm3, %v4343_v35 }
 0x949   : > { %3323 = vmatpush3.msra.mxu1 %v3283_v17  ;;  %3330 = vmatprep.mubr.msk.f32.mxu1 %vm646_vm0, %v4274_v8 }
 0x94a   : > { %3324 = vmatprep.subr.mxu1 %v1712_v19 }
 0x94b   : > { %3325 = vmatpush3.msra.mxu1 %v1712_v19 }
 0x94c   : > { %3326 = vmatprep.subr.mxu1 %v3280_v10 }
 0x94d   : > { %3327 = vmatpush3.msra.mxu1 %v3280_v10 }
 0x94e   : > { %3328 = vmatprep.subr.mxu1 %v1702_v11 }
 0x94f   : > { %3329 = vmatpush3.msra.mxu1 %v1702_v11 }
 0x950   : > { %3331 = vmatmul.mubr.msk.f32.vlgmr.msra.gmra.mxu1 %vm646_vm0, %v4278_v13  ;;  %3355 = vmatprep.subr.mxu1 %v3912_v30 }
 0x951   : > { %3356 = vmatpush3.msra.mxu1 %v4360_v38  ;;  %3333 = vmatprep.mubr.msk.f32.mxu1 %vm646_vm0, %v4280_v14 }
 0x954   : > { %3334 = vmatmul.mubr.msk.f32.gmra.mxu1 %vm646_vm0, %v4286_v15 }
 0x955   : > { %3357 = vmatprep.mubr.msk.f32.mxu1 %vm3913_vm2, %v3912_v30 }
 0xa08   : > { %v2034_v8 = vpop.f32.mrf.mxu1 }
 0xa09   : > { %3320 = vmatmul.mubr.msk.f32.vlgmr.msra.gmra.mxu0 %vm1042_vm3, %v2034_v8 }
 0xa0a   : > { %v3316_v21 = vpop.f32.mrf.mxu1  ;;  %3340 = vmatprep.mubr.msk.f32.mxu0 %vm877_vm1, %v4290_v16 }
 0xa10   : > { %v3332_v13 = vpop.f32.mrf.mxu1 }
 0xa11   : > { %3014 = vst.msk [vmem:[%s4430_s27 + $0x28] sm:$0xff] %vm646_vm0, %v3332_v13  ;;  %3336 = vmatprep.subr.mxu0 %v3332_v13 }
 0xa12   : > { %v2178_v22 = vpop.f32.mrf.mxu1  ;;  %3337 = vmatpush3.msra.mxu0 %v3332_v13 }
 0xa13   : > { %3013 = vst.msk [vmem:[%s4430_s27 + $0x20] sm:$0xff] %vm646_vm0, %v2178_v22  ;;  %3338 = vmatprep.subr.mxu0 %v2178_v22 }
 0xa14   : > { %3339 = vmatpush3.msra.mxu0 %v2178_v22 }
 0xa15   : > { %3341 = vmatmul.mubr.msk.f32.vlgmr.msra.gmra.mxu0 %vm877_vm1, %v4301_v20  ;;  %3343 = vmatprep.subr.mxu0 %v4311_v23 }
 0xa16   : > { %3344 = vmatpush3.msra.mxu0 %v4311_v23 }
 0xa17   : > { %3345 = vmatprep.subr.mxu0 %v4317_v25 }
 0xa18   : > { %3346 = vmatpush3.msra.mxu0 %v4317_v25  ;;  %v3335_v25 = vpop.f32.mrf.mxu1 }
 0xa19   : > { %3350 = vmatprep.subr.mxu0 %v3912_v30  ;;  %3016 = vst.msk [vmem:[%s4430_s27 + $0x38] sm:$0xff] %vm646_vm0, %v3335_v25 }
 0xa1a   : > { %v2188_v26 = vpop.f32.mrf.mxu1 }
 0xa1b   : > { %3015 = vst.msk [vmem:[%s4430_s27 + $0x30] sm:$0xff] %vm646_vm0, %v2188_v26 }
 0xac9   : > { %v2107_v14 = vpop.f32.mrf.mxu0 }
 0xaca   : > { %2111 = vst.msk [vmem:[%s4500_s24] sm:$0xff] %vm1042_vm3, %v2107_v14 }
 0xacb   : > { %v3321_v15 = vpop.f32.mrf.mxu0 }
 0xad5   : > { %v3342_v16 = vpop.f32.mrf.mxu0 }
 0xad7   : > { %v2268_v20 = vpop.f32.mrf.mxu0 }
 0xad8   : > { %3347 = vmatprep.mubr.msk.f32.mxu0 %vm877_vm1, %v2268_v20 }
 0xad9   : > { %3348 = vmatmul.mubr.msk.f32.vlgmr.msra.gmra.mxu0 %vm877_vm1, %v3342_v16 }
 0xada   : > { %3352 = vmatprep.mubr.msk.f32.mxu0 %vm3913_vm2, %v3912_v30 }
 0xb99   : > { %v3349_v23 = vpop.f32.mrf.mxu0 }
 0xb9a   : > { %3022 = vst.msk [vmem:[%s4464_s19 + $0x18] sm:$0xff] %vm877_vm1, %v3349_v23 }
 0xb9b   : > { %v2349_v24 = vpop.f32.mrf.mxu0 }
 0xb9c   : > { %3021 = vst.msk [vmem:[%s4464_s19 + $0x10] sm:$0xff] %vm877_vm1, %v2349_v24  ;;  %3351 = vmatpush3.msra.mxu0 %v2349_v24 }
 0xb9d   : > { %3353 = vmatmul.mubr.msk.f32.vlgmr.msra.gmra.mxu0 %vm1042_vm3, %v4343_v35 }
 0xc5d   : > { %v2427_v27 = vpop.f32.mrf.mxu0 }
 0xc5e   : > { %3358 = vmatmul.mubr.msk.f32.vlgmr.msra.gmra.mxu1 %vm1042_vm3, %v2427_v27 }
 0xc5f   : > { %v3354_v28 = vpop.f32.mrf.mxu0 }
 0xc60   : > { %3692 = shalt.err (!%p3689_p8)
}
 0xc61   : > { %s3693_s27 = scalar_lea.hbm %s4541_s21, 512  ;;  %s3697_s16 = scalar_lea.hbm %s4815_s9, 1024 }
 0xc62   : > { %p3694_p3 = scmp.ne.s32.totalorder %s4541_s21, %s3693_s27  ;;  %p3698_p2 = scmp.lt.s32.totalorder %s4541_s21, %s4815_s9 }
 0xc63   : > { %p3699_p10 = scmp.lt.s32.totalorder %s3697_s16, %s3693_s27 }
 0xc64   : > { %p3695_p7 = pnand %p3694_p3, %p4816_p5 }
 0xc65   : > { %p3700_p0 = por %p3699_p10, %p3698_p2 }
 0xc66   : > { %p3696_p12 = pneg %p3695_p7 }
 0xc68   : > { %p3701_p13 = pnand %p3700_p0, %p3696_p12 }
 0xc6a   : > { %3704 = shalt.err (!%p3701_p13)
}
 0xc6b   : > { %s3915_s30 = smov 128   ;;  %s3916_s5 = smov 8  }
 0xc6c   : > { %3385 = dma.vmem_to_hbm [thread:$0]  (%p4816_p5), %s4526_s29, 512, %s4541_s21, %s2512_s22, %s3915_s30, %s3915_s30, %s3916_s5  }
 0xc6d   : > { %s4574_s27 = scalar_lea.hbm %s4760_s12, %s3057_s4  ;;  %s4817_s19 = sshll.u32 %s4013_s14, 10 }
 0xc6e   : > { %s4581_s3 = scalar_lea.hbm %s4759_s11, %s4817_s19  ;;  %s2522_s1 = scalar_lea.sflag [#allocation19], %s4228_s15 }
 0xc6f   : > { %s3705_s6 = scalar_lea.vmem %s4530_s13, 1024  ;;  %s3917_s9 = smov [#allocation18]  }
 0xc70   : > { %p3706_p9 = scmp.ne.s32.totalorder %s4530_s13, %s3705_s6  ;;  %s3709_s29 = sshll.u32 %s3917_s9, 4  ;;  %s3710_s29 = int_to_ptr.vmem [resolvable:$false] %s3709_s29 }
 0xc71   : > { %s3711_s21 = scalar_lea.vmem %s3710_s29, 2048  ;;  %p3712_p4 = scmp.lt.s32.totalorder %s4530_s13, %s3710_s29 }
 0xc72   : > { %p3707_p11 = pnand %p3706_p9, %p4816_p5  ;;  %p3713_p6 = scmp.lt.s32.totalorder %s3711_s21, %s3705_s6 }
 0xc74   : > { %p3708_p1 = pneg %p3707_p11  ;;  %p3714_p8 = por %p3713_p6, %p3712_p4 }
 0xc76   : > { %p3715_p3 = pnand %p3714_p8, %p3708_p1 }
 0xc78   : > { %3718 = shalt.err (!%p3715_p3)
}
 0xc79   : > { %s3719_s4 = scalar_lea.hbm %s4581_s3, 1024  ;;  %s3723_s9 = scalar_lea.hbm %s4759_s11, 2048 }
 0xc7a   : > { %p3720_p7 = scmp.ne.s32.totalorder %s4581_s3, %s3719_s4  ;;  %p3724_p10 = scmp.lt.s32.totalorder %s4581_s3, %s4759_s11 }
 0xc7b   : > { %p3725_p0 = scmp.lt.s32.totalorder %s3723_s9, %s3719_s4 }
 0xc7c   : > { %p3721_p12 = pnand %p3720_p7, %p4816_p5 }
 0xc7d   : > { %p3726_p13 = por %p3725_p0, %p3724_p10 }
 0xc7e   : > { %p3722_p2 = pneg %p3721_p12 }
 0xc80   : > { %p3727_p9 = pnand %p3726_p13, %p3722_p2 }
 0xc82   : > { %3730 = shalt.err (!%p3727_p9)
}
 0xc83   : > { %3387 = dma.vmem_to_hbm [thread:$0]  (%p4816_p5), %s4530_s13, 1024, %s4581_s3, %s2522_s1, %s3915_s30, %s3915_s30, %s3916_s5  }
 0xc84   : > { %s4818_s6 = sshll.u32 %s4013_s14, 10  ;;  %s3058_s4 = sshll.u32 %s4013_s14, 8 }
 0xc85   : > { %s4614_s21 = scalar_lea.hbm %s4756_s8, %s4818_s6  ;;  %s2507_s20 = scalar_lea.sflag [#allocation4], %s4214_s0 }
 0xc86   : > { %s3731_s7 = scalar_lea.vmem %s4524_s18, 1024  ;;  %s3918_s9 = smov [#allocation14]  }
 0xc87   : > { %p3732_p11 = scmp.ne.s32.totalorder %s4524_s18, %s3731_s7  ;;  %s3735_s19 = sshll.u32 %s3918_s9, 4  ;;  %s3736_s19 = int_to_ptr.vmem [resolvable:$false] %s3735_s19 }
 0xc88   : > { %s3737_s25 = scalar_lea.vmem %s3736_s19, 2048  ;;  %p3738_p6 = scmp.lt.s32.totalorder %s4524_s18, %s3736_s19 }
 0xc89   : > { %p3733_p1 = pnand %p3732_p11, %p4816_p5  ;;  %p3739_p8 = scmp.lt.s32.totalorder %s3737_s25, %s3731_s7 }
 0xc8b   : > { %p3734_p4 = pneg %p3733_p1  ;;  %p3740_p3 = por %p3739_p8, %p3738_p6 }
 0xc8d   : > { %p3741_p7 = pnand %p3740_p3, %p3734_p4 }
 0xc8f   : > { %3744 = shalt.err (!%p3741_p7)
}
 0xc90   : > { %s3745_s13 = scalar_lea.hbm %s4614_s21, 1024  ;;  %s3749_s16 = scalar_lea.hbm %s4756_s8, 2048 }
 0xc91   : > { %p3746_p12 = scmp.ne.s32.totalorder %s4614_s21, %s3745_s13  ;;  %p3750_p0 = scmp.lt.s32.totalorder %s4614_s21, %s4756_s8 }
 0xc92   : > { %p3751_p13 = scmp.lt.s32.totalorder %s3749_s16, %s3745_s13 }
 0xc93   : > { %p3747_p2 = pnand %p3746_p12, %p4816_p5 }
 0xc94   : > { %p3752_p9 = por %p3751_p13, %p3750_p0 }
 0xc95   : > { %p3748_p10 = pneg %p3747_p2 }
 0xc97   : > { %p3753_p11 = pnand %p3752_p9, %p3748_p10 }
 0xc99   : > { %3756 = shalt.err (!%p3753_p11)
}
 0xc9a   : > { %3384 = dma.vmem_to_hbm [thread:$0]  (%p4816_p5), %s4524_s18, 1024, %s4614_s21, %s2507_s20, %s3915_s30, %s3915_s30, %s3916_s5  }
 0xc9b   : > { %s2578_s25 = scalar_lea.hbm %s4758_s10, %s3058_s4  ;;  %s3757_s13 = scalar_lea.vmem %s4528_s23, 256 }
 0xc9c   : > { %p3758_p1 = scmp.ne.s32.totalorder %s4528_s23, %s3757_s13  ;;  %s3919_s3 = smov [#allocation17]  }
 0xc9d   : > { %s3761_s6 = sshll.u32 %s3919_s3, 4  ;;  %s3762_s6 = int_to_ptr.vmem [resolvable:$false] %s3761_s6 }
 0xc9e   : > { %p3759_p4 = pnand %p3758_p1, %p4816_p5  ;;  %s3763_s16 = scalar_lea.vmem %s3762_s6, 512 }
 0xc9f   : > { %p3764_p8 = scmp.lt.s32.totalorder %s4528_s23, %s3762_s6  ;;  %p3765_p3 = scmp.lt.s32.totalorder %s3763_s16, %s3757_s13 }
 0xca0   : > { %p3760_p6 = pneg %p3759_p4 }
 0xca1   : > { %p3766_p7 = por %p3765_p3, %p3764_p8 }
 0xca3   : > { %p3767_p12 = pnand %p3766_p7, %p3760_p6 }
 0xca5   : > { %3770 = shalt.err (!%p3767_p12)
}
 0xca6   : > { %s3771_s18 = scalar_lea.hbm %s2578_s25, 256  ;;  %s3775_s29 = scalar_lea.hbm %s4758_s10, 512 }
 0xca7   : > { %p3772_p2 = scmp.ne.s32.totalorder %s2578_s25, %s3771_s18  ;;  %p3776_p13 = scmp.lt.s32.totalorder %s2578_s25, %s4758_s10 }
 0xca8   : > { %p3777_p9 = scmp.lt.s32.totalorder %s3775_s29, %s3771_s18 }
 0xca9   : > { %p3773_p10 = pnand %p3772_p2, %p4816_p5 }
 0xcaa   : > { %p3778_p11 = por %p3777_p9, %p3776_p13 }
 0xcab   : > { %p3774_p0 = pneg %p3773_p10 }
 0xcad   : > { %p3779_p1 = pnand %p3778_p11, %p3774_p0 }
 0xcaf   : > { %3782 = shalt.err (!%p3779_p1)
}
 0xcb0   : > { %3386 = dma.vmem_to_hbm [thread:$0]  (%p4816_p5), %s4528_s23, 256, %s2578_s25, %s2512_s22, %s3915_s30, %s3915_s30, %s3916_s5  }
 0xcb1   : > { %s3783_s19 = scalar_lea.vmem %s4532_s17, 512  ;;  %s3920_s13 = smov [#allocation20]  }
 0xcb2   : > { %p3784_p4 = scmp.ne.s32.totalorder %s4532_s17, %s3783_s19  ;;  %s3787_s3 = sshll.u32 %s3920_s13, 4  ;;  %s3788_s3 = int_to_ptr.vmem [resolvable:$false] %s3787_s3 }
 0xcb3   : > { %s3789_s6 = scalar_lea.vmem %s3788_s3, 1024  ;;  %p3790_p3 = scmp.lt.s32.totalorder %s4532_s17, %s3788_s3 }
 0xcb4   : > { %p3785_p6 = pnand %p3784_p4, %p4816_p5  ;;  %p3791_p7 = scmp.lt.s32.totalorder %s3789_s6, %s3783_s19 }
 0xcb6   : > { %p3786_p8 = pneg %p3785_p6  ;;  %p3792_p12 = por %p3791_p7, %p3790_p3 }
 0xcb8   : > { %p3793_p2 = pnand %p3792_p12, %p3786_p8 }
 0xcba   : > { %3796 = shalt.err (!%p3793_p2)
}
 0xcbb   : > { %s3797_s16 = scalar_lea.hbm %s4574_s27, 512  ;;  %s3801_s25 = scalar_lea.hbm %s4760_s12, 1024 }
 0xcbc   : > { %p3798_p10 = scmp.ne.s32.totalorder %s4574_s27, %s3797_s16  ;;  %p3802_p9 = scmp.lt.s32.totalorder %s4574_s27, %s4760_s12 }
 0xcbd   : > { %p3803_p11 = scmp.lt.s32.totalorder %s3801_s25, %s3797_s16 }
 0xcbe   : > { %p3799_p0 = pnand %p3798_p10, %p4816_p5 }
 0xcbf   : > { %p3804_p1 = por %p3803_p11, %p3802_p9 }
 0xcc0   : > { %p3800_p13 = pneg %p3799_p0 }
 0xcc2   : > { %p3805_p4 = pnand %p3804_p1, %p3800_p13 }
 0xcc4   : > { %3808 = shalt.err (!%p3805_p4)
}
 0xcc5   : > { %3388 = dma.vmem_to_hbm [thread:$0]  (%p4816_p5), %s4532_s17, 512, %s4574_s27, %s2522_s1, %s3915_s30, %s3915_s30, %s3916_s5  }
 0xcc6   : > { %s2629_s20 = sshll.u32 %s4500_s24, 4  ;;  %s4819_s7 = sld [smem:[#allocation46_spill]]  ;;  %s4693_s20 = int_to_ptr.vmem [resolvable:$true] %s2629_s20 }
 0xcc7   : > { %s2532_s15 = scalar_lea.sflag [#allocation22], %s4214_s0  ;;  %s3809_s13 = scalar_lea.vmem %s4693_s20, 256 }
 0xcc8   : > { %p3810_p6 = scmp.ne.s32.totalorder %s4693_s20, %s3809_s13  ;;  %s3921_s1 = smov [#allocation21]  }
 0xcc9   : > { %s3813_s14 = sshll.u32 %s3921_s1, 4  ;;  %s3814_s14 = int_to_ptr.vmem [resolvable:$false] %s3813_s14 }
 0xcca   : > { %p3811_p8 = pnand %p3810_p6, %p4816_p5  ;;  %s3815_s17 = scalar_lea.vmem %s3814_s14, 512 }
 0xccb   : > { %p3816_p7 = scmp.lt.s32.totalorder %s4693_s20, %s3814_s14  ;;  %p3817_p12 = scmp.lt.s32.totalorder %s3815_s17, %s3809_s13 }
 0xccc   : > { %s4700_s19 = scalar_lea.hbm %s4819_s7, %s3058_s4  ;;  %p3812_p3 = pneg %p3811_p8 }
 0xccd   : > { %p3818_p2 = por %p3817_p12, %p3816_p7 }
 0xccf   : > { %p3819_p10 = pnand %p3818_p2, %p3812_p3 }
 0xd1e   : > { %v2500_v29 = vpop.f32.mrf.mxu1 }
 0xd1f   : > { %3025 = vst.msk [vmem:[%s4500_s24 + $0x8] sm:$0xff] %vm1042_vm3, %v2500_v29 }
 0xd20   : > { %v3359_v30 = vpop.f32.mrf.mxu1 }
 0xd21   : > { %3822 = shalt.err (!%p3819_p10)
}
 0xd22   : > { %s3823_s24 = scalar_lea.hbm %s4700_s19, 256  ;;  %s3827_s4 = scalar_lea.hbm %s4819_s7, 512 }
 0xd23   : > { %p3824_p0 = scmp.ne.s32.totalorder %s4700_s19, %s3823_s24  ;;  %p3828_p11 = scmp.lt.s32.totalorder %s4700_s19, %s4819_s7 }
 0xd24   : > { %p3829_p1 = scmp.lt.s32.totalorder %s3827_s4, %s3823_s24 }
 0xd25   : > { %p3825_p13 = pnand %p3824_p0, %p4816_p5 }
 0xd26   : > { %p3830_p4 = por %p3829_p1, %p3828_p11 }
 0xd27   : > { %p3826_p9 = pneg %p3825_p13 }
 0xd29   : > { %p3831_p6 = pnand %p3830_p4, %p3826_p9 }
 0xd2b   : > { %3834 = shalt.err (!%p3831_p6)
}
 0xd2c   : > { %3389 = dma.vmem_to_hbm [thread:$0]  (%p4816_p5), %s4693_s20, 256, %s4700_s19, %s2532_s15, %s3915_s30, %s3915_s30, %s3916_s5  }
 0xd2d PF: > { %s4820_s16 = sld [smem:[#allocation32_spill]]  ;;  %p4823_p3 = scmp.ge.s32.totalorder %s3901_s28, 2 }
 0xd2e   : > { %s4821_s23 = sld [smem:[#allocation36_spill]] }
 0xd33   : > { %s2644_s22 = sand.u32 1, %s4820_s16  }
 0xd34   : > { %p4822_p8 = scmp.ne.s32.totalorder %s4821_s23, 0  ;;  %s2645_s25 = scalar_lea.sflag [#allocation4], %s2644_s22 }
 0xd36   : > { %p3420_p7 = pnand %p4823_p3, %p4822_p8 }
 0xd38   : > { %p3421_p12 = pneg %p3420_p7 }
 0xd3a   : > { %3872 = dma.done.wait (%p3421_p12), %s2645_s25, 1024  }
 0xd3b   : > { %3874 = vsyncadd (%p3421_p12), %s2645_s25, 4294966272  ;;  %s4824_s2 = sadd.s32 4294967294, %s3901_s28  }
 0xd3c   : > { %s2653_s18 = sand.u32 1, %s4824_s2  }
 0xd3d   : > { %s2654_s21 = scalar_lea.sflag [#allocation16], %s2653_s18 }
 0xd3e   : > { %3876 = dma.done.wait (%p3421_p12), %s2654_s21, 768  }
 0xd3f   : > { %3878 = vsyncadd (%p3421_p12), %s2654_s21, 4294966528  ;;  %s2672_s29 = scalar_lea.sflag [#allocation19], %s2653_s18 }
 0xd40   : > { %3880 = dma.done.wait (%p3421_p12), %s2672_s29, 1536  }
 0xd41   : > { %3882 = vsyncadd (%p3421_p12), %s2672_s29, 4294965760  ;;  %s2690_s30 = scalar_lea.sflag [#allocation22], %s2644_s22 }
 0xd42   : > { %3884 = dma.done.wait (%p3421_p12), %s2690_s30, 256  }
 0xd43   : > { %3886 = vsyncadd (%p3421_p12), %s2690_s30, 4294967040  ;;  %s4825_s28 = sld [smem:[#allocation34_spill]]  ;;  %s4828_s25 = smov %s3893_s26 }
 0xd44   : > { %s4826_s5 = sld [smem:[#allocation33_spill]] }
 0xd45   : > { %s4827_s27 = sld [smem:[#allocation35_spill]] }
 0xd49   : > { %p41_p5 = scmp.ge.s32.totalorder %s4825_s28, 4  }
 0xd4a   : > { %s4829_s26 = smov %s4826_s5 }
 0xd4b   :  { %43 = sbr.rel (!%p41_p5) target bundleno = 26 (0x1a), region = 217 }
 0xd50   :  { %2695 = vsyncpa [#allocation3], 1 }
 0xd51   :  { %2697 = vsyncpa [#allocation3 + $0x1], 1 }
 0xd52   :  { %2698 = vsyncpa [#allocation6], 1 }
 0xd53   :  { %2700 = vsyncpa [#allocation6 + $0x1], 1 }
 0xd54   :  { %2701 = vsyncpa [#allocation9], 1 }
 0xd55   :  { %2702 = vsyncpa [#allocation12], 1 }
 0xd56   :  { %2703 = vsyncpa [#allocation4], 1 }
 0xd57   :  { %2705 = vsyncpa [#allocation4 + $0x1], 1 }
 0xd58   :  { %2706 = vsyncpa [#allocation16], 1 }
 0xd59   :  { %2708 = vsyncpa [#allocation16 + $0x1], 1 }
 0xd5a   :  { %2709 = vsyncpa [#allocation19], 1 }
 0xd5b   :  { %2711 = vsyncpa [#allocation19 + $0x1], 1 }
 0xd5c   :  { %2712 = vsyncpa [#allocation22], 1 }
 0xd5d   :  { %2714 = vsyncpa [#allocation22 + $0x1], 1 }

// kernel: tpu_custom_call.1
= control target key start
LH: loop header
LB: loop body
LE: loop exit
PB: predicated region body
PF: predicated region fallthrough
CT: control target
= control target key end

     0   :  { %s4748_s0 = inlined_call_operand.hbm [shape: f32[4,32,32], index: 0, kind: input, shape index: {}]   ;;  %s4749_s1 = inlined_call_operand.hbm [shape: f32[4,32,32], index: 1, kind: input, shape index: {}]   ;;  %s4750_s2 = inlined_call_operand.hbm [shape: f32[32,32], index: 2, kind: input, shape index: {}]   ;;  %s4751_s3 = inlined_call_operand.hbm [shape: f32[32,32], index: 3, kind: input, shape index: {}]   ;;  %s4752_s4 = inlined_call_operand.hbm [shape: f32[16,16], index: 4, kind: input, shape index: {}]   ;;  %s4753_s5 = inlined_call_operand.hbm [shape: f32[16,16], index: 5, kind: input, shape index: {}]   ;;  %s4754_s6 = inlined_call_operand.vmem [shape: f32[8,8], index: 6, kind: input, shape index: {}]   ;;  %s4755_s7 = inlined_call_operand.hbm [shape: f32[8,8], index: 7, kind: input, shape index: {}]   ;;  %s4756_s8 = inlined_call_operand.hbm [shape: f32[4,32,32], index: 8, kind: output, shape index: {0}]   ;;  %s4757_s9 = inlined_call_operand.hbm [shape: f32[4,16,16], index: 9, kind: output, shape index: {1}]   ;;  %s4758_s10 = inlined_call_operand.hbm [shape: f32[4,8,8], index: 10, kind: output, shape index: {2}]   ;;  %s4759_s11 = inlined_call_operand.hbm [shape: f32[4,32,32], index: 11, kind: output, shape index: {3}]   ;;  %s4760_s12 = inlined_call_operand.hbm [shape: f32[4,16,16], index: 12, kind: output, shape index: {4}]   ;;  %s4761_s13 = inlined_call_operand.hbm [shape: f32[4,8,8], index: 13, kind: output, shape index: {5}]  }
   0x1   :  { %4776 = sst [smem:[#allocation37_spill]] %s4748_s0 }
   0x2   :  { %4777 = sst [smem:[#allocation38_spill]] %s4749_s1 }
   0x3   :  { %4778 = sst [smem:[#allocation39_spill]] %s4750_s2 }
   0x4   :  { %4779 = sst [smem:[#allocation40_spill]] %s4751_s3 }
   0x5   :  { %4780 = sst [smem:[#allocation41_spill]] %s4752_s4 }
   0x6   :  { %4781 = sst [smem:[#allocation42_spill]] %s4753_s5 }
   0x7   :  { %4782 = sst [smem:[#allocation43_spill]] %s4754_s6 }
   0x8   :  { %4783 = sst [smem:[#allocation44_spill]] %s4755_s7 }
   0x9   :  { %4784 = sst [smem:[#allocation45_spill]] %s4757_s9 }
   0xa   :  { %4785 = sst [smem:[#allocation46_spill]] %s4761_s13 }
   0xb   :  { %19 = vsyncpa [#allocation3], 0 }
   0xc   :  { %21 = vsyncpa [#allocation3 + $0x1], 0 }
   0xd   :  { %22 = vsyncpa [#allocation6], 0 }
   0xe   :  { %24 = vsyncpa [#allocation6 + $0x1], 0 }
   0xf   :  { %25 = vsyncpa [#allocation9], 0 }
  0x10   :  { %26 = vsyncpa [#allocation12], 0 }
  0x11   :  { %27 = vsyncpa [#allocation4], 0 }
  0x12   :  { %29 = vsyncpa [#allocation4 + $0x1], 0 }
  0x13   :  { %30 = vsyncpa [#allocation16], 0 }
  0x14   :  { %32 = vsyncpa [#allocation16 + $0x1], 0 }
  0x15   :  { %33 = vsyncpa [#allocation19], 0 }
  0x16   :  { %35 = vsyncpa [#allocation19 + $0x1], 0 }
  0x17   :  { %36 = vsyncpa [#allocation22], 0 }
  0x18   :  { %38 = vsyncpa [#allocation22 + $0x1], 0  ;;  %s3992_s25 = smov 0   ;;  %s3994_s26 = smov 0  }
  0x19   :  { %s3996_s27 = smov 0   ;;  %s3998_s28 = smov 0  }
  0x1a LB: > { %4786 = sst [smem:[#allocation32_spill]] %s3889_s25  ;;  %s3903_s29 = smov [#allocation7]   ;;  %s3901_s28 = sphi %s3998_s28, %s4825_s28   ;;  %s3897_s27 = sphi %s3996_s27, %s4827_s27   ;;  %s3893_s26 = sphi %s3994_s26, %s4829_s26   ;;  %s3889_s25 = sphi %s3992_s25, %s4828_s25  }
  0x1b   : > { %4787 = sst [smem:[#allocation33_spill]] %s3897_s27  ;;  %s395_s30 = sshll.u32 %s3903_s29, 4  ;;  %s396_s30 = int_to_ptr.vmem [resolvable:$true] %s395_s30 }
  0x1c   : > { %s4013_s14 = sadd.s32 4294967295, %s3901_s28   ;;  %p2927_p0 = scmp.ge.s32.totalorder %s3901_s28, 1 }
  0x1d   : > { %p4772_p1 = scmp.eq.s32.totalorder %s4013_s14, 0  ;;  %p383_p2 = scmp.lt.s32.totalorder %s3901_s28, 3 }
  0x1e   : > { %s3904_s16 = smov [#allocation8]   ;;  %s3905_s19 = smov [#allocation11]  }
  0x1f   : > { %p4018_p3 = pnand %p2927_p0, %p383_p2  ;;  %s408_s17 = sshll.u32 %s3904_s16, 4  ;;  %s4031_s17 = int_to_ptr.vmem [resolvable:$true] %s408_s17 }
  0x20   : > { %s434_s20 = sshll.u32 %s3905_s19, 4  ;;  %s3504_s22 = scalar_lea.vmem %s396_s30, 512  ;;  %s4033_s20 = int_to_ptr.vmem [resolvable:$true] %s434_s20 }
  0x21   : > { %p3396_p5 = pneg %p4018_p3  ;;  %p3505_p8 = scmp.ne.s32.totalorder %s396_s30, %s3504_s22 }
  0x22   : > { %p3512_p11 = scmp.lt.s32.totalorder %s396_s30, %s396_s30  ;;  %p3513_p12 = scmp.lt.s32.totalorder %s3504_s22, %s3504_s22 }
  0x23   : > { %p4027_p6 = pnand %p3396_p5, %p4772_p1 }
  0x24   : > { %p3514_p13 = por %p3513_p12, %p3512_p11 }
  0x25   : > { %p4037_p7 = pneg %p4027_p6 }
  0x27   : > { %p3507_p9 = pnand %p3505_p8, %p4037_p7 }
  0x29   : > { %p3508_p10 = pneg %p3507_p9 }
  0x2b   : > { %p3515_p0 = pnand %p3514_p13, %p3508_p10 }
  0x2d   : > { %3518 = shalt.err (!%p3515_p0)
}
  0x2e   : > { %s4762_s23 = smov 128   ;;  %s4764_s24 = smov 8  }
  0x2f   : > { %s4791_s2 = sld [smem:[#allocation39_spill]]  ;;  %s3530_s19 = scalar_lea.vmem %s4031_s17, 512 }
  0x30   : > { %p3531_p2 = scmp.ne.s32.totalorder %s4031_s17, %s3530_s19  ;;  %p3538_p9 = scmp.lt.s32.totalorder %s4031_s17, %s4031_s17 }
  0x31   : > { %p3539_p10 = scmp.lt.s32.totalorder %s3530_s19, %s3530_s19 }
  0x32   : > { %p3533_p5 = pnand %p3531_p2, %p4037_p7 }
  0x33   : > { %p3540_p11 = por %p3539_p10, %p3538_p9 }
  0x34   : > { %p3534_p8 = pneg %p3533_p5 }
  0x35   : > { %3399 = dma.hbm_to_vmem [thread:$0]  (!%p4027_p6), %s4791_s2, 512, %s396_s30, [#allocation6], %s4762_s23, %s4762_s23, %s4764_s24  }
  0x36   : > { %p3541_p12 = pnand %p3540_p11, %p3534_p8 }
  0x38   : > { %3544 = shalt.err (!%p3541_p12)
}
  0x39   : > { %s4792_s3 = sld [smem:[#allocation40_spill]]  ;;  %s3556_s30 = scalar_lea.vmem %s4033_s20, 256 }
  0x3a   : > { %p3557_p13 = scmp.ne.s32.totalorder %s4033_s20, %s3556_s30  ;;  %p3564_p5 = scmp.lt.s32.totalorder %s4033_s20, %s4033_s20 }
  0x3b   : > { %p3565_p8 = scmp.lt.s32.totalorder %s3556_s30, %s3556_s30 }
  0x3c   : > { %p3559_p0 = pnand %p3557_p13, %p4037_p7 }
  0x3d   : > { %p3566_p9 = por %p3565_p8, %p3564_p5 }
  0x3e   : > { %p3560_p2 = pneg %p3559_p0 }
  0x3f   : > { %3402 = dma.hbm_to_vmem [thread:$0]  (!%p4027_p6), %s4792_s3, 512, %s4031_s17, [#allocation9], %s4762_s23, %s4762_s23, %s4764_s24  }
  0x40   : > { %p3567_p10 = pnand %p3566_p9, %p3560_p2 }
  0x42   : > { %3570 = shalt.err (!%p3567_p10)
}
  0x43   : > { %s4793_s5 = sld [smem:[#allocation42_spill]]  ;;  %s3908_s17 = smov [#allocation10]  }
  0x44   : > { %s421_s22 = sshll.u32 %s3908_s17, 4  ;;  %s3909_s29 = smov [#allocation13]   ;;  %s422_s22 = int_to_ptr.vmem [resolvable:$true] %s421_s22 }
  0x45   : > { %s451_s2 = sshll.u32 %s3909_s29, 4  ;;  %s3582_s30 = scalar_lea.vmem %s422_s22, 256  ;;  %s452_s2 = int_to_ptr.vmem [resolvable:$true] %s451_s2 }
  0x46   : > { %p3583_p11 = scmp.ne.s32.totalorder %s422_s22, %s3582_s30  ;;  %p3590_p0 = scmp.lt.s32.totalorder %s422_s22, %s422_s22 }
  0x47   : > { %p3591_p2 = scmp.lt.s32.totalorder %s3582_s30, %s3582_s30 }
  0x48   : > { %p3585_p12 = pnand %p3583_p11, %p4037_p7 }
  0x49   : > { %3408 = dma.hbm_to_vmem [thread:$0]  (!%p4027_p6), %s4793_s5, 256, %s4033_s20, [#allocation12], %s4762_s23, %s4762_s23, %s4764_s24  }
  0x4a   : > { %p3586_p13 = pneg %p3585_p12  ;;  %p3592_p5 = por %p3591_p2, %p3590_p0 }
  0x4c   : > { %p3593_p8 = pnand %p3592_p5, %p3586_p13 }
  0x4e   : > { %3596 = shalt.err (!%p3593_p8)
}
  0x4f   : > { %s4794_s4 = sld [smem:[#allocation41_spill]]  ;;  %s3608_s19 = scalar_lea.vmem %s452_s2, 128 }
  0x50   : > { %p3609_p9 = scmp.ne.s32.totalorder %s452_s2, %s3608_s19  ;;  %p3616_p12 = scmp.lt.s32.totalorder %s452_s2, %s452_s2 }
  0x51   : > { %p3617_p0 = scmp.lt.s32.totalorder %s3608_s19, %s3608_s19 }
  0x52   : > { %p3611_p10 = pnand %p3609_p9, %p4037_p7 }
  0x53   : > { %p3618_p13 = por %p3617_p0, %p3616_p12 }
  0x54   : > { %p3612_p11 = pneg %p3611_p10 }
  0x55   : > { %3405 = dma.hbm_to_vmem [thread:$0]  (!%p4027_p6), %s4794_s4, 256, %s422_s22, [#allocation9], %s4762_s23, %s4762_s23, %s4764_s24  }
  0x56   : > { %p3619_p2 = pnand %p3618_p13, %p3612_p11 }
  0x58   : > { %3622 = shalt.err (!%p3619_p2)
}
  0x59   : > { %s4795_s7 = sld [smem:[#allocation44_spill]]  ;;  %s4766_s18 = sadd.s32 4294967294, %s3901_s28  }
  0x5a   : > { %s4100_s21 = sadd.s32 1, %s3901_s28   ;;  %s51_s22 = sadd.s32 1, %s3897_s27 }
  0x5b   : > { %4796 = sst [smem:[#allocation34_spill]] %s4100_s21  ;;  %s48_s30 = ssub.s32 %s3901_s28, %s4100_s21 }
  0x5c   : > { %p58_p7 = scmp.ne.s32.totalorder %s3897_s27, %s3893_s26  ;;  %p49_p5 = scmp.eq.s32.totalorder %s48_s30, 0 }
  0x5d   : > { %p59_p8 = scmp.eq.s32.totalorder %s3901_s28, 0  ;;  %p64_p9 = scmp.ne.s32.totalorder %s3893_s26, %s3889_s25 }
  0x5e   : > { %p240_p10 = scmp.eq.s32.totalorder %s4013_s14, 1  ;;  %p246_p0 = scmp.eq.s32.totalorder %s4766_s18, 1 }
  0x5f   : > { %3411 = dma.hbm_to_vmem [thread:$0]  (!%p4027_p6), %s4795_s7, 128, %s452_s2, [#allocation12]  }
  0x60   : > { %s4112_s20 = scalar_select %p49_p5, %s3897_s27, %s51_s22  }
  0x61   : > { %p60_p11 = por %p59_p8, %p58_p7  ;;  %p4116_p12 = por %p4772_p1, %p64_p9 }
  0x62   : > { %4797 = sst [smem:[#allocation35_spill]] %s4112_s20  ;;  %p4120_p6 = por %p240_p10, %p58_p7 }
  0x63   : > { %s4798_s16 = scalar_select %p4116_p12, 1, 0 }
  0x64   : > { %s4799_s2 = scalar_select %p4120_p6, 1, 0 }
  0x65   : > { %p3443_p13 = scmp.lt.s32.totalorder %s3901_s28, 2  ;;  %s462_s19 = sand.u32 1, %s3897_s27  }
  0x66   : > { %p4128_p2 = por %p246_p0, %p64_p9  ;;  %s4132_s29 = sshll.u32 %s462_s19, 6 }
  0x67   : > { %s3051_s22 = sshll.u32 %s3901_s28, 10  ;;  %s4802_s0 = sld [smem:[#allocation37_spill]] }
  0x68   : > { %s4800_s17 = scalar_select %p4128_p2, 1, 0 }
  0x69   : > { %s466_s3 = scalar_lea.vmem [#allocation2], %s4132_s29  ;;  %p4141_p7 = pnand %p3443_p13, %p60_p11 }
  0x6a   : > { %4801 = sst [smem:[#allocation36_spill]] %s4800_s17  ;;  %s474_s18 = sshll.u32 %s466_s3, 4  ;;  %s4145_s18 = int_to_ptr.vmem [resolvable:$true] %s474_s18 }
  0x6b   : > { %s4804_s1 = sld [smem:[#allocation38_spill]]  ;;  %s4152_s23 = scalar_lea.sflag [#allocation3], %s462_s19 }
  0x6c   : > { %p3625_p8 = pneg %p4141_p7 }
  0x6d   : > { %s4138_s24 = scalar_lea.hbm %s4802_s0, %s3051_s22  ;;  %s3628_s21 = scalar_lea.hbm %s4802_s0, 2048 }
  0x6e   : > { %s3623_s30 = scalar_lea.hbm %s4138_s24, 1024  ;;  %p3629_p11 = scmp.lt.s32.totalorder %s4138_s24, %s4802_s0 }
  0x6f   : > { %p3624_p5 = scmp.ne.s32.totalorder %s4138_s24, %s3623_s30  ;;  %p3630_p0 = scmp.lt.s32.totalorder %s3628_s21, %s3623_s30 }
  0x71   : > { %s4150_s20 = scalar_lea.hbm %s4804_s1, %s3051_s22  ;;  %p3626_p9 = pnand %p3625_p8, %p3624_p5 }
  0x72   : > { %p3631_p13 = por %p3630_p0, %p3629_p11 }
  0x73   : > { %p3627_p10 = pneg %p3626_p9 }
  0x75   : > { %p3632_p4 = pnand %p3631_p13, %p3627_p10 }
  0x77   : > { %3635 = shalt.err (!%p3632_p4)
}
  0x78   : > { %s3636_s5 = scalar_lea.vmem %s4145_s18, 1024  ;;  %s3910_s7 = smov [#allocation2]  }
  0x79   : > { %p3637_p1 = scmp.ne.s32.totalorder %s4145_s18, %s3636_s5  ;;  %s3641_s27 = sshll.u32 %s3910_s7, 4  ;;  %s3642_s27 = int_to_ptr.vmem [resolvable:$false] %s3641_s27 }
  0x7a   : > { %s3643_s19 = scalar_lea.vmem %s3642_s27, 2048  ;;  %p3644_p2 = scmp.lt.s32.totalorder %s4145_s18, %s3642_s27 }
  0x7b   : > { %p3639_p5 = pnand %p3637_p1, %p3625_p8  ;;  %p3645_p6 = scmp.lt.s32.totalorder %s3643_s19, %s3636_s5 }
  0x7d   : > { %p3640_p9 = pneg %p3639_p5  ;;  %p3646_p12 = por %p3645_p6, %p3644_p2 }
  0x7f   : > { %p3647_p11 = pnand %p3646_p12, %p3640_p9 }
  0x81   : > { %3650 = shalt.err (!%p3647_p11)
}
  0x82   : > { %s4805_s25 = smov 8   ;;  %s4806_s21 = smov 128  }
  0x83   : > { %3415 = dma.hbm_to_vmem [thread:$0]  (!%p4141_p7), %s4138_s24, 1024, %s4145_s18, %s4152_s23, %s4806_s21, %s4806_s21, %s4805_s25  }
  0x84   : > { %s488_s17 = scalar_lea.vmem [#allocation5], %s4132_s29  ;;  %s484_s30 = sand.u32 1, %s3901_s28  }
  0x85   : > { %s496_s22 = sshll.u32 %s488_s17, 4  ;;  %s485_s3 = scalar_lea.sflag [#allocation6], %s484_s30  ;;  %s4184_s22 = int_to_ptr.vmem [resolvable:$true] %s496_s22 }
  0x86   : > { %s3651_s5 = scalar_lea.hbm %s4150_s20, 1024  ;;  %s3656_s19 = scalar_lea.hbm %s4804_s1, 2048 }
  0x87   : > { %p3652_p1 = scmp.ne.s32.totalorder %s4150_s20, %s3651_s5  ;;  %p3657_p6 = scmp.lt.s32.totalorder %s4150_s20, %s4804_s1 }
  0x88   : > { %p3658_p2 = scmp.lt.s32.totalorder %s3656_s19, %s3651_s5 }
  0x89   : > { %p3654_p4 = pnand %p3652_p1, %p3625_p8 }
  0x8a   : > { %p3659_p10 = por %p3658_p2, %p3657_p6 }
  0x8b   : > { %p3655_p12 = pneg %p3654_p4 }
  0x8d   : > { %p3660_p0 = pnand %p3659_p10, %p3655_p12 }
  0x8f   : > { %3663 = shalt.err (!%p3660_p0)
}
  0x90   : > { %s3664_s24 = scalar_lea.vmem %s4184_s22, 1024  ;;  %s3911_s18 = smov [#allocation5]  }
  0x91   : > { %p3665_p13 = scmp.ne.s32.totalorder %s4184_s22, %s3664_s24  ;;  %s3669_s29 = sshll.u32 %s3911_s18, 4  ;;  %s3670_s29 = int_to_ptr.vmem [resolvable:$false] %s3669_s29 }
  0x92   : > { %s3671_s23 = scalar_lea.vmem %s3670_s29, 2048  ;;  %p3672_p11 = scmp.lt.s32.totalorder %s4184_s22, %s3670_s29 }
  0x93   : > { %p3667_p5 = pnand %p3665_p13, %p3625_p8  ;;  %p3673_p1 = scmp.lt.s32.totalorder %s3671_s23, %s3664_s24 }
  0x95   : > { %p3668_p9 = pneg %p3667_p5  ;;  %p3674_p4 = por %p3673_p1, %p3672_p11 }
  0x97   : > { %p3675_p6 = pnand %p3674_p4, %p3668_p9 }
  0x99   : > { %3678 = shalt.err (!%p3675_p6)
}
  0x9a   : > { %3418 = dma.hbm_to_vmem [thread:$0]  (!%p4141_p7), %s4150_s20, 1024, %s4184_s22, %s485_s3, %s4806_s21, %s4806_s21, %s4805_s25  }
  0x9b   : > { %508 = sbr.rel (%p4018_p3) target bundleno = 3373 (0xd2d), region = 52  ;;  %s4214_s0 = sand.u32 (!%p4018_p3), 1, %s3893_s26  }
  0x9c   : > { %s4217_s13 = sshll.u32 (!%p4018_p3), %s4214_s0, 6  ;;  %s511_s17 = scalar_lea.sflag (!%p4018_p3), [#allocation3], %s4214_s0 }
  0x9d   : > { %s4221_s4 = scalar_lea.vmem (!%p4018_p3), [#allocation2], %s4217_s13  ;;  %p4807_p8 = scmp.ne.s32.totalorder (!%p4018_p3), %s4798_s16, 0 }
  0xa0   : > { %3852 = dma.done.wait (%p4807_p8), %s511_s17, 1024  }
  0xa1   : > { %3854 = vsyncadd (%p4807_p8), %s511_s17, 4294966272  ;;  %s4228_s15 = sand.u32 1, %s4013_s14   ;;  %s4232_s25 = scalar_lea.vmem [#allocation5], %s4217_s13 }
  0xa2   : > { %s520_s20 = scalar_lea.sflag [#allocation6], %s4228_s15 }
  0xa3   : > { %3856 = dma.done.wait (%p4807_p8), %s520_s20, 1024  }
  0xa4   : > { %3858 = vsyncadd (%p4807_p8), %s520_s20, 4294966272  ;;  %p4808_p3 = scmp.eq.s32.totalorder %s4013_s14, 0 }
  0xa6   : > { %3860 = dma.done.wait (%p4808_p3), [#allocation6], 512   ;;  %p4809_p7 = pmov %p4808_p3 }
  0xa7   : > { %p4810_p12 = pmov %p4808_p3 }
  0xa8   : > { %3862 = vsyncadd (%p4809_p7), [#allocation6], 4294966784 }
  0xa9   : > { %3864 = dma.done.wait (%p4810_p12), [#allocation9], 768   ;;  %p4811_p2 = pmov %p4808_p3 }
  0xab   : > { %3866 = vsyncadd (%p4811_p2), [#allocation9], 4294966528  ;;  %p4812_p10 = pmov %p4811_p2 }
  0xac   : > { %p4813_p0 = pmov %p4811_p2 }
  0xad   : > { %3868 = dma.done.wait (%p4812_p10), [#allocation12], 384  }
  0xae   : > { %3870 = vsyncadd (%p4813_p0), [#allocation12], 4294966912  ;;  %vm646_vm0 = vcmask 261120   ;;  %v4250_v0 = vld [vmem:[#allocation8 + $0x18] sm:$0xff]  ;;  %v4252_v1 = vld [vmem:[#allocation8 + $0x10] sm:$0xff]  ;;  %vm877_vm1 = vcmask 130048  }
  0xaf   : > { %3168 = vmatprep.subr.mxu0 %v4250_v0  ;;  %v638_v2 = vld [vmem:[%s4221_s4] sm:$0xff]  ;;  %v4257_v3 = vld [vmem:[#allocation8 + $0x8] sm:$0xff]  ;;  %v640_v6 = vld [vmem:[%s4221_s4 + $0x10] sm:$0xff]  ;;  %s4297_s16 = scalar_lea.vmem [#allocation14], %s4217_s13  ;;  %v3912_v30 = vmov 0.0   ;;  %vm3913_vm2 = vmmov 0  }
  0xb0   : > { %3169 = vmatpush3.msra.mxu0 %v4250_v0  ;;  %3176 = vmatprep.mubr.msk.f32.mxu0 %vm646_vm0, %v638_v2  ;;  %v4262_v4 = vld [vmem:[#allocation8] sm:$0xff]  ;;  %v639_v5 = vld [vmem:[%s4221_s4 + $0x8] sm:$0xff]  ;;  %v641_v7 = vld [vmem:[%s4221_s4 + $0x18] sm:$0xff]  ;;  %s2951_s21 = sshll.u32 %s4214_s0, 5  ;;  %s4814_s6 = sld [smem:[#allocation43_spill]]  ;;  %vm1042_vm3 = vcmask 64512  }
  0xb1   : > { %3170 = vmatprep.subr.mxu0 %v4252_v1  ;;  %v4274_v8 = vld [vmem:[#allocation7] sm:$0xff]  ;;  %v4278_v13 = vld [vmem:[#allocation7 + $0x8] sm:$0xff]  ;;  %v4280_v14 = vld [vmem:[#allocation7 + $0x10] sm:$0xff]  ;;  %s4336_s22 = scalar_lea.vmem [#allocation15], %s2951_s21  ;;  %s2952_s5 = sshll.u32 %s4214_s0, 4 }
  0xb2   : > { %3171 = vmatpush3.msra.mxu0 %v4252_v1  ;;  %3196 = vmatprep.mubr.msk.f32.mxu1 %vm646_vm0, %v4274_v8  ;;  %v4286_v15 = vld [vmem:[#allocation7 + $0x18] sm:$0xff]  ;;  %v4290_v16 = vld [vmem:[#allocation10] sm:$0xff]  ;;  %v4301_v20 = vld [vmem:[#allocation10 + $0x8] sm:$0xff]  ;;  %s4381_s7 = scalar_lea.vmem [#allocation17], %s2952_s5  ;;  %s4430_s27 = scalar_lea.vmem [#allocation18], %s4217_s13 }
  0xb3   : > { %3172 = vmatprep.subr.mxu0 %v4257_v3  ;;  %v642_v17 = vld [vmem:[%s4221_s4 + $0x20] sm:$0xff]  ;;  %v4311_v23 = vld [vmem:[#allocation11 + $0x8] sm:$0xff]  ;;  %v643_v24 = vld [vmem:[%s4221_s4 + $0x28] sm:$0xff]  ;;  %s4464_s19 = scalar_lea.vmem [#allocation20], %s2951_s21  ;;  %s4500_s24 = scalar_lea.vmem [#allocation21], %s2952_s5 }
  0xb4   : > { %3173 = vmatpush3.msra.mxu0 %v4257_v3  ;;  %v4317_v25 = vld [vmem:[#allocation11] sm:$0xff]  ;;  %v645_v27 = vld [vmem:[%s4221_s4 + $0x38] sm:$0xff]  ;;  %v4360_v38 = vld [vmem:[#allocation13] sm:$0xff]  ;;  %s2546_s18 = sshll.u32 %s4297_s16, 4  ;;  %s2563_s29 = sshll.u32 %s4336_s22, 4  ;;  %s4524_s18 = int_to_ptr.vmem [resolvable:$true] %s2546_s18  ;;  %s4526_s29 = int_to_ptr.vmem [resolvable:$true] %s2563_s29 }
  0xb5   : > { %3174 = vmatprep.subr.mxu0 %v4262_v4  ;;  %v644_v26 = vld [vmem:[%s4221_s4 + $0x30] sm:$0xff]  ;;  %v1584_v49 = vld [vmem:[%s4232_s25] sm:$0xff]  ;;  %v1585_v50 = vld [vmem:[%s4232_s25 + $0x8] sm:$0xff]  ;;  %s2579_s23 = sshll.u32 %s4381_s7, 4  ;;  %s2596_s13 = sshll.u32 %s4430_s27, 4  ;;  %s4528_s23 = int_to_ptr.vmem [resolvable:$true] %s2579_s23  ;;  %s4530_s13 = int_to_ptr.vmem [resolvable:$true] %s2596_s13 }
  0xb6   : > { %3175 = vmatpush3.msra.mxu0 %v4262_v4  ;;  %v4343_v35 = vld [vmem:[%s4814_s6] sm:$0xff]  ;;  %v1586_v51 = vld [vmem:[%s4232_s25 + $0x10] sm:$0xff]  ;;  %v1587_v52 = vld [vmem:[%s4232_s25 + $0x18] sm:$0xff]  ;;  %s2613_s17 = sshll.u32 %s4464_s19, 4  ;;  %s3057_s4 = sshll.u32 %s4013_s14, 9  ;;  %s4532_s17 = int_to_ptr.vmem [resolvable:$true] %s2613_s17 }
  0xb7   : > { %3177 = vmatmul.mubr.msk.f32.vlgmr.msra.gmra.mxu0 %vm646_vm0, %v639_v5  ;;  %3216 = vmatprep.subr.mxu0 %v3912_v30  ;;  %v1590_v5 = vld [vmem:[%s4232_s25 + $0x30] sm:$0xff]  ;;  %s4815_s9 = sld [smem:[#allocation45_spill]]  ;;  %s3679_s30 = scalar_lea.vmem %s4526_s29, 512 }
  0xb8   : > { %3179 = vmatprep.mubr.msk.f32.mxu0 %vm646_vm0, %v640_v6  ;;  %v1591_v6 = vld [vmem:[%s4232_s25 + $0x38] sm:$0xff]  ;;  %p3680_p13 = scmp.ne.s32.totalorder %s4526_s29, %s3679_s30  ;;  %p4816_p5 = scmp.ne.s32.totalorder %s4799_s2, 0 }
  0xb9   : > { %s3914_s3 = smov [#allocation15]  }
  0xba   : > { %p3681_p9 = pnand %p3680_p13, %p4816_p5  ;;  %s3683_s5 = sshll.u32 %s3914_s3, 4  ;;  %s3684_s5 = int_to_ptr.vmem [resolvable:$false] %s3683_s5 }
  0xbb   : > { %3180 = vmatmul.mubr.msk.f32.gmra.mxu0 %vm646_vm0, %v641_v7  ;;  %p3686_p1 = scmp.lt.s32.totalorder %s4526_s29, %s3684_s5 }
  0xbc   : > { %3182 = vmatprep.mubr.msk.f32.mxu0 %vm646_vm0, %v642_v17  ;;  %p3682_p11 = pneg %p3681_p9 }
  0xbd   : > { %s4541_s21 = scalar_lea.hbm %s4815_s9, %s3057_s4 }
  0xbf   : > { %3183 = vmatmul.mubr.msk.f32.gmra.mxu0 %vm646_vm0, %v643_v24 }
  0xc0   : > { %3185 = vmatprep.mubr.msk.f32.mxu0 %vm646_vm0, %v644_v26 }
  0xc3   : > { %3186 = vmatmul.mubr.msk.f32.gmra.mxu0 %vm646_vm0, %v645_v27 }
  0xc4   : > { %3218 = vmatprep.mubr.msk.f32.mxu0 %vm3913_vm2, %v3912_v30 }
 0x177   : > { %v3178_v9 = vpop.f32.mrf.mxu0 }
 0x179   : > { %v737_v10 = vpop.f32.mrf.mxu0 }
 0x17b   : > { %v3181_v11 = vpop.f32.mrf.mxu0 }
 0x17c   : > { %3188 = vmatprep.subr.mxu1 %v3181_v11 }
 0x17d   : > { %v747_v12 = vpop.f32.mrf.mxu0  ;;  %3189 = vmatpush3.msra.mxu1 %v3181_v11 }
 0x17e   : > { %3190 = vmatprep.subr.mxu1 %v747_v12 }
 0x17f   : > { %3191 = vmatpush3.msra.mxu1 %v747_v12  ;;  %v3184_v31 = vpop.f32.mrf.mxu0 }
 0x180   : > { %3192 = vmatprep.subr.mxu1 %v3178_v9 }
 0x181   : > { %3193 = vmatpush3.msra.mxu1 %v3178_v9  ;;  %v757_v32 = vpop.f32.mrf.mxu0 }
 0x182   : > { %3194 = vmatprep.subr.mxu1 %v737_v10 }
 0x183   : > { %3195 = vmatpush3.msra.mxu1 %v737_v10  ;;  %v3187_v34 = vpop.f32.mrf.mxu0 }
 0x184   : > { %3197 = vmatmul.mubr.msk.f32.vlgmr.msra.gmra.mxu1 %vm646_vm0, %v4278_v13 }
 0x185   : > { %3199 = vmatprep.mubr.msk.f32.mxu1 %vm646_vm0, %v4280_v14  ;;  %v767_v37 = vpop.f32.mrf.mxu0 }
 0x188   : > { %3200 = vmatmul.mubr.msk.f32.gmra.mxu1 %vm646_vm0, %v4286_v15 }
 0x189   : > { %3206 = vmatprep.mubr.msk.f32.mxu1 %vm877_vm1, %v4290_v16 }
 0x244   : > { %v3198_v18 = vpop.f32.mrf.mxu1 }
 0x245   : > { %874 = vst.msk [vmem:[%s4297_s16 + $0x8] sm:$0xff] %vm646_vm0, %v3198_v18  ;;  %3202 = vmatprep.subr.mxu1 %v3198_v18 }
 0x246   : > { %v854_v19 = vpop.f32.mrf.mxu1  ;;  %3203 = vmatpush3.msra.mxu1 %v3198_v18 }
 0x247   : > { %873 = vst.msk [vmem:[%s4297_s16] sm:$0xff] %vm646_vm0, %v854_v19  ;;  %3204 = vmatprep.subr.mxu1 %v854_v19 }
 0x248   : > { %3205 = vmatpush3.msra.mxu1 %v854_v19  ;;  %v3201_v21 = vpop.f32.mrf.mxu1 }
 0x249   : > { %3207 = vmatmul.mubr.msk.f32.vlgmr.msra.gmra.mxu1 %vm877_vm1, %v4301_v20  ;;  %876 = vst.msk [vmem:[%s4297_s16 + $0x18] sm:$0xff] %vm646_vm0, %v3201_v21  ;;  %3209 = vmatprep.subr.mxu1 %v4311_v23 }
 0x24a   : > { %v864_v22 = vpop.f32.mrf.mxu1  ;;  %3210 = vmatpush3.msra.mxu1 %v4311_v23 }
 0x24b   : > { %875 = vst.msk [vmem:[%s4297_s16 + $0x10] sm:$0xff] %vm646_vm0, %v864_v22  ;;  %3211 = vmatprep.subr.mxu1 %v4317_v25 }
 0x24c   : > { %3212 = vmatpush3.msra.mxu1 %v4317_v25 }
 0x24d   : > { %3221 = vmatprep.subr.mxu1 %v3912_v30 }
 0x309   : > { %v3208_v28 = vpop.f32.mrf.mxu1 }
 0x30b   : > { %v950_v29 = vpop.f32.mrf.mxu1 }
 0x30c   : > { %3213 = vmatprep.mubr.msk.f32.mxu1 %vm877_vm1, %v950_v29 }
 0x30d   : > { %3214 = vmatmul.mubr.msk.f32.vlgmr.msra.gmra.mxu1 %vm877_vm1, %v3208_v28 }
 0x30e   : > { %3223 = vmatprep.mubr.msk.f32.mxu1 %vm3913_vm2, %v3912_v30  ;;  %3222 = vmatpush3.msra.mxu1 %v4360_v38 }
 0x3cd   : > { %v3215_v33 = vpop.f32.mrf.mxu1 }
 0x3ce   : > { %1041 = vst.msk [vmem:[%s4336_s22 + $0x8] sm:$0xff] %vm877_vm1, %v3215_v33 }
 0x3cf   : > { %v1031_v36 = vpop.f32.mrf.mxu1 }
 0x3d0   : > { %1040 = vst.msk [vmem:[%s4336_s22] sm:$0xff] %vm877_vm1, %v1031_v36  ;;  %3217 = vmatpush3.msra.mxu0 %v1031_v36 }
 0x3d1   : > { %3219 = vmatmul.mubr.msk.f32.vlgmr.msra.gmra.mxu0 %vm1042_vm3, %v4343_v35  ;;  %3226 = vmatprep.subr.mxu0 %v3187_v34 }
 0x3d2   : > { %3227 = vmatpush3.msra.mxu0 %v3187_v34  ;;  %3234 = vmatprep.mubr.msk.f32.mxu0 %vm646_vm0, %v4274_v8 }
 0x3d3   : > { %3228 = vmatprep.subr.mxu0 %v767_v37 }
 0x3d4   : > { %3229 = vmatpush3.msra.mxu0 %v767_v37 }
 0x3d5   : > { %3230 = vmatprep.subr.mxu0 %v3184_v31 }
 0x3d6   : > { %3231 = vmatpush3.msra.mxu0 %v3184_v31 }
 0x3d7   : > { %3232 = vmatprep.subr.mxu0 %v757_v32 }
 0x3d8   : > { %3233 = vmatpush3.msra.mxu0 %v757_v32 }
 0x3d9   : > { %3235 = vmatmul.mubr.msk.f32.vlgmr.msra.gmra.mxu0 %vm646_vm0, %v4278_v13  ;;  %3259 = vmatprep.subr.mxu0 %v3912_v30 }
 0x3da   : > { %3237 = vmatprep.mubr.msk.f32.mxu0 %vm646_vm0, %v4280_v14  ;;  %3260 = vmatpush3.msra.mxu0 %v4360_v38 }
 0x3dd   : > { %3238 = vmatmul.mubr.msk.f32.gmra.mxu0 %vm646_vm0, %v4286_v15 }
 0x3de   : > { %3261 = vmatprep.mubr.msk.f32.mxu0 %vm3913_vm2, %v3912_v30 }
 0x491   : > { %v1112_v39 = vpop.f32.mrf.mxu0 }
 0x492   : > { %3224 = vmatmul.mubr.msk.f32.vlgmr.msra.gmra.mxu1 %vm1042_vm3, %v1112_v39 }
 0x493   : > { %v3220_v40 = vpop.f32.mrf.mxu0  ;;  %3244 = vmatprep.mubr.msk.f32.mxu1 %vm877_vm1, %v4290_v16 }
 0x499   : > { %v3236_v41 = vpop.f32.mrf.mxu0 }
 0x49a   : > { %2979 = vst.msk [vmem:[%s4297_s16 + $0x28] sm:$0xff] %vm646_vm0, %v3236_v41  ;;  %3240 = vmatprep.subr.mxu1 %v3236_v41 }
 0x49b   : > { %v1256_v42 = vpop.f32.mrf.mxu0  ;;  %3241 = vmatpush3.msra.mxu1 %v3236_v41 }
 0x49c   : > { %2978 = vst.msk [vmem:[%s4297_s16 + $0x20] sm:$0xff] %vm646_vm0, %v1256_v42  ;;  %3242 = vmatprep.subr.mxu1 %v1256_v42 }
 0x49d   : > { %3243 = vmatpush3.msra.mxu1 %v1256_v42  ;;  %v3239_v53 = vpop.f32.mrf.mxu0 }
 0x49e   : > { %3245 = vmatmul.mubr.msk.f32.vlgmr.msra.gmra.mxu1 %vm877_vm1, %v4301_v20  ;;  %3247 = vmatprep.subr.mxu1 %v4311_v23  ;;  %2981 = vst.msk [vmem:[%s4297_s16 + $0x38] sm:$0xff] %vm646_vm0, %v3239_v53 }
 0x49f   : > { %3248 = vmatpush3.msra.mxu1 %v4311_v23  ;;  %v1266_v54 = vpop.f32.mrf.mxu0 }
 0x4a0   : > { %3249 = vmatprep.subr.mxu1 %v4317_v25  ;;  %2980 = vst.msk [vmem:[%s4297_s16 + $0x30] sm:$0xff] %vm646_vm0, %v1266_v54 }
 0x4a1   : > { %3250 = vmatpush3.msra.mxu1 %v4317_v25 }
 0x4a2   : > { %3254 = vmatprep.subr.mxu1 %v3912_v30 }
 0x552   : > { %v1185_v43 = vpop.f32.mrf.mxu1 }
 0x553   : > { %1189 = vst.msk [vmem:[%s4381_s7] sm:$0xff] %vm1042_vm3, %v1185_v43 }
 0x554   : > { %v3225_v44 = vpop.f32.mrf.mxu1 }
 0x55e   : > { %v3246_v45 = vpop.f32.mrf.mxu1 }
 0x560   : > { %v1346_v46 = vpop.f32.mrf.mxu1 }
 0x561   : > { %3251 = vmatprep.mubr.msk.f32.mxu1 %vm877_vm1, %v1346_v46 }
 0x562   : > { %3252 = vmatmul.mubr.msk.f32.vlgmr.msra.gmra.mxu1 %vm877_vm1, %v3246_v45 }
 0x563   : > { %3256 = vmatprep.mubr.msk.f32.mxu1 %vm3913_vm2, %v3912_v30 }
 0x622   : > { %v3253_v47 = vpop.f32.mrf.mxu1 }
 0x623   : > { %2987 = vst.msk [vmem:[%s4336_s22 + $0x18] sm:$0xff] %vm877_vm1, %v3253_v47 }
 0x624   : > { %v1427_v48 = vpop.f32.mrf.mxu1 }
 0x625   : > { %2986 = vst.msk [vmem:[%s4336_s22 + $0x10] sm:$0xff] %vm877_vm1, %v1427_v48  ;;  %3255 = vmatpush3.msra.mxu1 %v1427_v48  ;;  %s2512_s22 = scalar_lea.sflag [#allocation16], %s4228_s15 }
 0x626   : > { %3257 = vmatmul.mubr.msk.f32.vlgmr.msra.gmra.mxu1 %vm1042_vm3, %v4343_v35  ;;  %3264 = vmatprep.subr.mxu1 %v4250_v0 }
 0x627   : > { %3265 = vmatpush3.msra.mxu1 %v4250_v0  ;;  %3272 = vmatprep.mubr.msk.f32.mxu1 %vm646_vm0, %v1584_v49 }
 0x628   : > { %3266 = vmatprep.subr.mxu1 %v4252_v1 }
 0x629   : > { %3267 = vmatpush3.msra.mxu1 %v4252_v1 }
 0x62a   : > { %3268 = vmatprep.subr.mxu1 %v4257_v3 }
 0x62b   : > { %3269 = vmatpush3.msra.mxu1 %v4257_v3  ;;  %v1588_v3 = vld [vmem:[%s4232_s25 + $0x20] sm:$0xff] }
 0x62c   : > { %3270 = vmatprep.subr.mxu1 %v4262_v4 }
 0x62d   : > { %3271 = vmatpush3.msra.mxu1 %v4262_v4  ;;  %v1589_v4 = vld [vmem:[%s4232_s25 + $0x28] sm:$0xff] }
 0x62e   : > { %3273 = vmatmul.mubr.msk.f32.vlgmr.msra.gmra.mxu1 %vm646_vm0, %v1585_v50  ;;  %3312 = vmatprep.subr.mxu1 %v3912_v30 }
 0x62f   : > { %3275 = vmatprep.mubr.msk.f32.mxu1 %vm646_vm0, %v1586_v51 }
 0x632   : > { %3276 = vmatmul.mubr.msk.f32.gmra.mxu1 %vm646_vm0, %v1587_v52 }
 0x633   : > { %3278 = vmatprep.mubr.msk.f32.mxu1 %vm646_vm0, %v1588_v3 }
 0x636   : > { %3279 = vmatmul.mubr.msk.f32.gmra.mxu1 %vm646_vm0, %v1589_v4 }
 0x637   : > { %3281 = vmatprep.mubr.msk.f32.mxu1 %vm646_vm0, %v1590_v5 }
 0x63a   : > { %3282 = vmatmul.mubr.msk.f32.gmra.mxu1 %vm646_vm0, %v1591_v6 }
 0x63b   : > { %3314 = vmatprep.mubr.msk.f32.mxu1 %vm3913_vm2, %v3912_v30 }
 0x6e6   : > { %v1505_v55 = vpop.f32.mrf.mxu1 }
 0x6e7   : > { %3262 = vmatmul.mubr.msk.f32.vlgmr.msra.gmra.mxu0 %vm1042_vm3, %v1505_v55 }
 0x6e8   : > { %v3258_v56 = vpop.f32.mrf.mxu1  ;;  %3292 = vmatprep.mubr.msk.f32.mxu0 %vm646_vm0, %v4274_v8 }
 0x6ee   : > { %v3274_v57 = vpop.f32.mrf.mxu1 }
 0x6f0   : > { %v1682_v58 = vpop.f32.mrf.mxu1 }
 0x6f2   : > { %v3277_v59 = vpop.f32.mrf.mxu1 }
 0x6f3   : > { %3284 = vmatprep.subr.mxu0 %v3277_v59 }
 0x6f4   : > { %v1692_v60 = vpop.f32.mrf.mxu1  ;;  %3285 = vmatpush3.msra.mxu0 %v3277_v59 }
 0x6f5   : > { %3286 = vmatprep.subr.mxu0 %v1692_v60 }
 0x6f6   : > { %3287 = vmatpush3.msra.mxu0 %v1692_v60  ;;  %v3280_v10 = vpop.f32.mrf.mxu1 }
 0x6f7   : > { %3288 = vmatprep.subr.mxu0 %v3274_v57 }
 0x6f8   : > { %3289 = vmatpush3.msra.mxu0 %v3274_v57  ;;  %v1702_v11 = vpop.f32.mrf.mxu1 }
 0x6f9   : > { %3290 = vmatprep.subr.mxu0 %v1682_v58 }
 0x6fa   : > { %3291 = vmatpush3.msra.mxu0 %v1682_v58  ;;  %v3283_v17 = vpop.f32.mrf.mxu1 }
 0x6fb   : > { %3293 = vmatmul.mubr.msk.f32.vlgmr.msra.gmra.mxu0 %vm646_vm0, %v4278_v13 }
 0x6fc   : > { %3295 = vmatprep.mubr.msk.f32.mxu0 %vm646_vm0, %v4280_v14  ;;  %v1712_v19 = vpop.f32.mrf.mxu1 }
 0x6ff   : > { %3296 = vmatmul.mubr.msk.f32.gmra.mxu0 %vm646_vm0, %v4286_v15 }
 0x700   : > { %3302 = vmatprep.mubr.msk.f32.mxu0 %vm877_vm1, %v4290_v16 }
 0x7a7   : > { %v1578_v61 = vpop.f32.mrf.mxu0 }
 0x7a8   : > { %2990 = vst.msk [vmem:[%s4381_s7 + $0x8] sm:$0xff] %vm1042_vm3, %v1578_v61  ;;  %s3685_s7 = scalar_lea.vmem %s3684_s5, 1024 }
 0x7a9   : > { %v3263_v62 = vpop.f32.mrf.mxu0  ;;  %p3687_p4 = scmp.lt.s32.totalorder %s3685_s7, %s3679_s30 }
 0x7ab   : > { %p3688_p6 = por %p3687_p4, %p3686_p1 }
 0x7ad   : > { %p3689_p8 = pnand %p3688_p6, %p3682_p11 }
 0x7bb   : > { %v3294_v63 = vpop.f32.mrf.mxu0 }
 0x7bc   : > { %1807 = vst.msk [vmem:[%s4430_s27 + $0x8] sm:$0xff] %vm646_vm0, %v3294_v63  ;;  %3298 = vmatprep.subr.mxu0 %v3294_v63 }
 0x7bd   : > { %v1787_v0 = vpop.f32.mrf.mxu0  ;;  %3299 = vmatpush3.msra.mxu0 %v3294_v63 }
 0x7be   : > { %1806 = vst.msk [vmem:[%s4430_s27] sm:$0xff] %vm646_vm0, %v1787_v0  ;;  %3300 = vmatprep.subr.mxu0 %v1787_v0 }
 0x7bf   : > { %3301 = vmatpush3.msra.mxu0 %v1787_v0  ;;  %v3297_v1 = vpop.f32.mrf.mxu0 }
 0x7c0   : > { %3303 = vmatmul.mubr.msk.f32.vlgmr.msra.gmra.mxu0 %vm877_vm1, %v4301_v20  ;;  %1809 = vst.msk [vmem:[%s4430_s27 + $0x18] sm:$0xff] %vm646_vm0, %v3297_v1  ;;  %3305 = vmatprep.subr.mxu0 %v4311_v23 }
 0x7c1   : > { %v1797_v2 = vpop.f32.mrf.mxu0  ;;  %3306 = vmatpush3.msra.mxu0 %v4311_v23 }
 0x7c2   : > { %1808 = vst.msk [vmem:[%s4430_s27 + $0x10] sm:$0xff] %vm646_vm0, %v1797_v2  ;;  %3307 = vmatprep.subr.mxu0 %v4317_v25 }
 0x7c3   : > { %3308 = vmatpush3.msra.mxu0 %v4317_v25 }
 0x7c4   : > { %3317 = vmatprep.subr.mxu0 %v3912_v30 }
 0x880   : > { %v3304_v7 = vpop.f32.mrf.mxu0 }
 0x882   : > { %v1876_v9 = vpop.f32.mrf.mxu0 }
 0x883   : > { %3309 = vmatprep.mubr.msk.f32.mxu0 %vm877_vm1, %v1876_v9 }
 0x884   : > { %3310 = vmatmul.mubr.msk.f32.vlgmr.msra.gmra.mxu0 %vm877_vm1, %v3304_v7 }
 0x885   : > { %3318 = vmatpush3.msra.mxu0 %v4360_v38  ;;  %3319 = vmatprep.mubr.msk.f32.mxu0 %vm3913_vm2, %v3912_v30 }
 0x944   : > { %v3311_v12 = vpop.f32.mrf.mxu0 }
 0x945   : > { %1967 = vst.msk [vmem:[%s4464_s19 + $0x8] sm:$0xff] %vm877_vm1, %v3311_v12 }
 0x946   : > { %v1957_v18 = vpop.f32.mrf.mxu0 }
 0x947   : > { %1966 = vst.msk [vmem:[%s4464_s19] sm:$0xff] %vm877_vm1, %v1957_v18  ;;  %3313 = vmatpush3.msra.mxu1 %v1957_v18 }
 0x948   : > { %3322 = vmatprep.subr.mxu1 %v3283_v17  ;;  %3315 = vmatmul.mubr.msk.f32.vlgmr.msra.gmra.mxu1 %vm1042_vm3, %v4343_v35 }
 0x949   : > { %3323 = vmatpush3.msra.mxu1 %v3283_v17  ;;  %3330 = vmatprep.mubr.msk.f32.mxu1 %vm646_vm0, %v4274_v8 }
 0x94a   : > { %3324 = vmatprep.subr.mxu1 %v1712_v19 }
 0x94b   : > { %3325 = vmatpush3.msra.mxu1 %v1712_v19 }
 0x94c   : > { %3326 = vmatprep.subr.mxu1 %v3280_v10 }
 0x94d   : > { %3327 = vmatpush3.msra.mxu1 %v3280_v10 }
 0x94e   : > { %3328 = vmatprep.subr.mxu1 %v1702_v11 }
 0x94f   : > { %3329 = vmatpush3.msra.mxu1 %v1702_v11 }
 0x950   : > { %3331 = vmatmul.mubr.msk.f32.vlgmr.msra.gmra.mxu1 %vm646_vm0, %v4278_v13  ;;  %3355 = vmatprep.subr.mxu1 %v3912_v30 }
 0x951   : > { %3356 = vmatpush3.msra.mxu1 %v4360_v38  ;;  %3333 = vmatprep.mubr.msk.f32.mxu1 %vm646_vm0, %v4280_v14 }
 0x954   : > { %3334 = vmatmul.mubr.msk.f32.gmra.mxu1 %vm646_vm0, %v4286_v15 }
 0x955   : > { %3357 = vmatprep.mubr.msk.f32.mxu1 %vm3913_vm2, %v3912_v30 }
 0xa08   : > { %v2034_v8 = vpop.f32.mrf.mxu1 }
 0xa09   : > { %3320 = vmatmul.mubr.msk.f32.vlgmr.msra.gmra.mxu0 %vm1042_vm3, %v2034_v8 }
 0xa0a   : > { %v3316_v21 = vpop.f32.mrf.mxu1  ;;  %3340 = vmatprep.mubr.msk.f32.mxu0 %vm877_vm1, %v4290_v16 }
 0xa10   : > { %v3332_v13 = vpop.f32.mrf.mxu1 }
 0xa11   : > { %3014 = vst.msk [vmem:[%s4430_s27 + $0x28] sm:$0xff] %vm646_vm0, %v3332_v13  ;;  %3336 = vmatprep.subr.mxu0 %v3332_v13 }
 0xa12   : > { %v2178_v22 = vpop.f32.mrf.mxu1  ;;  %3337 = vmatpush3.msra.mxu0 %v3332_v13 }
 0xa13   : > { %3013 = vst.msk [vmem:[%s4430_s27 + $0x20] sm:$0xff] %vm646_vm0, %v2178_v22  ;;  %3338 = vmatprep.subr.mxu0 %v2178_v22 }
 0xa14   : > { %3339 = vmatpush3.msra.mxu0 %v2178_v22 }
 0xa15   : > { %3341 = vmatmul.mubr.msk.f32.vlgmr.msra.gmra.mxu0 %vm877_vm1, %v4301_v20  ;;  %3343 = vmatprep.subr.mxu0 %v4311_v23 }
 0xa16   : > { %3344 = vmatpush3.msra.mxu0 %v4311_v23 }
 0xa17   : > { %3345 = vmatprep.subr.mxu0 %v4317_v25 }
 0xa18   : > { %3346 = vmatpush3.msra.mxu0 %v4317_v25  ;;  %v3335_v25 = vpop.f32.mrf.mxu1 }
 0xa19   : > { %3350 = vmatprep.subr.mxu0 %v3912_v30  ;;  %3016 = vst.msk [vmem:[%s4430_s27 + $0x38] sm:$0xff] %vm646_vm0, %v3335_v25 }
 0xa1a   : > { %v2188_v26 = vpop.f32.mrf.mxu1 }
 0xa1b   : > { %3015 = vst.msk [vmem:[%s4430_s27 + $0x30] sm:$0xff] %vm646_vm0, %v2188_v26 }
 0xac9   : > { %v2107_v14 = vpop.f32.mrf.mxu0 }
 0xaca   : > { %2111 = vst.msk [vmem:[%s4500_s24] sm:$0xff] %vm1042_vm3, %v2107_v14 }
 0xacb   : > { %v3321_v15 = vpop.f32.mrf.mxu0 }
 0xad5   : > { %v3342_v16 = vpop.f32.mrf.mxu0 }
 0xad7   : > { %v2268_v20 = vpop.f32.mrf.mxu0 }
 0xad8   : > { %3347 = vmatprep.mubr.msk.f32.mxu0 %vm877_vm1, %v2268_v20 }
 0xad9   : > { %3348 = vmatmul.mubr.msk.f32.vlgmr.msra.gmra.mxu0 %vm877_vm1, %v3342_v16 }
 0xada   : > { %3352 = vmatprep.mubr.msk.f32.mxu0 %vm3913_vm2, %v3912_v30 }
 0xb99   : > { %v3349_v23 = vpop.f32.mrf.mxu0 }
 0xb9a   : > { %3022 = vst.msk [vmem:[%s4464_s19 + $0x18] sm:$0xff] %vm877_vm1, %v3349_v23 }
 0xb9b   : > { %v2349_v24 = vpop.f32.mrf.mxu0 }
 0xb9c   : > { %3021 = vst.msk [vmem:[%s4464_s19 + $0x10] sm:$0xff] %vm877_vm1, %v2349_v24  ;;  %3351 = vmatpush3.msra.mxu0 %v2349_v24 }
 0xb9d   : > { %3353 = vmatmul.mubr.msk.f32.vlgmr.msra.gmra.mxu0 %vm1042_vm3, %v4343_v35 }
 0xc5d   : > { %v2427_v27 = vpop.f32.mrf.mxu0 }
 0xc5e   : > { %3358 = vmatmul.mubr.msk.f32.vlgmr.msra.gmra.mxu1 %vm1042_vm3, %v2427_v27 }
 0xc5f   : > { %v3354_v28 = vpop.f32.mrf.mxu0 }
 0xc60   : > { %3692 = shalt.err (!%p3689_p8)
}
 0xc61   : > { %s3693_s27 = scalar_lea.hbm %s4541_s21, 512  ;;  %s3697_s16 = scalar_lea.hbm %s4815_s9, 1024 }
 0xc62   : > { %p3694_p3 = scmp.ne.s32.totalorder %s4541_s21, %s3693_s27  ;;  %p3698_p2 = scmp.lt.s32.totalorder %s4541_s21, %s4815_s9 }
 0xc63   : > { %p3699_p10 = scmp.lt.s32.totalorder %s3697_s16, %s3693_s27 }
 0xc64   : > { %p3695_p7 = pnand %p3694_p3, %p4816_p5 }
 0xc65   : > { %p3700_p0 = por %p3699_p10, %p3698_p2 }
 0xc66   : > { %p3696_p12 = pneg %p3695_p7 }
 0xc68   : > { %p3701_p13 = pnand %p3700_p0, %p3696_p12 }
 0xc6a   : > { %3704 = shalt.err (!%p3701_p13)
}
 0xc6b   : > { %s3915_s30 = smov 128   ;;  %s3916_s5 = smov 8  }
 0xc6c   : > { %3385 = dma.vmem_to_hbm [thread:$0]  (%p4816_p5), %s4526_s29, 512, %s4541_s21, %s2512_s22, %s3915_s30, %s3915_s30, %s3916_s5  }
 0xc6d   : > { %s4574_s27 = scalar_lea.hbm %s4760_s12, %s3057_s4  ;;  %s4817_s19 = sshll.u32 %s4013_s14, 10 }
 0xc6e   : > { %s4581_s3 = scalar_lea.hbm %s4759_s11, %s4817_s19  ;;  %s2522_s1 = scalar_lea.sflag [#allocation19], %s4228_s15 }
 0xc6f   : > { %s3705_s6 = scalar_lea.vmem %s4530_s13, 1024  ;;  %s3917_s9 = smov [#allocation18]  }
 0xc70   : > { %p3706_p9 = scmp.ne.s32.totalorder %s4530_s13, %s3705_s6  ;;  %s3709_s29 = sshll.u32 %s3917_s9, 4  ;;  %s3710_s29 = int_to_ptr.vmem [resolvable:$false] %s3709_s29 }
 0xc71   : > { %s3711_s21 = scalar_lea.vmem %s3710_s29, 2048  ;;  %p3712_p4 = scmp.lt.s32.totalorder %s4530_s13, %s3710_s29 }
 0xc72   : > { %p3707_p11 = pnand %p3706_p9, %p4816_p5  ;;  %p3713_p6 = scmp.lt.s32.totalorder %s3711_s21, %s3705_s6 }
 0xc74   : > { %p3708_p1 = pneg %p3707_p11  ;;  %p3714_p8 = por %p3713_p6, %p3712_p4 }
 0xc76   : > { %p3715_p3 = pnand %p3714_p8, %p3708_p1 }
 0xc78   : > { %3718 = shalt.err (!%p3715_p3)
}
 0xc79   : > { %s3719_s4 = scalar_lea.hbm %s4581_s3, 1024  ;;  %s3723_s9 = scalar_lea.hbm %s4759_s11, 2048 }
 0xc7a   : > { %p3720_p7 = scmp.ne.s32.totalorder %s4581_s3, %s3719_s4  ;;  %p3724_p10 = scmp.lt.s32.totalorder %s4581_s3, %s4759_s11 }
 0xc7b   : > { %p3725_p0 = scmp.lt.s32.totalorder %s3723_s9, %s3719_s4 }
 0xc7c   : > { %p3721_p12 = pnand %p3720_p7, %p4816_p5 }
 0xc7d   : > { %p3726_p13 = por %p3725_p0, %p3724_p10 }
 0xc7e   : > { %p3722_p2 = pneg %p3721_p12 }
 0xc80   : > { %p3727_p9 = pnand %p3726_p13, %p3722_p2 }
 0xc82   : > { %3730 = shalt.err (!%p3727_p9)
}
 0xc83   : > { %3387 = dma.vmem_to_hbm [thread:$0]  (%p4816_p5), %s4530_s13, 1024, %s4581_s3, %s2522_s1, %s3915_s30, %s3915_s30, %s3916_s5  }
 0xc84   : > { %s4818_s6 = sshll.u32 %s4013_s14, 10  ;;  %s3058_s4 = sshll.u32 %s4013_s14, 8 }
 0xc85   : > { %s4614_s21 = scalar_lea.hbm %s4756_s8, %s4818_s6  ;;  %s2507_s20 = scalar_lea.sflag [#allocation4], %s4214_s0 }
 0xc86   : > { %s3731_s7 = scalar_lea.vmem %s4524_s18, 1024  ;;  %s3918_s9 = smov [#allocation14]  }
 0xc87   : > { %p3732_p11 = scmp.ne.s32.totalorder %s4524_s18, %s3731_s7  ;;  %s3735_s19 = sshll.u32 %s3918_s9, 4  ;;  %s3736_s19 = int_to_ptr.vmem [resolvable:$false] %s3735_s19 }
 0xc88   : > { %s3737_s25 = scalar_lea.vmem %s3736_s19, 2048  ;;  %p3738_p6 = scmp.lt.s32.totalorder %s4524_s18, %s3736_s19 }
 0xc89   : > { %p3733_p1 = pnand %p3732_p11, %p4816_p5  ;;  %p3739_p8 = scmp.lt.s32.totalorder %s3737_s25, %s3731_s7 }
 0xc8b   : > { %p3734_p4 = pneg %p3733_p1  ;;  %p3740_p3 = por %p3739_p8, %p3738_p6 }
 0xc8d   : > { %p3741_p7 = pnand %p3740_p3, %p3734_p4 }
 0xc8f   : > { %3744 = shalt.err (!%p3741_p7)
}
 0xc90   : > { %s3745_s13 = scalar_lea.hbm %s4614_s21, 1024  ;;  %s3749_s16 = scalar_lea.hbm %s4756_s8, 2048 }
 0xc91   : > { %p3746_p12 = scmp.ne.s32.totalorder %s4614_s21, %s3745_s13  ;;  %p3750_p0 = scmp.lt.s32.totalorder %s4614_s21, %s4756_s8 }
 0xc92   : > { %p3751_p13 = scmp.lt.s32.totalorder %s3749_s16, %s3745_s13 }
 0xc93   : > { %p3747_p2 = pnand %p3746_p12, %p4816_p5 }
 0xc94   : > { %p3752_p9 = por %p3751_p13, %p3750_p0 }
 0xc95   : > { %p3748_p10 = pneg %p3747_p2 }
 0xc97   : > { %p3753_p11 = pnand %p3752_p9, %p3748_p10 }
 0xc99   : > { %3756 = shalt.err (!%p3753_p11)
}
 0xc9a   : > { %3384 = dma.vmem_to_hbm [thread:$0]  (%p4816_p5), %s4524_s18, 1024, %s4614_s21, %s2507_s20, %s3915_s30, %s3915_s30, %s3916_s5  }
 0xc9b   : > { %s2578_s25 = scalar_lea.hbm %s4758_s10, %s3058_s4  ;;  %s3757_s13 = scalar_lea.vmem %s4528_s23, 256 }
 0xc9c   : > { %p3758_p1 = scmp.ne.s32.totalorder %s4528_s23, %s3757_s13  ;;  %s3919_s3 = smov [#allocation17]  }
 0xc9d   : > { %s3761_s6 = sshll.u32 %s3919_s3, 4  ;;  %s3762_s6 = int_to_ptr.vmem [resolvable:$false] %s3761_s6 }
 0xc9e   : > { %p3759_p4 = pnand %p3758_p1, %p4816_p5  ;;  %s3763_s16 = scalar_lea.vmem %s3762_s6, 512 }
 0xc9f   : > { %p3764_p8 = scmp.lt.s32.totalorder %s4528_s23, %s3762_s6  ;;  %p3765_p3 = scmp.lt.s32.totalorder %s3763_s16, %s3757_s13 }
 0xca0   : > { %p3760_p6 = pneg %p3759_p4 }
 0xca1   : > { %p3766_p7 = por %p3765_p3, %p3764_p8 }
 0xca3   : > { %p3767_p12 = pnand %p3766_p7, %p3760_p6 }
 0xca5   : > { %3770 = shalt.err (!%p3767_p12)
}
 0xca6   : > { %s3771_s18 = scalar_lea.hbm %s2578_s25, 256  ;;  %s3775_s29 = scalar_lea.hbm %s4758_s10, 512 }
 0xca7   : > { %p3772_p2 = scmp.ne.s32.totalorder %s2578_s25, %s3771_s18  ;;  %p3776_p13 = scmp.lt.s32.totalorder %s2578_s25, %s4758_s10 }
 0xca8   : > { %p3777_p9 = scmp.lt.s32.totalorder %s3775_s29, %s3771_s18 }
 0xca9   : > { %p3773_p10 = pnand %p3772_p2, %p4816_p5 }
 0xcaa   : > { %p3778_p11 = por %p3777_p9, %p3776_p13 }
 0xcab   : > { %p3774_p0 = pneg %p3773_p10 }
 0xcad   : > { %p3779_p1 = pnand %p3778_p11, %p3774_p0 }
 0xcaf   : > { %3782 = shalt.err (!%p3779_p1)
}
 0xcb0   : > { %3386 = dma.vmem_to_hbm [thread:$0]  (%p4816_p5), %s4528_s23, 256, %s2578_s25, %s2512_s22, %s3915_s30, %s3915_s30, %s3916_s5  }
 0xcb1   : > { %s3783_s19 = scalar_lea.vmem %s4532_s17, 512  ;;  %s3920_s13 = smov [#allocation20]  }
 0xcb2   : > { %p3784_p4 = scmp.ne.s32.totalorder %s4532_s17, %s3783_s19  ;;  %s3787_s3 = sshll.u32 %s3920_s13, 4  ;;  %s3788_s3 = int_to_ptr.vmem [resolvable:$false] %s3787_s3 }
 0xcb3   : > { %s3789_s6 = scalar_lea.vmem %s3788_s3, 1024  ;;  %p3790_p3 = scmp.lt.s32.totalorder %s4532_s17, %s3788_s3 }
 0xcb4   : > { %p3785_p6 = pnand %p3784_p4, %p4816_p5  ;;  %p3791_p7 = scmp.lt.s32.totalorder %s3789_s6, %s3783_s19 }
 0xcb6   : > { %p3786_p8 = pneg %p3785_p6  ;;  %p3792_p12 = por %p3791_p7, %p3790_p3 }
 0xcb8   : > { %p3793_p2 = pnand %p3792_p12, %p3786_p8 }
 0xcba   : > { %3796 = shalt.err (!%p3793_p2)
}
 0xcbb   : > { %s3797_s16 = scalar_lea.hbm %s4574_s27, 512  ;;  %s3801_s25 = scalar_lea.hbm %s4760_s12, 1024 }
 0xcbc   : > { %p3798_p10 = scmp.ne.s32.totalorder %s4574_s27, %s3797_s16  ;;  %p3802_p9 = scmp.lt.s32.totalorder %s4574_s27, %s4760_s12 }
 0xcbd   : > { %p3803_p11 = scmp.lt.s32.totalorder %s3801_s25, %s3797_s16 }
 0xcbe   : > { %p3799_p0 = pnand %p3798_p10, %p4816_p5 }
 0xcbf   : > { %p3804_p1 = por %p3803_p11, %p3802_p9 }
 0xcc0   : > { %p3800_p13 = pneg %p3799_p0 }
 0xcc2   : > { %p3805_p4 = pnand %p3804_p1, %p3800_p13 }
 0xcc4   : > { %3808 = shalt.err (!%p3805_p4)
}
 0xcc5   : > { %3388 = dma.vmem_to_hbm [thread:$0]  (%p4816_p5), %s4532_s17, 512, %s4574_s27, %s2522_s1, %s3915_s30, %s3915_s30, %s3916_s5  }
 0xcc6   : > { %s2629_s20 = sshll.u32 %s4500_s24, 4  ;;  %s4819_s7 = sld [smem:[#allocation46_spill]]  ;;  %s4693_s20 = int_to_ptr.vmem [resolvable:$true] %s2629_s20 }
 0xcc7   : > { %s2532_s15 = scalar_lea.sflag [#allocation22], %s4214_s0  ;;  %s3809_s13 = scalar_lea.vmem %s4693_s20, 256 }
 0xcc8   : > { %p3810_p6 = scmp.ne.s32.totalorder %s4693_s20, %s3809_s13  ;;  %s3921_s1 = smov [#allocation21]  }
 0xcc9   : > { %s3813_s14 = sshll.u32 %s3921_s1, 4  ;;  %s3814_s14 = int_to_ptr.vmem [resolvable:$false] %s3813_s14 }
 0xcca   : > { %p3811_p8 = pnand %p3810_p6, %p4816_p5  ;;  %s3815_s17 = scalar_lea.vmem %s3814_s14, 512 }
 0xccb   : > { %p3816_p7 = scmp.lt.s32.totalorder %s4693_s20, %s3814_s14  ;;  %p3817_p12 = scmp.lt.s32.totalorder %s3815_s17, %s3809_s13 }
 0xccc   : > { %s4700_s19 = scalar_lea.hbm %s4819_s7, %s3058_s4  ;;  %p3812_p3 = pneg %p3811_p8 }
 0xccd   : > { %p3818_p2 = por %p3817_p12, %p3816_p7 }
 0xccf   : > { %p3819_p10 = pnand %p3818_p2, %p3812_p3 }
 0xd1e   : > { %v2500_v29 = vpop.f32.mrf.mxu1 }
 0xd1f   : > { %3025 = vst.msk [vmem:[%s4500_s24 + $0x8] sm:$0xff] %vm1042_vm3, %v2500_v29 }
 0xd20   : > { %v3359_v30 = vpop.f32.mrf.mxu1 }
 0xd21   : > { %3822 = shalt.err (!%p3819_p10)
}
 0xd22   : > { %s3823_s24 = scalar_lea.hbm %s4700_s19, 256  ;;  %s3827_s4 = scalar_lea.hbm %s4819_s7, 512 }
 0xd23   : > { %p3824_p0 = scmp.ne.s32.totalorder %s4700_s19, %s3823_s24  ;;  %p3828_p11 = scmp.lt.s32.totalorder %s4700_s19, %s4819_s7 }
 0xd24   : > { %p3829_p1 = scmp.lt.s32.totalorder %s3827_s4, %s3823_s24 }
 0xd25   : > { %p3825_p13 = pnand %p3824_p0, %p4816_p5 }
 0xd26   : > { %p3830_p4 = por %p3829_p1, %p3828_p11 }
 0xd27   : > { %p3826_p9 = pneg %p3825_p13 }
 0xd29   : > { %p3831_p6 = pnand %p3830_p4, %p3826_p9 }
 0xd2b   : > { %3834 = shalt.err (!%p3831_p6)
}
 0xd2c   : > { %3389 = dma.vmem_to_hbm [thread:$0]  (%p4816_p5), %s4693_s20, 256, %s4700_s19, %s2532_s15, %s3915_s30, %s3915_s30, %s3916_s5  }
 0xd2d PF: > { %s4820_s16 = sld [smem:[#allocation32_spill]]  ;;  %p4823_p3 = scmp.ge.s32.totalorder %s3901_s28, 2 }
 0xd2e   : > { %s4821_s23 = sld [smem:[#allocation36_spill]] }
 0xd33   : > { %s2644_s22 = sand.u32 1, %s4820_s16  }
 0xd34   : > { %p4822_p8 = scmp.ne.s32.totalorder %s4821_s23, 0  ;;  %s2645_s25 = scalar_lea.sflag [#allocation4], %s2644_s22 }
 0xd36   : > { %p3420_p7 = pnand %p4823_p3, %p4822_p8 }
 0xd38   : > { %p3421_p12 = pneg %p3420_p7 }
 0xd3a   : > { %3872 = dma.done.wait (%p3421_p12), %s2645_s25, 1024  }
 0xd3b   : > { %3874 = vsyncadd (%p3421_p12), %s2645_s25, 4294966272  ;;  %s4824_s2 = sadd.s32 4294967294, %s3901_s28  }
 0xd3c   : > { %s2653_s18 = sand.u32 1, %s4824_s2  }
 0xd3d   : > { %s2654_s21 = scalar_lea.sflag [#allocation16], %s2653_s18 }
 0xd3e   : > { %3876 = dma.done.wait (%p3421_p12), %s2654_s21, 768  }
 0xd3f   : > { %3878 = vsyncadd (%p3421_p12), %s2654_s21, 4294966528  ;;  %s2672_s29 = scalar_lea.sflag [#allocation19], %s2653_s18 }
 0xd40   : > { %3880 = dma.done.wait (%p3421_p12), %s2672_s29, 1536  }
 0xd41   : > { %3882 = vsyncadd (%p3421_p12), %s2672_s29, 4294965760  ;;  %s2690_s30 = scalar_lea.sflag [#allocation22], %s2644_s22 }
 0xd42   : > { %3884 = dma.done.wait (%p3421_p12), %s2690_s30, 256  }
 0xd43   : > { %3886 = vsyncadd (%p3421_p12), %s2690_s30, 4294967040  ;;  %s4825_s28 = sld [smem:[#allocation34_spill]]  ;;  %s4828_s25 = smov %s3893_s26 }
 0xd44   : > { %s4826_s5 = sld [smem:[#allocation33_spill]] }
 0xd45   : > { %s4827_s27 = sld [smem:[#allocation35_spill]] }
 0xd49   : > { %p41_p5 = scmp.ge.s32.totalorder %s4825_s28, 4  }
 0xd4a   : > { %s4829_s26 = smov %s4826_s5 }
 0xd4b   :  { %43 = sbr.rel (!%p41_p5) target bundleno = 26 (0x1a), region = 217 }
 0xd50   :  { %2695 = vsyncpa [#allocation3], 1 }
 0xd51   :  { %2697 = vsyncpa [#allocation3 + $0x1], 1 }
 0xd52   :  { %2698 = vsyncpa [#allocation6], 1 }
 0xd53   :  { %2700 = vsyncpa [#allocation6 + $0x1], 1 }
 0xd54   :  { %2701 = vsyncpa [#allocation9], 1 }
 0xd55   :  { %2702 = vsyncpa [#allocation12], 1 }
 0xd56   :  { %2703 = vsyncpa [#allocation4], 1 }
 0xd57   :  { %2705 = vsyncpa [#allocation4 + $0x1], 1 }
 0xd58   :  { %2706 = vsyncpa [#allocation16], 1 }
 0xd59   :  { %2708 = vsyncpa [#allocation16 + $0x1], 1 }
 0xd5a   :  { %2709 = vsyncpa [#allocation19], 1 }
 0xd5b   :  { %2711 = vsyncpa [#allocation19 + $0x1], 1 }
 0xd5c   :  { %2712 = vsyncpa [#allocation22], 1 }
 0xd5d   :  { %2714 = vsyncpa [#allocation22 + $0x1], 1 }

// kernel: tpu_custom_call.1
= control target key start
LH: loop header
LB: loop body
LE: loop exit
PB: predicated region body
PF: predicated region fallthrough
CT: control target
= control target key end

     0   :  { %s4748_s0 = inlined_call_operand.hbm [shape: f32[4,32,32], index: 0, kind: input, shape index: {}]   ;;  %s4749_s1 = inlined_call_operand.hbm [shape: f32[4,32,32], index: 1, kind: input, shape index: {}]   ;;  %s4750_s2 = inlined_call_operand.hbm [shape: f32[32,32], index: 2, kind: input, shape index: {}]   ;;  %s4751_s3 = inlined_call_operand.hbm [shape: f32[32,32], index: 3, kind: input, shape index: {}]   ;;  %s4752_s4 = inlined_call_operand.hbm [shape: f32[16,16], index: 4, kind: input, shape index: {}]   ;;  %s4753_s5 = inlined_call_operand.hbm [shape: f32[16,16], index: 5, kind: input, shape index: {}]   ;;  %s4754_s6 = inlined_call_operand.vmem [shape: f32[8,8], index: 6, kind: input, shape index: {}]   ;;  %s4755_s7 = inlined_call_operand.hbm [shape: f32[8,8], index: 7, kind: input, shape index: {}]   ;;  %s4756_s8 = inlined_call_operand.hbm [shape: f32[4,32,32], index: 8, kind: output, shape index: {0}]   ;;  %s4757_s9 = inlined_call_operand.hbm [shape: f32[4,16,16], index: 9, kind: output, shape index: {1}]   ;;  %s4758_s10 = inlined_call_operand.hbm [shape: f32[4,8,8], index: 10, kind: output, shape index: {2}]   ;;  %s4759_s11 = inlined_call_operand.hbm [shape: f32[4,32,32], index: 11, kind: output, shape index: {3}]   ;;  %s4760_s12 = inlined_call_operand.hbm [shape: f32[4,16,16], index: 12, kind: output, shape index: {4}]   ;;  %s4761_s13 = inlined_call_operand.hbm [shape: f32[4,8,8], index: 13, kind: output, shape index: {5}]  }
   0x1   :  { %4776 = sst [smem:[#allocation37_spill]] %s4748_s0 }
   0x2   :  { %4777 = sst [smem:[#allocation38_spill]] %s4749_s1 }
   0x3   :  { %4778 = sst [smem:[#allocation39_spill]] %s4750_s2 }
   0x4   :  { %4779 = sst [smem:[#allocation40_spill]] %s4751_s3 }
   0x5   :  { %4780 = sst [smem:[#allocation41_spill]] %s4752_s4 }
   0x6   :  { %4781 = sst [smem:[#allocation42_spill]] %s4753_s5 }
   0x7   :  { %4782 = sst [smem:[#allocation43_spill]] %s4754_s6 }
   0x8   :  { %4783 = sst [smem:[#allocation44_spill]] %s4755_s7 }
   0x9   :  { %4784 = sst [smem:[#allocation45_spill]] %s4757_s9 }
   0xa   :  { %4785 = sst [smem:[#allocation46_spill]] %s4761_s13 }
   0xb   :  { %19 = vsyncpa [#allocation3], 0 }
   0xc   :  { %21 = vsyncpa [#allocation3 + $0x1], 0 }
   0xd   :  { %22 = vsyncpa [#allocation6], 0 }
   0xe   :  { %24 = vsyncpa [#allocation6 + $0x1], 0 }
   0xf   :  { %25 = vsyncpa [#allocation9], 0 }
  0x10   :  { %26 = vsyncpa [#allocation12], 0 }
  0x11   :  { %27 = vsyncpa [#allocation4], 0 }
  0x12   :  { %29 = vsyncpa [#allocation4 + $0x1], 0 }
  0x13   :  { %30 = vsyncpa [#allocation16], 0 }
  0x14   :  { %32 = vsyncpa [#allocation16 + $0x1], 0 }
  0x15   :  { %33 = vsyncpa [#allocation19], 0 }
  0x16   :  { %35 = vsyncpa [#allocation19 + $0x1], 0 }
  0x17   :  { %36 = vsyncpa [#allocation22], 0 }
  0x18   :  { %38 = vsyncpa [#allocation22 + $0x1], 0  ;;  %s3992_s25 = smov 0   ;;  %s3994_s26 = smov 0  }
  0x19   :  { %s3996_s27 = smov 0   ;;  %s3998_s28 = smov 0  }
  0x1a LB: > { %4786 = sst [smem:[#allocation32_spill]] %s3889_s25  ;;  %s3903_s29 = smov [#allocation7]   ;;  %s3901_s28 = sphi %s3998_s28, %s4825_s28   ;;  %s3897_s27 = sphi %s3996_s27, %s4827_s27   ;;  %s3893_s26 = sphi %s3994_s26, %s4829_s26   ;;  %s3889_s25 = sphi %s3992_s25, %s4828_s25  }
  0x1b   : > { %4787 = sst [smem:[#allocation33_spill]] %s3897_s27  ;;  %s395_s30 = sshll.u32 %s3903_s29, 4  ;;  %s396_s30 = int_to_ptr.vmem [resolvable:$true] %s395_s30 }
  0x1c   : > { %s4013_s14 = sadd.s32 4294967295, %s3901_s28   ;;  %p2927_p0 = scmp.ge.s32.totalorder %s3901_s28, 1 }
  0x1d   : > { %p4772_p1 = scmp.eq.s32.totalorder %s4013_s14, 0  ;;  %p383_p2 = scmp.lt.s32.totalorder %s3901_s28, 3 }
  0x1e   : > { %s3904_s16 = smov [#allocation8]   ;;  %s3905_s19 = smov [#allocation11]  }
  0x1f   : > { %p4018_p3 = pnand %p2927_p0, %p383_p2  ;;  %s408_s17 = sshll.u32 %s3904_s16, 4  ;;  %s4031_s17 = int_to_ptr.vmem [resolvable:$true] %s408_s17 }
  0x20   : > { %s434_s20 = sshll.u32 %s3905_s19, 4  ;;  %s3504_s22 = scalar_lea.vmem %s396_s30, 512  ;;  %s4033_s20 = int_to_ptr.vmem [resolvable:$true] %s434_s20 }
  0x21   : > { %p3396_p5 = pneg %p4018_p3  ;;  %p3505_p8 = scmp.ne.s32.totalorder %s396_s30, %s3504_s22 }
  0x22   : > { %p3512_p11 = scmp.lt.s32.totalorder %s396_s30, %s396_s30  ;;  %p3513_p12 = scmp.lt.s32.totalorder %s3504_s22, %s3504_s22 }
  0x23   : > { %p4027_p6 = pnand %p3396_p5, %p4772_p1 }
  0x24   : > { %p3514_p13 = por %p3513_p12, %p3512_p11 }
  0x25   : > { %p4037_p7 = pneg %p4027_p6 }
  0x27   : > { %p3507_p9 = pnand %p3505_p8, %p4037_p7 }
  0x29   : > { %p3508_p10 = pneg %p3507_p9 }
  0x2b   : > { %p3515_p0 = pnand %p3514_p13, %p3508_p10 }
  0x2d   : > { %3518 = shalt.err (!%p3515_p0)
}
  0x2e   : > { %s4762_s23 = smov 128   ;;  %s4764_s24 = smov 8  }
  0x2f   : > { %s4791_s2 = sld [smem:[#allocation39_spill]]  ;;  %s3530_s19 = scalar_lea.vmem %s4031_s17, 512 }
  0x30   : > { %p3531_p2 = scmp.ne.s32.totalorder %s4031_s17, %s3530_s19  ;;  %p3538_p9 = scmp.lt.s32.totalorder %s4031_s17, %s4031_s17 }
  0x31   : > { %p3539_p10 = scmp.lt.s32.totalorder %s3530_s19, %s3530_s19 }
  0x32   : > { %p3533_p5 = pnand %p3531_p2, %p4037_p7 }
  0x33   : > { %p3540_p11 = por %p3539_p10, %p3538_p9 }
  0x34   : > { %p3534_p8 = pneg %p3533_p5 }
  0x35   : > { %3399 = dma.hbm_to_vmem [thread:$0]  (!%p4027_p6), %s4791_s2, 512, %s396_s30, [#allocation6], %s4762_s23, %s4762_s23, %s4764_s24  }
  0x36   : > { %p3541_p12 = pnand %p3540_p11, %p3534_p8 }
  0x38   : > { %3544 = shalt.err (!%p3541_p12)
}
  0x39   : > { %s4792_s3 = sld [smem:[#allocation40_spill]]  ;;  %s3556_s30 = scalar_lea.vmem %s4033_s20, 256 }
  0x3a   : > { %p3557_p13 = scmp.ne.s32.totalorder %s4033_s20, %s3556_s30  ;;  %p3564_p5 = scmp.lt.s32.totalorder %s4033_s20, %s4033_s20 }
  0x3b   : > { %p3565_p8 = scmp.lt.s32.totalorder %s3556_s30, %s3556_s30 }
  0x3c   : > { %p3559_p0 = pnand %p3557_p13, %p4037_p7 }
  0x3d   : > { %p3566_p9 = por %p3565_p8, %p3564_p5 }
  0x3e   : > { %p3560_p2 = pneg %p3559_p0 }
  0x3f   : > { %3402 = dma.hbm_to_vmem [thread:$0]  (!%p4027_p6), %s4792_s3, 512, %s4031_s17, [#allocation9], %s4762_s23, %s4762_s23, %s4764_s24  }
  0x40   : > { %p3567_p10 = pnand %p3566_p9, %p3560_p2 }
  0x42   : > { %3570 = shalt.err (!%p3567_p10)
}
  0x43   : > { %s4793_s5 = sld [smem:[#allocation42_spill]]  ;;  %s3908_s17 = smov [#allocation10]  }
  0x44   : > { %s421_s22 = sshll.u32 %s3908_s17, 4  ;;  %s3909_s29 = smov [#allocation13]   ;;  %s422_s22 = int_to_ptr.vmem [resolvable:$true] %s421_s22 }
  0x45   : > { %s451_s2 = sshll.u32 %s3909_s29, 4  ;;  %s3582_s30 = scalar_lea.vmem %s422_s22, 256  ;;  %s452_s2 = int_to_ptr.vmem [resolvable:$true] %s451_s2 }
  0x46   : > { %p3583_p11 = scmp.ne.s32.totalorder %s422_s22, %s3582_s30  ;;  %p3590_p0 = scmp.lt.s32.totalorder %s422_s22, %s422_s22 }
  0x47   : > { %p3591_p2 = scmp.lt.s32.totalorder %s3582_s30, %s3582_s30 }
  0x48   : > { %p3585_p12 = pnand %p3583_p11, %p4037_p7 }
  0x49   : > { %3408 = dma.hbm_to_vmem [thread:$0]  (!%p4027_p6), %s4793_s5, 256, %s4033_s20, [#allocation12], %s4762_s23, %s4762_s23, %s4764_s24  }
  0x4a   : > { %p3586_p13 = pneg %p3585_p12  ;;  %p3592_p5 = por %p3591_p2, %p3590_p0 }
  0x4c   : > { %p3593_p8 = pnand %p3592_p5, %p3586_p13 }
  0x4e   : > { %3596 = shalt.err (!%p3593_p8)
}
  0x4f   : > { %s4794_s4 = sld [smem:[#allocation41_spill]]  ;;  %s3608_s19 = scalar_lea.vmem %s452_s2, 128 }
  0x50   : > { %p3609_p9 = scmp.ne.s32.totalorder %s452_s2, %s3608_s19  ;;  %p3616_p12 = scmp.lt.s32.totalorder %s452_s2, %s452_s2 }
  0x51   : > { %p3617_p0 = scmp.lt.s32.totalorder %s3608_s19, %s3608_s19 }
  0x52   : > { %p3611_p10 = pnand %p3609_p9, %p4037_p7 }
  0x53   : > { %p3618_p13 = por %p3617_p0, %p3616_p12 }
  0x54   : > { %p3612_p11 = pneg %p3611_p10 }
  0x55   : > { %3405 = dma.hbm_to_vmem [thread:$0]  (!%p4027_p6), %s4794_s4, 256, %s422_s22, [#allocation9], %s4762_s23, %s4762_s23, %s4764_s24  }
  0x56   : > { %p3619_p2 = pnand %p3618_p13, %p3612_p11 }
  0x58   : > { %3622 = shalt.err (!%p3619_p2)
}
  0x59   : > { %s4795_s7 = sld [smem:[#allocation44_spill]]  ;;  %s4766_s18 = sadd.s32 4294967294, %s3901_s28  }
  0x5a   : > { %s4100_s21 = sadd.s32 1, %s3901_s28   ;;  %s51_s22 = sadd.s32 1, %s3897_s27 }
  0x5b   : > { %4796 = sst [smem:[#allocation34_spill]] %s4100_s21  ;;  %s48_s30 = ssub.s32 %s3901_s28, %s4100_s21 }
  0x5c   : > { %p58_p7 = scmp.ne.s32.totalorder %s3897_s27, %s3893_s26  ;;  %p49_p5 = scmp.eq.s32.totalorder %s48_s30, 0 }
  0x5d   : > { %p59_p8 = scmp.eq.s32.totalorder %s3901_s28, 0  ;;  %p64_p9 = scmp.ne.s32.totalorder %s3893_s26, %s3889_s25 }
  0x5e   : > { %p240_p10 = scmp.eq.s32.totalorder %s4013_s14, 1  ;;  %p246_p0 = scmp.eq.s32.totalorder %s4766_s18, 1 }
  0x5f   : > { %3411 = dma.hbm_to_vmem [thread:$0]  (!%p4027_p6), %s4795_s7, 128, %s452_s2, [#allocation12]  }
  0x60   : > { %s4112_s20 = scalar_select %p49_p5, %s3897_s27, %s51_s22  }
  0x61   : > { %p60_p11 = por %p59_p8, %p58_p7  ;;  %p4116_p12 = por %p4772_p1, %p64_p9 }
  0x62   : > { %4797 = sst [smem:[#allocation35_spill]] %s4112_s20  ;;  %p4120_p6 = por %p240_p10, %p58_p7 }
  0x63   : > { %s4798_s16 = scalar_select %p4116_p12, 1, 0 }
  0x64   : > { %s4799_s2 = scalar_select %p4120_p6, 1, 0 }
  0x65   : > { %p3443_p13 = scmp.lt.s32.totalorder %s3901_s28, 2  ;;  %s462_s19 = sand.u32 1, %s3897_s27  }
  0x66   : > { %p4128_p2 = por %p246_p0, %p64_p9  ;;  %s4132_s29 = sshll.u32 %s462_s19, 6 }
  0x67   : > { %s3051_s22 = sshll.u32 %s3901_s28, 10  ;;  %s4802_s0 = sld [smem:[#allocation37_spill]] }
  0x68   : > { %s4800_s17 = scalar_select %p4128_p2, 1, 0 }
  0x69   : > { %s466_s3 = scalar_lea.vmem [#allocation2], %s4132_s29  ;;  %p4141_p7 = pnand %p3443_p13, %p60_p11 }
  0x6a   : > { %4801 = sst [smem:[#allocation36_spill]] %s4800_s17  ;;  %s474_s18 = sshll.u32 %s466_s3, 4  ;;  %s4145_s18 = int_to_ptr.vmem [resolvable:$true] %s474_s18 }
  0x6b   : > { %s4804_s1 = sld [smem:[#allocation38_spill]]  ;;  %s4152_s23 = scalar_lea.sflag [#allocation3], %s462_s19 }
  0x6c   : > { %p3625_p8 = pneg %p4141_p7 }
  0x6d   : > { %s4138_s24 = scalar_lea.hbm %s4802_s0, %s3051_s22  ;;  %s3628_s21 = scalar_lea.hbm %s4802_s0, 2048 }
  0x6e   : > { %s3623_s30 = scalar_lea.hbm %s4138_s24, 1024  ;;  %p3629_p11 = scmp.lt.s32.totalorder %s4138_s24, %s4802_s0 }
  0x6f   : > { %p3624_p5 = scmp.ne.s32.totalorder %s4138_s24, %s3623_s30  ;;  %p3630_p0 = scmp.lt.s32.totalorder %s3628_s21, %s3623_s30 }
  0x71   : > { %s4150_s20 = scalar_lea.hbm %s4804_s1, %s3051_s22  ;;  %p3626_p9 = pnand %p3625_p8, %p3624_p5 }
  0x72   : > { %p3631_p13 = por %p3630_p0, %p3629_p11 }
  0x73   : > { %p3627_p10 = pneg %p3626_p9 }
  0x75   : > { %p3632_p4 = pnand %p3631_p13, %p3627_p10 }
  0x77   : > { %3635 = shalt.err (!%p3632_p4)
}
  0x78   : > { %s3636_s5 = scalar_lea.vmem %s4145_s18, 1024  ;;  %s3910_s7 = smov [#allocation2]  }
  0x79   : > { %p3637_p1 = scmp.ne.s32.totalorder %s4145_s18, %s3636_s5  ;;  %s3641_s27 = sshll.u32 %s3910_s7, 4  ;;  %s3642_s27 = int_to_ptr.vmem [resolvable:$false] %s3641_s27 }
  0x7a   : > { %s3643_s19 = scalar_lea.vmem %s3642_s27, 2048  ;;  %p3644_p2 = scmp.lt.s32.totalorder %s4145_s18, %s3642_s27 }
  0x7b   : > { %p3639_p5 = pnand %p3637_p1, %p3625_p8  ;;  %p3645_p6 = scmp.lt.s32.totalorder %s3643_s19, %s3636_s5 }
  0x7d   : > { %p3640_p9 = pneg %p3639_p5  ;;  %p3646_p12 = por %p3645_p6, %p3644_p2 }
  0x7f   : > { %p3647_p11 = pnand %p3646_p12, %p3640_p9 }
  0x81   : > { %3650 = shalt.err (!%p3647_p11)
}
  0x82   : > { %s4805_s25 = smov 8   ;;  %s4806_s21 = smov 128  }
  0x83   : > { %3415 = dma.hbm_to_vmem [thread:$0]  (!%p4141_p7), %s4138_s24, 1024, %s4145_s18, %s4152_s23, %s4806_s21, %s4806_s21, %s4805_s25  }
  0x84   : > { %s488_s17 = scalar_lea.vmem [#allocation5], %s4132_s29  ;;  %s484_s30 = sand.u32 1, %s3901_s28  }
  0x85   : > { %s496_s22 = sshll.u32 %s488_s17, 4  ;;  %s485_s3 = scalar_lea.sflag [#allocation6], %s484_s30  ;;  %s4184_s22 = int_to_ptr.vmem [resolvable:$true] %s496_s22 }
  0x86   : > { %s3651_s5 = scalar_lea.hbm %s4150_s20, 1024  ;;  %s3656_s19 = scalar_lea.hbm %s4804_s1, 2048 }
  0x87   : > { %p3652_p1 = scmp.ne.s32.totalorder %s4150_s20, %s3651_s5  ;;  %p3657_p6 = scmp.lt.s32.totalorder %s4150_s20, %s4804_s1 }
  0x88   : > { %p3658_p2 = scmp.lt.s32.totalorder %s3656_s19, %s3651_s5 }
  0x89   : > { %p3654_p4 = pnand %p3652_p1, %p3625_p8 }
  0x8a   : > { %p3659_p10 = por %p3658_p2, %p3657_p6 }
  0x8b   : > { %p3655_p12 = pneg %p3654_p4 }
  0x8d   : > { %p3660_p0 = pnand %p3659_p10, %p3655_p12 }
  0x8f   : > { %3663 = shalt.err (!%p3660_p0)
}
  0x90   : > { %s3664_s24 = scalar_lea.vmem %s4184_s22, 1024  ;;  %s3911_s18 = smov [#allocation5]  }
  0x91   : > { %p3665_p13 = scmp.ne.s32.totalorder %s4184_s22, %s3664_s24  ;;  %s3669_s29 = sshll.u32 %s3911_s18, 4  ;;  %s3670_s29 = int_to_ptr.vmem [resolvable:$false] %s3669_s29 }
  0x92   : > { %s3671_s23 = scalar_lea.vmem %s3670_s29, 2048  ;;  %p3672_p11 = scmp.lt.s32.totalorder %s4184_s22, %s3670_s29 }
  0x93   : > { %p3667_p5 = pnand %p3665_p13, %p3625_p8  ;;  %p3673_p1 = scmp.lt.s32.totalorder %s3671_s23, %s3664_s24 }
  0x95   : > { %p3668_p9 = pneg %p3667_p5  ;;  %p3674_p4 = por %p3673_p1, %p3672_p11 }
  0x97   : > { %p3675_p6 = pnand %p3674_p4, %p3668_p9 }
  0x99   : > { %3678 = shalt.err (!%p3675_p6)
}
  0x9a   : > { %3418 = dma.hbm_to_vmem [thread:$0]  (!%p4141_p7), %s4150_s20, 1024, %s4184_s22, %s485_s3, %s4806_s21, %s4806_s21, %s4805_s25  }
  0x9b   : > { %508 = sbr.rel (%p4018_p3) target bundleno = 3373 (0xd2d), region = 52  ;;  %s4214_s0 = sand.u32 (!%p4018_p3), 1, %s3893_s26  }
  0x9c   : > { %s4217_s13 = sshll.u32 (!%p4018_p3), %s4214_s0, 6  ;;  %s511_s17 = scalar_lea.sflag (!%p4018_p3), [#allocation3], %s4214_s0 }
  0x9d   : > { %s4221_s4 = scalar_lea.vmem (!%p4018_p3), [#allocation2], %s4217_s13  ;;  %p4807_p8 = scmp.ne.s32.totalorder (!%p4018_p3), %s4798_s16, 0 }
  0xa0   : > { %3852 = dma.done.wait (%p4807_p8), %s511_s17, 1024  }
  0xa1   : > { %3854 = vsyncadd (%p4807_p8), %s511_s17, 4294966272  ;;  %s4228_s15 = sand.u32 1, %s4013_s14   ;;  %s4232_s25 = scalar_lea.vmem [#allocation5], %s4217_s13 }
  0xa2   : > { %s520_s20 = scalar_lea.sflag [#allocation6], %s4228_s15 }
  0xa3   : > { %3856 = dma.done.wait (%p4807_p8), %s520_s20, 1024  }
  0xa4   : > { %3858 = vsyncadd (%p4807_p8), %s520_s20, 4294966272  ;;  %p4808_p3 = scmp.eq.s32.totalorder %s4013_s14, 0 }
  0xa6   : > { %3860 = dma.done.wait (%p4808_p3), [#allocation6], 512   ;;  %p4809_p7 = pmov %p4808_p3 }
  0xa7   : > { %p4810_p12 = pmov %p4808_p3 }
  0xa8   : > { %3862 = vsyncadd (%p4809_p7), [#allocation6], 4294966784 }
  0xa9   : > { %3864 = dma.done.wait (%p4810_p12), [#allocation9], 768   ;;  %p4811_p2 = pmov %p4808_p3 }
  0xab   : > { %3866 = vsyncadd (%p4811_p2), [#allocation9], 4294966528  ;;  %p4812_p10 = pmov %p4811_p2 }
  0xac   : > { %p4813_p0 = pmov %p4811_p2 }
  0xad   : > { %3868 = dma.done.wait (%p4812_p10), [#allocation12], 384  }
  0xae   : > { %3870 = vsyncadd (%p4813_p0), [#allocation12], 4294966912  ;;  %vm646_vm0 = vcmask 261120   ;;  %v4250_v0 = vld [vmem:[#allocation8 + $0x18] sm:$0xff]  ;;  %v4252_v1 = vld [vmem:[#allocation8 + $0x10] sm:$0xff]  ;;  %vm877_vm1 = vcmask 130048  }
  0xaf   : > { %3168 = vmatprep.subr.mxu0 %v4250_v0  ;;  %v638_v2 = vld [vmem:[%s4221_s4] sm:$0xff]  ;;  %v4257_v3 = vld [vmem:[#allocation8 + $0x8] sm:$0xff]  ;;  %v640_v6 = vld [vmem:[%s4221_s4 + $0x10] sm:$0xff]  ;;  %s4297_s16 = scalar_lea.vmem [#allocation14], %s4217_s13  ;;  %v3912_v30 = vmov 0.0   ;;  %vm3913_vm2 = vmmov 0  }
  0xb0   : > { %3169 = vmatpush3.msra.mxu0 %v4250_v0  ;;  %3176 = vmatprep.mubr.msk.f32.mxu0 %vm646_vm0, %v638_v2  ;;  %v4262_v4 = vld [vmem:[#allocation8] sm:$0xff]  ;;  %v639_v5 = vld [vmem:[%s4221_s4 + $0x8] sm:$0xff]  ;;  %v641_v7 = vld [vmem:[%s4221_s4 + $0x18] sm:$0xff]  ;;  %s2951_s21 = sshll.u32 %s4214_s0, 5  ;;  %s4814_s6 = sld [smem:[#allocation43_spill]]  ;;  %vm1042_vm3 = vcmask 64512  }
  0xb1   : > { %3170 = vmatprep.subr.mxu0 %v4252_v1  ;;  %v4274_v8 = vld [vmem:[#allocation7] sm:$0xff]  ;;  %v4278_v13 = vld [vmem:[#allocation7 + $0x8] sm:$0xff]  ;;  %v4280_v14 = vld [vmem:[#allocation7 + $0x10] sm:$0xff]  ;;  %s4336_s22 = scalar_lea.vmem [#allocation15], %s2951_s21  ;;  %s2952_s5 = sshll.u32 %s4214_s0, 4 }
  0xb2   : > { %3171 = vmatpush3.msra.mxu0 %v4252_v1  ;;  %3196 = vmatprep.mubr.msk.f32.mxu1 %vm646_vm0, %v4274_v8  ;;  %v4286_v15 = vld [vmem:[#allocation7 + $0x18] sm:$0xff]  ;;  %v4290_v16 = vld [vmem:[#allocation10] sm:$0xff]  ;;  %v4301_v20 = vld [vmem:[#allocation10 + $0x8] sm:$0xff]  ;;  %s4381_s7 = scalar_lea.vmem [#allocation17], %s2952_s5  ;;  %s4430_s27 = scalar_lea.vmem [#allocation18], %s4217_s13 }
  0xb3   : > { %3172 = vmatprep.subr.mxu0 %v4257_v3  ;;  %v642_v17 = vld [vmem:[%s4221_s4 + $0x20] sm:$0xff]  ;;  %v4311_v23 = vld [vmem:[#allocation11 + $0x8] sm:$0xff]  ;;  %v643_v24 = vld [vmem:[%s4221_s4 + $0x28] sm:$0xff]  ;;  %s4464_s19 = scalar_lea.vmem [#allocation20], %s2951_s21  ;;  %s4500_s24 = scalar_lea.vmem [#allocation21], %s2952_s5 }
  0xb4   : > { %3173 = vmatpush3.msra.mxu0 %v4257_v3  ;;  %v4317_v25 = vld [vmem:[#allocation11] sm:$0xff]  ;;  %v645_v27 = vld [vmem:[%s4221_s4 + $0x38] sm:$0xff]  ;;  %v4360_v38 = vld [vmem:[#allocation13] sm:$0xff]  ;;  %s2546_s18 = sshll.u32 %s4297_s16, 4  ;;  %s2563_s29 = sshll.u32 %s4336_s22, 4  ;;  %s4524_s18 = int_to_ptr.vmem [resolvable:$true] %s2546_s18  ;;  %s4526_s29 = int_to_ptr.vmem [resolvable:$true] %s2563_s29 }
  0xb5   : > { %3174 = vmatprep.subr.mxu0 %v4262_v4  ;;  %v644_v26 = vld [vmem:[%s4221_s4 + $0x30] sm:$0xff]  ;;  %v1584_v49 = vld [vmem:[%s4232_s25] sm:$0xff]  ;;  %v1585_v50 = vld [vmem:[%s4232_s25 + $0x8] sm:$0xff]  ;;  %s2579_s23 = sshll.u32 %s4381_s7, 4  ;;  %s2596_s13 = sshll.u32 %s4430_s27, 4  ;;  %s4528_s23 = int_to_ptr.vmem [resolvable:$true] %s2579_s23  ;;  %s4530_s13 = int_to_ptr.vmem [resolvable:$true] %s2596_s13 }
  0xb6   : > { %3175 = vmatpush3.msra.mxu0 %v4262_v4  ;;  %v4343_v35 = vld [vmem:[%s4814_s6] sm:$0xff]  ;;  %v1586_v51 = vld [vmem:[%s4232_s25 + $0x10] sm:$0xff]  ;;  %v1587_v52 = vld [vmem:[%s4232_s25 + $0x18] sm:$0xff]  ;;  %s2613_s17 = sshll.u32 %s4464_s19, 4  ;;  %s3057_s4 = sshll.u32 %s4013_s14, 9  ;;  %s4532_s17 = int_to_ptr.vmem [resolvable:$true] %s2613_s17 }
  0xb7   : > { %3177 = vmatmul.mubr.msk.f32.vlgmr.msra.gmra.mxu0 %vm646_vm0, %v639_v5  ;;  %3216 = vmatprep.subr.mxu0 %v3912_v30  ;;  %v1590_v5 = vld [vmem:[%s4232_s25 + $0x30] sm:$0xff]  ;;  %s4815_s9 = sld [smem:[#allocation45_spill]]  ;;  %s3679_s30 = scalar_lea.vmem %s4526_s29, 512 }
  0xb8   : > { %3179 = vmatprep.mubr.msk.f32.mxu0 %vm646_vm0, %v640_v6  ;;  %v1591_v6 = vld [vmem:[%s4232_s25 + $0x38] sm:$0xff]  ;;  %p3680_p13 = scmp.ne.s32.totalorder %s4526_s29, %s3679_s30  ;;  %p4816_p5 = scmp.ne.s32.totalorder %s4799_s2, 0 }
  0xb9   : > { %s3914_s3 = smov [#allocation15]  }
  0xba   : > { %p3681_p9 = pnand %p3680_p13, %p4816_p5  ;;  %s3683_s5 = sshll.u32 %s3914_s3, 4  ;;  %s3684_s5 = int_to_ptr.vmem [resolvable:$false] %s3683_s5 }
  0xbb   : > { %3180 = vmatmul.mubr.msk.f32.gmra.mxu0 %vm646_vm0, %v641_v7  ;;  %p3686_p1 = scmp.lt.s32.totalorder %s4526_s29, %s3684_s5 }
  0xbc   : > { %3182 = vmatprep.mubr.msk.f32.mxu0 %vm646_vm0, %v642_v17  ;;  %p3682_p11 = pneg %p3681_p9 }
  0xbd   : > { %s4541_s21 = scalar_lea.hbm %s4815_s9, %s3057_s4 }
  0xbf   : > { %3183 = vmatmul.mubr.msk.f32.gmra.mxu0 %vm646_vm0, %v643_v24 }
  0xc0   : > { %3185 = vmatprep.mubr.msk.f32.mxu0 %vm646_vm0, %v644_v26 }
  0xc3   : > { %3186 = vmatmul.mubr.msk.f32.gmra.mxu0 %vm646_vm0, %v645_v27 }
  0xc4   : > { %3218 = vmatprep.mubr.msk.f32.mxu0 %vm3913_vm2, %v3912_v30 }
 0x177   : > { %v3178_v9 = vpop.f32.mrf.mxu0 }
 0x179   : > { %v737_v10 = vpop.f32.mrf.mxu0 }
 0x17b   : > { %v3181_v11 = vpop.f32.mrf.mxu0 }
 0x17c   : > { %3188 = vmatprep.subr.mxu1 %v3181_v11 }
 0x17d   : > { %v747_v12 = vpop.f32.mrf.mxu0  ;;  %3189 = vmatpush3.msra.mxu1 %v3181_v11 }
 0x17e   : > { %3190 = vmatprep.subr.mxu1 %v747_v12 }
 0x17f   : > { %3191 = vmatpush3.msra.mxu1 %v747_v12  ;;  %v3184_v31 = vpop.f32.mrf.mxu0 }
 0x180   : > { %3192 = vmatprep.subr.mxu1 %v3178_v9 }
 0x181   : > { %3193 = vmatpush3.msra.mxu1 %v3178_v9  ;;  %v757_v32 = vpop.f32.mrf.mxu0 }
 0x182   : > { %3194 = vmatprep.subr.mxu1 %v737_v10 }
 0x183   : > { %3195 = vmatpush3.msra.mxu1 %v737_v10  ;;  %v3187_v34 = vpop.f32.mrf.mxu0 }
 0x184   : > { %3197 = vmatmul.mubr.msk.f32.vlgmr.msra.gmra.mxu1 %vm646_vm0, %v4278_v13 }
 0x185   : > { %3199 = vmatprep.mubr.msk.f32.mxu1 %vm646_vm0, %v4280_v14  ;;  %v767_v37 = vpop.f32.mrf.mxu0 }
 0x188   : > { %3200 = vmatmul.mubr.msk.f32.gmra.mxu1 %vm646_vm0, %v4286_v15 }
 0x189   : > { %3206 = vmatprep.mubr.msk.f32.mxu1 %vm877_vm1, %v4290_v16 }
 0x244   : > { %v3198_v18 = vpop.f32.mrf.mxu1 }
 0x245   : > { %874 = vst.msk [vmem:[%s4297_s16 + $0x8] sm:$0xff] %vm646_vm0, %v3198_v18  ;;  %3202 = vmatprep.subr.mxu1 %v3198_v18 }
 0x246   : > { %v854_v19 = vpop.f32.mrf.mxu1  ;;  %3203 = vmatpush3.msra.mxu1 %v3198_v18 }
 0x247   : > { %873 = vst.msk [vmem:[%s4297_s16] sm:$0xff] %vm646_vm0, %v854_v19  ;;  %3204 = vmatprep.subr.mxu1 %v854_v19 }
 0x248   : > { %3205 = vmatpush3.msra.mxu1 %v854_v19  ;;  %v3201_v21 = vpop.f32.mrf.mxu1 }
 0x249   : > { %3207 = vmatmul.mubr.msk.f32.vlgmr.msra.gmra.mxu1 %vm877_vm1, %v4301_v20  ;;  %876 = vst.msk [vmem:[%s4297_s16 + $0x18] sm:$0xff] %vm646_vm0, %v3201_v21  ;;  %3209 = vmatprep.subr.mxu1 %v4311_v23 }
 0x24a   : > { %v864_v22 = vpop.f32.mrf.mxu1  ;;  %3210 = vmatpush3.msra.mxu1 %v4311_v23 }
 0x24b   : > { %875 = vst.msk [vmem:[%s4297_s16 + $0x10] sm:$0xff] %vm646_vm0, %v864_v22  ;;  %3211 = vmatprep.subr.mxu1 %v4317_v25 }
 0x24c   : > { %3212 = vmatpush3.msra.mxu1 %v4317_v25 }
 0x24d   : > { %3221 = vmatprep.subr.mxu1 %v3912_v30 }
 0x309   : > { %v3208_v28 = vpop.f32.mrf.mxu1 }
 0x30b   : > { %v950_v29 = vpop.f32.mrf.mxu1 }
 0x30c   : > { %3213 = vmatprep.mubr.msk.f32.mxu1 %vm877_vm1, %v950_v29 }
 0x30d   : > { %3214 = vmatmul.mubr.msk.f32.vlgmr.msra.gmra.mxu1 %vm877_vm1, %v3208_v28 }
 0x30e   : > { %3223 = vmatprep.mubr.msk.f32.mxu1 %vm3913_vm2, %v3912_v30  ;;  %3222 = vmatpush3.msra.mxu1 %v4360_v38 }
 0x3cd   : > { %v3215_v33 = vpop.f32.mrf.mxu1 }
 0x3ce   : > { %1041 = vst.msk [vmem:[%s4336_s22 + $0x8] sm:$0xff] %vm877_vm1, %v3215_v33 }
 0x3cf   : > { %v1031_v36 = vpop.f32.mrf.mxu1 }
 0x3d0   : > { %1040 = vst.msk [vmem:[%s4336_s22] sm:$0xff] %vm877_vm1, %v1031_v36  ;;  %3217 = vmatpush3.msra.mxu0 %v1031_v36 }
 0x3d1   : > { %3219 = vmatmul.mubr.msk.f32.vlgmr.msra.gmra.mxu0 %vm1042_vm3, %v4343_v35  ;;  %3226 = vmatprep.subr.mxu0 %v3187_v34 }
 0x3d2   : > { %3227 = vmatpush3.msra.mxu0 %v3187_v34  ;;  %3234 = vmatprep.mubr.msk.f32.mxu0 %vm646_vm0, %v4274_v8 }
 0x3d3   : > { %3228 = vmatprep.subr.mxu0 %v767_v37 }
 0x3d4   : > { %3229 = vmatpush3.msra.mxu0 %v767_v37 }
 0x3d5   : > { %3230 = vmatprep.subr.mxu0 %v3184_v31 }
 0x3d6   : > { %3231 = vmatpush3.msra.mxu0 %v3184_v31 }
 0x3d7   : > { %3232 = vmatprep.subr.mxu0 %v757_v32 }
 0x3d8   : > { %3233 = vmatpush3.msra.mxu0 %v757_v32 }
 0x3d9   : > { %3235 = vmatmul.mubr.msk.f32.vlgmr.msra.gmra.mxu0 %vm646_vm0, %v4278_v13  ;;  %3259 = vmatprep.subr.mxu0 %v3912_v30 }
 0x3da   : > { %3237 = vmatprep.mubr.msk.f32.mxu0 %vm646_vm0, %v4280_v14  ;;  %3260 = vmatpush3.msra.mxu0 %v4360_v38 }
 0x3dd   : > { %3238 = vmatmul.mubr.msk.f32.gmra.mxu0 %vm646_vm0, %v4286_v15 }
 0x3de   : > { %3261 = vmatprep.mubr.msk.f32.mxu0 %vm3913_vm2, %v3912_v30 }
 0x491   : > { %v1112_v39 = vpop.f32.mrf.mxu0 }
 0x492   : > { %3224 = vmatmul.mubr.msk.f32.vlgmr.msra.gmra.mxu1 %vm1042_vm3, %v1112_v39 }
 0x493   : > { %v3220_v40 = vpop.f32.mrf.mxu0  ;;  %3244 = vmatprep.mubr.msk.f32.mxu1 %vm877_vm1, %v4290_v16 }
 0x499   : > { %v3236_v41 = vpop.f32.mrf.mxu0 }
 0x49a   : > { %2979 = vst.msk [vmem:[%s4297_s16 + $0x28] sm:$0xff] %vm646_vm0, %v3236_v41  ;;  %3240 = vmatprep.subr.mxu1 %v3236_v41 }
 0x49b   : > { %v1256_v42 = vpop.f32.mrf.mxu0  ;;  %3241 = vmatpush3.msra.mxu1 %v3236_v41 }
 0x49c   : > { %2978 = vst.msk [vmem:[%s4297_s16 + $0x20] sm:$0xff] %vm646_vm0, %v1256_v42  ;;  %3242 = vmatprep.subr.mxu1 %v1256_v42 }
 0x49d   : > { %3243 = vmatpush3.msra.mxu1 %v1256_v42  ;;  %v3239_v53 = vpop.f32.mrf.mxu0 }
 0x49e   : > { %3245 = vmatmul.mubr.msk.f32.vlgmr.msra.gmra.mxu1 %vm877_vm1, %v4301_v20  ;;  %3247 = vmatprep.subr.mxu1 %v4311_v23  ;;  %2981 = vst.msk [vmem:[%s4297_s16 + $0x38] sm:$0xff] %vm646_vm0, %v3239_v53 }
 0x49f   : > { %3248 = vmatpush3.msra.mxu1 %v4311_v23  ;;  %v1266_v54 = vpop.f32.mrf.mxu0 }
 0x4a0   : > { %3249 = vmatprep.subr.mxu1 %v4317_v25  ;;  %2980 = vst.msk [vmem:[%s4297_s16 + $0x30] sm:$0xff] %vm646_vm0, %v1266_v54 }
 0x4a1   : > { %3250 = vmatpush3.msra.mxu1 %v4317_v25 }
 0x4a2   : > { %3254 = vmatprep.subr.mxu1 %v3912_v30 }
 0x552   : > { %v1185_v43 = vpop.f32.mrf.mxu1 }
 0x553   : > { %1189 = vst.msk [vmem:[%s4381_s7] sm:$0xff] %vm1042_vm3, %v1185_v43 }
 0x554   : > { %v3225_v44 = vpop.f32.mrf.mxu1 }
 0x55e   : > { %v3246_v45 = vpop.f32.mrf.mxu1 }
 0x560   : > { %v1346_v46 = vpop.f32.mrf.mxu1 }
 0x561   : > { %3251 = vmatprep.mubr.msk.f32.mxu1 %vm877_vm1, %v1346_v46 }
 0x562   : > { %3252 = vmatmul.mubr.msk.f32.vlgmr.msra.gmra.mxu1 %vm877_vm1, %v3246_v45 }
 0x563   : > { %3256 = vmatprep.mubr.msk.f32.mxu1 %vm3913_vm2, %v3912_v30 }
 0x622   : > { %v3253_v47 = vpop.f32.mrf.mxu1 }
 0x623   : > { %2987 = vst.msk [vmem:[%s4336_s22 + $0x18] sm:$0xff] %vm877_vm1, %v3253_v47 }
 0x624   : > { %v1427_v48 = vpop.f32.mrf.mxu1 }
 0x625   : > { %2986 = vst.msk [vmem:[%s4336_s22 + $0x10] sm:$0xff] %vm877_vm1, %v1427_v48  ;;  %3255 = vmatpush3.msra.mxu1 %v1427_v48  ;;  %s2512_s22 = scalar_lea.sflag [#allocation16], %s4228_s15 }
 0x626   : > { %3257 = vmatmul.mubr.msk.f32.vlgmr.msra.gmra.mxu1 %vm1042_vm3, %v4343_v35  ;;  %3264 = vmatprep.subr.mxu1 %v4250_v0 }
 0x627   : > { %3265 = vmatpush3.msra.mxu1 %v4250_v0  ;;  %3272 = vmatprep.mubr.msk.f32.mxu1 %vm646_vm0, %v1584_v49 }
 0x628   : > { %3266 = vmatprep.subr.mxu1 %v4252_v1 }
 0x629   : > { %3267 = vmatpush3.msra.mxu1 %v4252_v1 }
 0x62a   : > { %3268 = vmatprep.subr.mxu1 %v4257_v3 }
 0x62b   : > { %3269 = vmatpush3.msra.mxu1 %v4257_v3  ;;  %v1588_v3 = vld [vmem:[%s4232_s25 + $0x20] sm:$0xff] }
 0x62c   : > { %3270 = vmatprep.subr.mxu1 %v4262_v4 }
 0x62d   : > { %3271 = vmatpush3.msra.mxu1 %v4262_v4  ;;  %v1589_v4 = vld [vmem:[%s4232_s25 + $0x28] sm:$0xff] }
 0x62e   : > { %3273 = vmatmul.mubr.msk.f32.vlgmr.msra.gmra.mxu1 %vm646_vm0, %v1585_v50  ;;  %3312 = vmatprep.subr.mxu1 %v3912_v30 }
 0x62f   : > { %3275 = vmatprep.mubr.msk.f32.mxu1 %vm646_vm0, %v1586_v51 }
 0x632   : > { %3276 = vmatmul.mubr.msk.f32.gmra.mxu1 %vm646_vm0, %v1587_v52 }
 0x633   : > { %3278 = vmatprep.mubr.msk.f32.mxu1 %vm646_vm0, %v1588_v3 }
 0x636   : > { %3279 = vmatmul.mubr.msk.f32.gmra.mxu1 %vm646_vm0, %v1589_v4 }
 0x637   : > { %3281 = vmatprep.mubr.msk.f32.mxu1 %vm646_vm0, %v1590_v5 }
 0x63a   : > { %3282 = vmatmul.mubr.msk.f32.gmra.mxu1 %vm646_vm0, %v1591_v6 }
 0x63b   : > { %3314 = vmatprep.mubr.msk.f32.mxu1 %vm3913_vm2, %v3912_v30 }
 0x6e6   : > { %v1505_v55 = vpop.f32.mrf.mxu1 }
 0x6e7   : > { %3262 = vmatmul.mubr.msk.f32.vlgmr.msra.gmra.mxu0 %vm1042_vm3, %v1505_v55 }
 0x6e8   : > { %v3258_v56 = vpop.f32.mrf.mxu1  ;;  %3292 = vmatprep.mubr.msk.f32.mxu0 %vm646_vm0, %v4274_v8 }
 0x6ee   : > { %v3274_v57 = vpop.f32.mrf.mxu1 }
 0x6f0   : > { %v1682_v58 = vpop.f32.mrf.mxu1 }
 0x6f2   : > { %v3277_v59 = vpop.f32.mrf.mxu1 }
 0x6f3   : > { %3284 = vmatprep.subr.mxu0 %v3277_v59 }
 0x6f4   : > { %v1692_v60 = vpop.f32.mrf.mxu1  ;;  %3285 = vmatpush3.msra.mxu0 %v3277_v59 }
 0x6f5   : > { %3286 = vmatprep.subr.mxu0 %v1692_v60 }
 0x6f6   : > { %3287 = vmatpush3.msra.mxu0 %v1692_v60  ;;  %v3280_v10 = vpop.f32.mrf.mxu1 }
 0x6f7   : > { %3288 = vmatprep.subr.mxu0 %v3274_v57 }
 0x6f8   : > { %3289 = vmatpush3.msra.mxu0 %v3274_v57  ;;  %v1702_v11 = vpop.f32.mrf.mxu1 }
 0x6f9   : > { %3290 = vmatprep.subr.mxu0 %v1682_v58 }
 0x6fa   : > { %3291 = vmatpush3.msra.mxu0 %v1682_v58  ;;  %v3283_v17 = vpop.f32.mrf.mxu1 }
 0x6fb   : > { %3293 = vmatmul.mubr.msk.f32.vlgmr.msra.gmra.mxu0 %vm646_vm0, %v4278_v13 }
 0x6fc   : > { %3295 = vmatprep.mubr.msk.f32.mxu0 %vm646_vm0, %v4280_v14  ;;  %v1712_v19 = vpop.f32.mrf.mxu1 }
 0x6ff   : > { %3296 = vmatmul.mubr.msk.f32.gmra.mxu0 %vm646_vm0, %v4286_v15 }
 0x700   : > { %3302 = vmatprep.mubr.msk.f32.mxu0 %vm877_vm1, %v4290_v16 }
 0x7a7   : > { %v1578_v61 = vpop.f32.mrf.mxu0 }
 0x7a8   : > { %2990 = vst.msk [vmem:[%s4381_s7 + $0x8] sm:$0xff] %vm1042_vm3, %v1578_v61  ;;  %s3685_s7 = scalar_lea.vmem %s3684_s5, 1024 }
 0x7a9   : > { %v3263_v62 = vpop.f32.mrf.mxu0  ;;  %p3687_p4 = scmp.lt.s32.totalorder %s3685_s7, %s3679_s30 }
 0x7ab   : > { %p3688_p6 = por %p3687_p4, %p3686_p1 }
 0x7ad   : > { %p3689_p8 = pnand %p3688_p6, %p3682_p11 }
 0x7bb   : > { %v3294_v63 = vpop.f32.mrf.mxu0 }
 0x7bc   : > { %1807 = vst.msk [vmem:[%s4430_s27 + $0x8] sm:$0xff] %vm646_vm0, %v3294_v63  ;;  %3298 = vmatprep.subr.mxu0 %v3294_v63 }
 0x7bd   : > { %v1787_v0 = vpop.f32.mrf.mxu0  ;;  %3299 = vmatpush3.msra.mxu0 %v3294_v63 }
 0x7be   : > { %1806 = vst.msk [vmem:[%s4430_s27] sm:$0xff] %vm646_vm0, %v1787_v0  ;;  %3300 = vmatprep.subr.mxu0 %v1787_v0 }
 0x7bf   : > { %3301 = vmatpush3.msra.mxu0 %v1787_v0  ;;  %v3297_v1 = vpop.f32.mrf.mxu0 }
 0x7c0   : > { %3303 = vmatmul.mubr.msk.f32.vlgmr.msra.gmra.mxu0 %vm877_vm1, %v4301_v20  ;;  %1809 = vst.msk [vmem:[%s4430_s27 + $0x18] sm:$0xff] %vm646_vm0, %v3297_v1  ;;  %3305 = vmatprep.subr.mxu0 %v4311_v23 }
 0x7c1   : > { %v1797_v2 = vpop.f32.mrf.mxu0  ;;  %3306 = vmatpush3.msra.mxu0 %v4311_v23 }
 0x7c2   : > { %1808 = vst.msk [vmem:[%s4430_s27 + $0x10] sm:$0xff] %vm646_vm0, %v1797_v2  ;;  %3307 = vmatprep.subr.mxu0 %v4317_v25 }
 0x7c3   : > { %3308 = vmatpush3.msra.mxu0 %v4317_v25 }
 0x7c4   : > { %3317 = vmatprep.subr.mxu0 %v3912_v30 }
 0x880   : > { %v3304_v7 = vpop.f32.mrf.mxu0 }
 0x882   : > { %v1876_v9 = vpop.f32.mrf.mxu0 }
 0x883   : > { %3309 = vmatprep.mubr.msk.f32.mxu0 %vm877_vm1, %v1876_v9 }
 0x884   : > { %3310 = vmatmul.mubr.msk.f32.vlgmr.msra.gmra.mxu0 %vm877_vm1, %v3304_v7 }
 0x885   : > { %3318 = vmatpush3.msra.mxu0 %v4360_v38  ;;  %3319 = vmatprep.mubr.msk.f32.mxu0 %vm3913_vm2, %v3912_v30 }
 0x944   : > { %v3311_v12 = vpop.f32.mrf.mxu0 }
 0x945   : > { %1967 = vst.msk [vmem:[%s4464_s19 + $0x8] sm:$0xff] %vm877_vm1, %v3311_v12 }
 0x946   : > { %v1957_v18 = vpop.f32.mrf.mxu0 }
 0x947   : > { %1966 = vst.msk [vmem:[%s4464_s19] sm:$0xff] %vm877_vm1, %v1957_v18  ;;  %3313 = vmatpush3.msra.mxu1 %v1957_v18 }
 0x948   : > { %3322 = vmatprep.subr.mxu1 %v3283_v17  ;;  %3315 = vmatmul.mubr.msk.f32.vlgmr.msra.gmra.mxu1 %vm1042_vm3, %v4343_v35 }
 0x949   : > { %3323 = vmatpush3.msra.mxu1 %v3283_v17  ;;  %3330 = vmatprep.mubr.msk.f32.mxu1 %vm646_vm0, %v4274_v8 }
 0x94a   : > { %3324 = vmatprep.subr.mxu1 %v1712_v19 }
 0x94b   : > { %3325 = vmatpush3.msra.mxu1 %v1712_v19 }
 0x94c   : > { %3326 = vmatprep.subr.mxu1 %v3280_v10 }
 0x94d   : > { %3327 = vmatpush3.msra.mxu1 %v3280_v10 }
 0x94e   : > { %3328 = vmatprep.subr.mxu1 %v1702_v11 }
 0x94f   : > { %3329 = vmatpush3.msra.mxu1 %v1702_v11 }
 0x950   : > { %3331 = vmatmul.mubr.msk.f32.vlgmr.msra.gmra.mxu1 %vm646_vm0, %v4278_v13  ;;  %3355 = vmatprep.subr.mxu1 %v3912_v30 }
 0x951   : > { %3356 = vmatpush3.msra.mxu1 %v4360_v38  ;;  %3333 = vmatprep.mubr.msk.f32.mxu1 %vm646_vm0, %v4280_v14 }
 0x954   : > { %3334 = vmatmul.mubr.msk.f32.gmra.mxu1 %vm646_vm0, %v4286_v15 }
 0x955   : > { %3357 = vmatprep.mubr.msk.f32.mxu1 %vm3913_vm2, %v3912_v30 }
 0xa08   : > { %v2034_v8 = vpop.f32.mrf.mxu1 }
 0xa09   : > { %3320 = vmatmul.mubr.msk.f32.vlgmr.msra.gmra.mxu0 %vm1042_vm3, %v2034_v8 }
 0xa0a   : > { %v3316_v21 = vpop.f32.mrf.mxu1  ;;  %3340 = vmatprep.mubr.msk.f32.mxu0 %vm877_vm1, %v4290_v16 }
 0xa10   : > { %v3332_v13 = vpop.f32.mrf.mxu1 }
 0xa11   : > { %3014 = vst.msk [vmem:[%s4430_s27 + $0x28] sm:$0xff] %vm646_vm0, %v3332_v13  ;;  %3336 = vmatprep.subr.mxu0 %v3332_v13 }
 0xa12   : > { %v2178_v22 = vpop.f32.mrf.mxu1  ;;  %3337 = vmatpush3.msra.mxu0 %v3332_v13 }
 0xa13   : > { %3013 = vst.msk [vmem:[%s4430_s27 + $0x20] sm:$0xff] %vm646_vm0, %v2178_v22  ;;  %3338 = vmatprep.subr.mxu0 %v2178_v22 }
 0xa14   : > { %3339 = vmatpush3.msra.mxu0 %v2178_v22 }
 0xa15   : > { %3341 = vmatmul.mubr.msk.f32.vlgmr.msra.gmra.mxu0 %vm877_vm1, %v4301_v20  ;;  %3343 = vmatprep.subr.mxu0 %v4311_v23 }
 0xa16   : > { %3344 = vmatpush3.msra.mxu0 %v4311_v23 }
 0xa17   : > { %3345 = vmatprep.subr.mxu0 %v4317_v25 }
 0xa18   : > { %3346 = vmatpush3.msra.mxu0 %v4317_v25  ;;  %v3335_v25 = vpop.f32.mrf.mxu1 }
 0xa19   : > { %3350 = vmatprep.subr.mxu0 %v3912_v30  ;;  %3016 = vst.msk [vmem:[%s4430_s27 + $0x38] sm:$0xff] %vm646_vm0, %v3335_v25 }
 0xa1a   : > { %v2188_v26 = vpop.f32.mrf.mxu1 }
 0xa1b   : > { %3015 = vst.msk [vmem:[%s4430_s27 + $0x30] sm:$0xff] %vm646_vm0, %v2188_v26 }
 0xac9   : > { %v2107_v14 = vpop.f32.mrf.mxu0 }
 0xaca   : > { %2111 = vst.msk [vmem:[%s4500_s24] sm:$0xff] %vm1042_vm3, %v2107_v14 }
 0xacb   : > { %v3321_v15 = vpop.f32.mrf.mxu0 }
 0xad5   : > { %v3342_v16 = vpop.f32.mrf.mxu0 }
 0xad7   : > { %v2268_v20 = vpop.f32.mrf.mxu0 }
 0xad8   : > { %3347 = vmatprep.mubr.msk.f32.mxu0 %vm877_vm1, %v2268_v20 }
 0xad9   : > { %3348 = vmatmul.mubr.msk.f32.vlgmr.msra.gmra.mxu0 %vm877_vm1, %v3342_v16 }
 0xada   : > { %3352 = vmatprep.mubr.msk.f32.mxu0 %vm3913_vm2, %v3912_v30 }
 0xb99   : > { %v3349_v23 = vpop.f32.mrf.mxu0 }
 0xb9a   : > { %3022 = vst.msk [vmem:[%s4464_s19 + $0x18] sm:$0xff] %vm877_vm1, %v3349_v23 }
 0xb9b   : > { %v2349_v24 = vpop.f32.mrf.mxu0 }
 0xb9c   : > { %3021 = vst.msk [vmem:[%s4464_s19 + $0x10] sm:$0xff] %vm877_vm1, %v2349_v24  ;;  %3351 = vmatpush3.msra.mxu0 %v2349_v24 }
 0xb9d   : > { %3353 = vmatmul.mubr.msk.f32.vlgmr.msra.gmra.mxu0 %vm1042_vm3, %v4343_v35 }
 0xc5d   : > { %v2427_v27 = vpop.f32.mrf.mxu0 }
 0xc5e   : > { %3358 = vmatmul.mubr.msk.f32.vlgmr.msra.gmra.mxu1 %vm1042_vm3, %v2427_v27 }
 0xc5f   : > { %v3354_v28 = vpop.f32.mrf.mxu0 }
 0xc60   : > { %3692 = shalt.err (!%p3689_p8)
}
 0xc61   : > { %s3693_s27 = scalar_lea.hbm %s4541_s21, 512  ;;  %s3697_s16 = scalar_lea.hbm %s4815_s9, 1024 }
 0xc62   : > { %p3694_p3 = scmp.ne.s32.totalorder %s4541_s21, %s3693_s27  ;;  %p3698_p2 = scmp.lt.s32.totalorder %s4541_s21, %s4815_s9 }
 0xc63   : > { %p3699_p10 = scmp.lt.s32.totalorder %s3697_s16, %s3693_s27 }
 0xc64   : > { %p3695_p7 = pnand %p3694_p3, %p4816_p5 }
 0xc65   : > { %p3700_p0 = por %p3699_p10, %p3698_p2 }
 0xc66   : > { %p3696_p12 = pneg %p3695_p7 }
 0xc68   : > { %p3701_p13 = pnand %p3700_p0, %p3696_p12 }
 0xc6a   : > { %3704 = shalt.err (!%p3701_p13)
}
 0xc6b   : > { %s3915_s30 = smov 128   ;;  %s3916_s5 = smov 8  }
 0xc6c   : > { %3385 = dma.vmem_to_hbm [thread:$0]  (%p4816_p5), %s4526_s29, 512, %s4541_s21, %s2512_s22, %s3915_s30, %s3915_s30, %s3916_s5  }
 0xc6d   : > { %s4574_s27 = scalar_lea.hbm %s4760_s12, %s3057_s4  ;;  %s4817_s19 = sshll.u32 %s4013_s14, 10 }
 0xc6e   : > { %s4581_s3 = scalar_lea.hbm %s4759_s11, %s4817_s19  ;;  %s2522_s1 = scalar_lea.sflag [#allocation19], %s4228_s15 }
 0xc6f   : > { %s3705_s6 = scalar_lea.vmem %s4530_s13, 1024  ;;  %s3917_s9 = smov [#allocation18]  }
 0xc70   : > { %p3706_p9 = scmp.ne.s32.totalorder %s4530_s13, %s3705_s6  ;;  %s3709_s29 = sshll.u32 %s3917_s9, 4  ;;  %s3710_s29 = int_to_ptr.vmem [resolvable:$false] %s3709_s29 }
 0xc71   : > { %s3711_s21 = scalar_lea.vmem %s3710_s29, 2048  ;;  %p3712_p4 = scmp.lt.s32.totalorder %s4530_s13, %s3710_s29 }
 0xc72   : > { %p3707_p11 = pnand %p3706_p9, %p4816_p5  ;;  %p3713_p6 = scmp.lt.s32.totalorder %s3711_s21, %s3705_s6 }
 0xc74   : > { %p3708_p1 = pneg %p3707_p11  ;;  %p3714_p8 = por %p3713_p6, %p3712_p4 }
 0xc76   : > { %p3715_p3 = pnand %p3714_p8, %p3708_p1 }
 0xc78   : > { %3718 = shalt.err (!%p3715_p3)
}
 0xc79   : > { %s3719_s4 = scalar_lea.hbm %s4581_s3, 1024  ;;  %s3723_s9 = scalar_lea.hbm %s4759_s11, 2048 }
 0xc7a   : > { %p3720_p7 = scmp.ne.s32.totalorder %s4581_s3, %s3719_s4  ;;  %p3724_p10 = scmp.lt.s32.totalorder %s4581_s3, %s4759_s11 }
 0xc7b   : > { %p3725_p0 = scmp.lt.s32.totalorder %s3723_s9, %s3719_s4 }
 0xc7c   : > { %p3721_p12 = pnand %p3720_p7, %p4816_p5 }
 0xc7d   : > { %p3726_p13 = por %p3725_p0, %p3724_p10 }
 0xc7e   : > { %p3722_p2 = pneg %p3721_p12 }
 0xc80   : > { %p3727_p9 = pnand %p3726_p13, %p3722_p2 }
 0xc82   : > { %3730 = shalt.err (!%p3727_p9)
}
 0xc83   : > { %3387 = dma.vmem_to_hbm [thread:$0]  (%p4816_p5), %s4530_s13, 1024, %s4581_s3, %s2522_s1, %s3915_s30, %s3915_s30, %s3916_s5  }
 0xc84   : > { %s4818_s6 = sshll.u32 %s4013_s14, 10  ;;  %s3058_s4 = sshll.u32 %s4013_s14, 8 }
 0xc85   : > { %s4614_s21 = scalar_lea.hbm %s4756_s8, %s4818_s6  ;;  %s2507_s20 = scalar_lea.sflag [#allocation4], %s4214_s0 }
 0xc86   : > { %s3731_s7 = scalar_lea.vmem %s4524_s18, 1024  ;;  %s3918_s9 = smov [#allocation14]  }
 0xc87   : > { %p3732_p11 = scmp.ne.s32.totalorder %s4524_s18, %s3731_s7  ;;  %s3735_s19 = sshll.u32 %s3918_s9, 4  ;;  %s3736_s19 = int_to_ptr.vmem [resolvable:$false] %s3735_s19 }
 0xc88   : > { %s3737_s25 = scalar_lea.vmem %s3736_s19, 2048  ;;  %p3738_p6 = scmp.lt.s32.totalorder %s4524_s18, %s3736_s19 }
 0xc89   : > { %p3733_p1 = pnand %p3732_p11, %p4816_p5  ;;  %p3739_p8 = scmp.lt.s32.totalorder %s3737_s25, %s3731_s7 }
 0xc8b   : > { %p3734_p4 = pneg %p3733_p1  ;;  %p3740_p3 = por %p3739_p8, %p3738_p6 }
 0xc8d   : > { %p3741_p7 = pnand %p3740_p3, %p3734_p4 }
 0xc8f   : > { %3744 = shalt.err (!%p3741_p7)
}
 0xc90   : > { %s3745_s13 = scalar_lea.hbm %s4614_s21, 1024  ;;  %s3749_s16 = scalar_lea.hbm %s4756_s8, 2048 }
 0xc91   : > { %p3746_p12 = scmp.ne.s32.totalorder %s4614_s21, %s3745_s13  ;;  %p3750_p0 = scmp.lt.s32.totalorder %s4614_s21, %s4756_s8 }
 0xc92   : > { %p3751_p13 = scmp.lt.s32.totalorder %s3749_s16, %s3745_s13 }
 0xc93   : > { %p3747_p2 = pnand %p3746_p12, %p4816_p5 }
 0xc94   : > { %p3752_p9 = por %p3751_p13, %p3750_p0 }
 0xc95   : > { %p3748_p10 = pneg %p3747_p2 }
 0xc97   : > { %p3753_p11 = pnand %p3752_p9, %p3748_p10 }
 0xc99   : > { %3756 = shalt.err (!%p3753_p11)
}
 0xc9a   : > { %3384 = dma.vmem_to_hbm [thread:$0]  (%p4816_p5), %s4524_s18, 1024, %s4614_s21, %s2507_s20, %s3915_s30, %s3915_s30, %s3916_s5  }
 0xc9b   : > { %s2578_s25 = scalar_lea.hbm %s4758_s10, %s3058_s4  ;;  %s3757_s13 = scalar_lea.vmem %s4528_s23, 256 }
 0xc9c   : > { %p3758_p1 = scmp.ne.s32.totalorder %s4528_s23, %s3757_s13  ;;  %s3919_s3 = smov [#allocation17]  }
 0xc9d   : > { %s3761_s6 = sshll.u32 %s3919_s3, 4  ;;  %s3762_s6 = int_to_ptr.vmem [resolvable:$false] %s3761_s6 }
 0xc9e   : > { %p3759_p4 = pnand %p3758_p1, %p4816_p5  ;;  %s3763_s16 = scalar_lea.vmem %s3762_s6, 512 }
 0xc9f   : > { %p3764_p8 = scmp.lt.s32.totalorder %s4528_s23, %s3762_s6  ;;  %p3765_p3 = scmp.lt.s32.totalorder %s3763_s16, %s3757_s13 }
 0xca0   : > { %p3760_p6 = pneg %p3759_p4 }
 0xca1   : > { %p3766_p7 = por %p3765_p3, %p3764_p8 }
 0xca3   : > { %p3767_p12 = pnand %p3766_p7, %p3760_p6 }
 0xca5   : > { %3770 = shalt.err (!%p3767_p12)
}
 0xca6   : > { %s3771_s18 = scalar_lea.hbm %s2578_s25, 256  ;;  %s3775_s29 = scalar_lea.hbm %s4758_s10, 512 }
 0xca7   : > { %p3772_p2 = scmp.ne.s32.totalorder %s2578_s25, %s3771_s18  ;;  %p3776_p13 = scmp.lt.s32.totalorder %s2578_s25, %s4758_s10 }
 0xca8   : > { %p3777_p9 = scmp.lt.s32.totalorder %s3775_s29, %s3771_s18 }
 0xca9   : > { %p3773_p10 = pnand %p3772_p2, %p4816_p5 }
 0xcaa   : > { %p3778_p11 = por %p3777_p9, %p3776_p13 }
 0xcab   : > { %p3774_p0 = pneg %p3773_p10 }
 0xcad   : > { %p3779_p1 = pnand %p3778_p11, %p3774_p0 }
 0xcaf   : > { %3782 = shalt.err (!%p3779_p1)
}
 0xcb0   : > { %3386 = dma.vmem_to_hbm [thread:$0]  (%p4816_p5), %s4528_s23, 256, %s2578_s25, %s2512_s22, %s3915_s30, %s3915_s30, %s3916_s5  }
 0xcb1   : > { %s3783_s19 = scalar_lea.vmem %s4532_s17, 512  ;;  %s3920_s13 = smov [#allocation20]  }
 0xcb2   : > { %p3784_p4 = scmp.ne.s32.totalorder %s4532_s17, %s3783_s19  ;;  %s3787_s3 = sshll.u32 %s3920_s13, 4  ;;  %s3788_s3 = int_to_ptr.vmem [resolvable:$false] %s3787_s3 }
 0xcb3   : > { %s3789_s6 = scalar_lea.vmem %s3788_s3, 1024  ;;  %p3790_p3 = scmp.lt.s32.totalorder %s4532_s17, %s3788_s3 }
 0xcb4   : > { %p3785_p6 = pnand %p3784_p4, %p4816_p5  ;;  %p3791_p7 = scmp.lt.s32.totalorder %s3789_s6, %s3783_s19 }
 0xcb6   : > { %p3786_p8 = pneg %p3785_p6  ;;  %p3792_p12 = por %p3791_p7, %p3790_p3 }
 0xcb8   : > { %p3793_p2 = pnand %p3792_p12, %p3786_p8 }
 0xcba   : > { %3796 = shalt.err (!%p3793_p2)
}
 0xcbb   : > { %s3797_s16 = scalar_lea.hbm %s4574_s27, 512  ;;  %s3801_s25 = scalar_lea.hbm %s4760_s12, 1024 }
 0xcbc   : > { %p3798_p10 = scmp.ne.s32.totalorder %s4574_s27, %s3797_s16  ;;  %p3802_p9 = scmp.lt.s32.totalorder %s4574_s27, %s4760_s12 }
 0xcbd   : > { %p3803_p11 = scmp.lt.s32.totalorder %s3801_s25, %s3797_s16 }
 0xcbe   : > { %p3799_p0 = pnand %p3798_p10, %p4816_p5 }
 0xcbf   : > { %p3804_p1 = por %p3803_p11, %p3802_p9 }
 0xcc0   : > { %p3800_p13 = pneg %p3799_p0 }
 0xcc2   : > { %p3805_p4 = pnand %p3804_p1, %p3800_p13 }
 0xcc4   : > { %3808 = shalt.err (!%p3805_p4)
}
 0xcc5   : > { %3388 = dma.vmem_to_hbm [thread:$0]  (%p4816_p5), %s4532_s17, 512, %s4574_s27, %s2522_s1, %s3915_s30, %s3915_s30, %s3916_s5  }
 0xcc6   : > { %s2629_s20 = sshll.u32 %s4500_s24, 4  ;;  %s4819_s7 = sld [smem:[#allocation46_spill]]  ;;  %s4693_s20 = int_to_ptr.vmem [resolvable:$true] %s2629_s20 }
 0xcc7   : > { %s2532_s15 = scalar_lea.sflag [#allocation22], %s4214_s0  ;;  %s3809_s13 = scalar_lea.vmem %s4693_s20, 256 }
 0xcc8   : > { %p3810_p6 = scmp.ne.s32.totalorder %s4693_s20, %s3809_s13  ;;  %s3921_s1 = smov [#allocation21]  }
 0xcc9   : > { %s3813_s14 = sshll.u32 %s3921_s1, 4  ;;  %s3814_s14 = int_to_ptr.vmem [resolvable:$false] %s3813_s14 }
 0xcca   : > { %p3811_p8 = pnand %p3810_p6, %p4816_p5  ;;  %s3815_s17 = scalar_lea.vmem %s3814_s14, 512 }
 0xccb   : > { %p3816_p7 = scmp.lt.s32.totalorder %s4693_s20, %s3814_s14  ;;  %p3817_p12 = scmp.lt.s32.totalorder %s3815_s17, %s3809_s13 }
 0xccc   : > { %s4700_s19 = scalar_lea.hbm %s4819_s7, %s3058_s4  ;;  %p3812_p3 = pneg %p3811_p8 }
 0xccd   : > { %p3818_p2 = por %p3817_p12, %p3816_p7 }
 0xccf   : > { %p3819_p10 = pnand %p3818_p2, %p3812_p3 }
 0xd1e   : > { %v2500_v29 = vpop.f32.mrf.mxu1 }
 0xd1f   : > { %3025 = vst.msk [vmem:[%s4500_s24 + $0x8] sm:$0xff] %vm1042_vm3, %v2500_v29 }
 0xd20   : > { %v3359_v30 = vpop.f32.mrf.mxu1 }
 0xd21   : > { %3822 = shalt.err (!%p3819_p10)
}
 0xd22   : > { %s3823_s24 = scalar_lea.hbm %s4700_s19, 256  ;;  %s3827_s4 = scalar_lea.hbm %s4819_s7, 512 }
 0xd23   : > { %p3824_p0 = scmp.ne.s32.totalorder %s4700_s19, %s3823_s24  ;;  %p3828_p11 = scmp.lt.s32.totalorder %s4700_s19, %s4819_s7 }
 0xd24   : > { %p3829_p1 = scmp.lt.s32.totalorder %s3827_s4, %s3823_s24 }
 0xd25   : > { %p3825_p13 = pnand %p3824_p0, %p4816_p5 }
 0xd26   : > { %p3830_p4 = por %p3829_p1, %p3828_p11 }
 0xd27   : > { %p3826_p9 = pneg %p3825_p13 }
 0xd29   : > { %p3831_p6 = pnand %p3830_p4, %p3826_p9 }
 0xd2b   : > { %3834 = shalt.err (!%p3831_p6)
}
 0xd2c   : > { %3389 = dma.vmem_to_hbm [thread:$0]  (%p4816_p5), %s4693_s20, 256, %s4700_s19, %s2532_s15, %s3915_s30, %s3915_s30, %s3916_s5  }
 0xd2d PF: > { %s4820_s16 = sld [smem:[#allocation32_spill]]  ;;  %p4823_p3 = scmp.ge.s32.totalorder %s3901_s28, 2 }
 0xd2e   : > { %s4821_s23 = sld [smem:[#allocation36_spill]] }
 0xd33   : > { %s2644_s22 = sand.u32 1, %s4820_s16  }
 0xd34   : > { %p4822_p8 = scmp.ne.s32.totalorder %s4821_s23, 0  ;;  %s2645_s25 = scalar_lea.sflag [#allocation4], %s2644_s22 }
 0xd36   : > { %p3420_p7 = pnand %p4823_p3, %p4822_p8 }
 0xd38   : > { %p3421_p12 = pneg %p3420_p7 }
 0xd3a   : > { %3872 = dma.done.wait (%p3421_p12), %s2645_s25, 1024  }
 0xd3b   : > { %3874 = vsyncadd (%p3421_p12), %s2645_s25, 4294966272  ;;  %s4824_s2 = sadd.s32 4294967294, %s3901_s28  }
 0xd3c   : > { %s2653_s18 = sand.u32 1, %s4824_s2  }
 0xd3d   : > { %s2654_s21 = scalar_lea.sflag [#allocation16], %s2653_s18 }
 0xd3e   : > { %3876 = dma.done.wait (%p3421_p12), %s2654_s21, 768  }
 0xd3f   : > { %3878 = vsyncadd (%p3421_p12), %s2654_s21, 4294966528  ;;  %s2672_s29 = scalar_lea.sflag [#allocation19], %s2653_s18 }
 0xd40   : > { %3880 = dma.done.wait (%p3421_p12), %s2672_s29, 1536  }
 0xd41   : > { %3882 = vsyncadd (%p3421_p12), %s2672_s29, 4294965760  ;;  %s2690_s30 = scalar_lea.sflag [#allocation22], %s2644_s22 }
 0xd42   : > { %3884 = dma.done.wait (%p3421_p12), %s2690_s30, 256  }
 0xd43   : > { %3886 = vsyncadd (%p3421_p12), %s2690_s30, 4294967040  ;;  %s4825_s28 = sld [smem:[#allocation34_spill]]  ;;  %s4828_s25 = smov %s3893_s26 }
 0xd44   : > { %s4826_s5 = sld [smem:[#allocation33_spill]] }
 0xd45   : > { %s4827_s27 = sld [smem:[#allocation35_spill]] }
 0xd49   : > { %p41_p5 = scmp.ge.s32.totalorder %s4825_s28, 4  }
 0xd4a   : > { %s4829_s26 = smov %s4826_s5 }
 0xd4b   :  { %43 = sbr.rel (!%p41_p5) target bundleno = 26 (0x1a), region = 217 }
 0xd50   :  { %2695 = vsyncpa [#allocation3], 1 }
 0xd51   :  { %2697 = vsyncpa [#allocation3 + $0x1], 1 }
 0xd52   :  { %2698 = vsyncpa [#allocation6], 1 }
 0xd53   :  { %2700 = vsyncpa [#allocation6 + $0x1], 1 }
 0xd54   :  { %2701 = vsyncpa [#allocation9], 1 }
 0xd55   :  { %2702 = vsyncpa [#allocation12], 1 }
 0xd56   :  { %2703 = vsyncpa [#allocation4], 1 }
 0xd57   :  { %2705 = vsyncpa [#allocation4 + $0x1], 1 }
 0xd58   :  { %2706 = vsyncpa [#allocation16], 1 }
 0xd59   :  { %2708 = vsyncpa [#allocation16 + $0x1], 1 }
 0xd5a   :  { %2709 = vsyncpa [#allocation19], 1 }
 0xd5b   :  { %2711 = vsyncpa [#allocation19 + $0x1], 1 }
 0xd5c   :  { %2712 = vsyncpa [#allocation22], 1 }
 0xd5d   :  { %2714 = vsyncpa [#allocation22 + $0x1], 1 }

</bundles_post_ra>
